<compile_context>
chip_gen: v6e
topology: v6e:2x2x1
jax: 0.10.0
libtpu: 0.0.40
codegen_flags: <defaults>
</compile_context>

<pallas_src>
import jax
import jax.numpy as jnp
from jax.experimental import pallas as pl
from jax.experimental.pallas import tpu as pltpu

# ---- small, TPU-friendly hyperparameters (same structure as the reference) ----
VOCAB_SIZE = 65          # len(chars) in the reference
VOCAB_PAD  = 128         # lane-dense lm_head width; sliced to VOCAB_SIZE outside
N_EMBD     = 128         # n_embd (scaled down from 384)
N_HEAD     = 4           # n_head (scaled down from 6)
HEAD_SIZE  = N_EMBD // N_HEAD
N_LAYER    = 2           # n_layer (scaled down from 6)
BLOCK_SIZE = 16          # block_size (scaled down from 256)
LN_EPS     = 1e-5
NEG_INF    = -1e30       # finite large-negative mask value (safer than -inf)
ATT_SCALE  = N_EMBD ** (-0.5)   # reference scales by n_embd**-0.5 (intentional)


# ------------------------------ Pallas kernel --------------------------------

def _layernorm(x, gamma, beta):
    mu = jnp.mean(x, axis=-1, keepdims=True)
    var = jnp.mean((x - mu) ** 2, axis=-1, keepdims=True)
    return (x - mu) * jax.lax.rsqrt(var + LN_EPS) * gamma + beta


def gpt_kernel(x_ref,
               ln1_g_ref, ln1_b_ref,
               wqkv_ref, wp_ref, bp_ref,
               ln2_g_ref, ln2_b_ref,
               w1_ref, b1_ref, w2_ref, b2_ref,
               lnf_g_ref, lnf_b_ref, wlm_ref, blm_ref,
               o_ref):
    """Full GPT forward for a block of Bt batch elements (block = (Bt, T, C))."""
    Bt, T, C = x_ref.shape
    M = Bt * T
    x = x_ref[...].reshape(M, C)                       # all rows folded into matmul M

    # causal mask, hoisted out of the layer loop (broadcast over heads)
    row = jax.lax.broadcasted_iota(jnp.int32, (T, T), 0)
    col = jax.lax.broadcasted_iota(jnp.int32, (T, T), 1)
    causal = (col <= row)[None, :, :]                  # (1, T, T)

    # static unroll over layers (fine for N_LAYER <= ~3; use fori_loop beyond)
    for li in range(N_LAYER):
        # ---- self-attention branch: x + sa(ln1(x)) ----
        xn = _layernorm(x, ln1_g_ref[li], ln1_b_ref[li]).astype(jnp.bfloat16)
        # fused QKV: (M, C) @ (C, 3C); attention scale pre-folded into q columns
        qkv = jnp.dot(xn, wqkv_ref[li], preferred_element_type=jnp.float32)
        q = qkv[:, :C]                                  # 128-lane aligned slices
        k = qkv[:, C:2 * C]
        v = qkv[:, 2 * C:3 * C]

        att_rows = []
        for b in range(Bt):                             # static, Bt is small
            sl = slice(b * T, (b + 1) * T)
            # (T, C) -> (H, T, hs) views; one batched contraction over all heads
            qh = q[sl].reshape(T, N_HEAD, HEAD_SIZE).transpose(1, 0, 2).astype(jnp.bfloat16)
            kh = k[sl].reshape(T, N_HEAD, HEAD_SIZE).transpose(1, 0, 2).astype(jnp.bfloat16)
            vh = v[sl].reshape(T, N_HEAD, HEAD_SIZE).transpose(1, 0, 2).astype(jnp.bfloat16)
            wei = jnp.einsum('hqd,hkd->hqk', qh, kh,
                             preferred_element_type=jnp.float32)      # (H, T, T)
            wei = jnp.where(causal, wei, NEG_INF)
            wei = wei - jnp.max(wei, axis=-1, keepdims=True)
            p = jnp.exp(wei)
            # approx reciprocal (EUP): ~1e-3 rel. deviation vs exact softmax
            p = p * pl.reciprocal(jnp.sum(p, axis=-1, keepdims=True), approx=True)
            out = jnp.einsum('hqk,hkd->hqd', p.astype(jnp.bfloat16), vh,
                             preferred_element_type=jnp.float32)      # (H, T, hs)
            att_rows.append(out.transpose(1, 0, 2).reshape(T, C))
        att = att_rows[0] if Bt == 1 else jnp.concatenate(att_rows, axis=0)

        sa = jnp.dot(att.astype(jnp.bfloat16), wp_ref[li],
                     preferred_element_type=jnp.float32) + bp_ref[li]
        x = x + sa

        # ---- feed-forward branch: x + ffwd(ln2(x)) ----
        xn2 = _layernorm(x, ln2_g_ref[li], ln2_b_ref[li]).astype(jnp.bfloat16)
        h1 = jnp.dot(xn2, w1_ref[li], preferred_element_type=jnp.float32) + b1_ref[li]
        h1 = jnp.maximum(h1, 0.0).astype(jnp.bfloat16)                 # ReLU
        ff = jnp.dot(h1, w2_ref[li], preferred_element_type=jnp.float32) + b2_ref[li]
        x = x + ff

    # ---- final LayerNorm + lm_head (padded to VOCAB_PAD lanes, lane-dense) ----
    xf = _layernorm(x, lnf_g_ref[...], lnf_b_ref[...]).astype(jnp.bfloat16)
    logits = jnp.dot(xf, wlm_ref[...], preferred_element_type=jnp.float32) + blm_ref[...]
    o_ref[...] = logits.reshape(Bt, T, VOCAB_PAD)


# ------------------------------ wrapper ---------------------------------------

def _const_spec(a):
    """Full-array block with constant index_map -> DMA'd into VMEM once.

    NOTE: at reference size, add pipeline_mode=pl.Buffered(1) to halve weight
    VMEM (no double-buffering needed for constant blocks).
    """
    n = a.ndim
    return pl.BlockSpec(a.shape, lambda b, _n=n: (0,) * _n)


def gpt_forward(idx, params):
    """Equivalent of GPTLLM.forward(idx, targets=None) -> (logits, None)."""
    B, T = idx.shape
    # Embedding gather + positional add as JAX glue (see TODO at top of file).
    tok_embd = jnp.take(params["tok_table"], idx, axis=0)            # (B, T, C)
    pos_embd = params["pos_table"][:T]                               # (T, C)
    x = (tok_embd + pos_embd[None, :, :]).astype(jnp.float32)

    # >=2 parallel grid steps when possible (keeps both v7x TCs busy); on
    # single-TC v5e/v6e the extra step is ~0.35us — negligible at this size.
    num_steps = 2 if (B >= 2 and B % 2 == 0) else 1
    Bt = B // num_steps

    args = (x,
            params["ln1_g"], params["ln1_b"],
            params["wqkv"], params["wp"], params["bp"],
            params["ln2_g"], params["ln2_b"],
            params["w1"], params["b1"], params["w2"], params["b2"],
            params["lnf_g"], params["lnf_b"], params["wlm"], params["blm"])
    in_specs = [pl.BlockSpec((Bt, T, N_EMBD), lambda b: (b, 0, 0))] + \
               [_const_spec(a) for a in args[1:]]

    logits_pad = pl.pallas_call(
        gpt_kernel,
        out_shape=jax.ShapeDtypeStruct((B, T, VOCAB_PAD), jnp.float32),
        grid=(num_steps,),
        in_specs=in_specs,
        out_specs=pl.BlockSpec((Bt, T, VOCAB_PAD), lambda b: (b, 0, 0)),
        compiler_params=pltpu.CompilerParams(
            dimension_semantics=("parallel",),
            vmem_limit_bytes=32 * 1024 * 1024),
    )(*args)

    logits = logits_pad[:, :, :VOCAB_SIZE]                           # drop pad lanes
    return logits, None


# ------------------------------ parameter init -------------------------------

def init_params(key):
    def normal(k, shape, scale=0.02):
        return (scale * jax.random.normal(k, shape)).astype(jnp.float32)

    keys = jax.random.split(key, 4 + N_LAYER)

    ln1_g, ln1_b, ln2_g, ln2_b = [], [], [], []
    wqkv, wp, bp = [], [], []
    w1, b1, w2, b2 = [], [], [], []
    for li in range(N_LAYER):
        lk = jax.random.split(keys[4 + li], 8)
        ln1_g.append(jnp.ones((1, N_EMBD), jnp.float32))
        ln1_b.append(jnp.zeros((1, N_EMBD), jnp.float32))
        wq = normal(lk[0], (N_EMBD, N_EMBD))
        wk = normal(lk[1], (N_EMBD, N_EMBD))
        wv = normal(lk[2], (N_EMBD, N_EMBD))
        # fused QKV weight; attention scale folded into the q columns (init-time)
        wqkv.append(jnp.concatenate([wq * ATT_SCALE, wk, wv], axis=-1)
                    .astype(jnp.bfloat16))                           # (C, 3C)
        wp.append(normal(lk[3], (N_EMBD, N_EMBD)).astype(jnp.bfloat16))
        bp.append(jnp.zeros((1, N_EMBD), jnp.float32))
        ln2_g.append(jnp.ones((1, N_EMBD), jnp.float32))
        ln2_b.append(jnp.zeros((1, N_EMBD), jnp.float32))
        w1.append(normal(lk[4], (N_EMBD, 4 * N_EMBD)).astype(jnp.bfloat16))
        b1.append(jnp.zeros((1, 4 * N_EMBD), jnp.float32))
        w2.append(normal(lk[5], (4 * N_EMBD, N_EMBD)).astype(jnp.bfloat16))
        b2.append(jnp.zeros((1, N_EMBD), jnp.float32))

    # lm_head padded to VOCAB_PAD lanes (extra columns zero, sliced off outside)
    wlm = jnp.zeros((N_EMBD, VOCAB_PAD), jnp.float32)
    wlm = wlm.at[:, :VOCAB_SIZE].set(normal(keys[2], (N_EMBD, VOCAB_SIZE)))
    wlm = wlm.astype(jnp.bfloat16)

    return {
        "tok_table": normal(keys[0], (VOCAB_SIZE, N_EMBD)),
        "pos_table": normal(keys[1], (BLOCK_SIZE, N_EMBD)),
        "ln1_g": jnp.stack(ln1_g), "ln1_b": jnp.stack(ln1_b),        # (L, 1, C)
        "wqkv": jnp.stack(wqkv),                                     # (L, C, 3C) bf16
        "wp": jnp.stack(wp), "bp": jnp.stack(bp),                    # (L, C, C), (L, 1, C)
        "ln2_g": jnp.stack(ln2_g), "ln2_b": jnp.stack(ln2_b),
        "w1": jnp.stack(w1), "b1": jnp.stack(b1),                    # (L, C, 4C), (L, 1, 4C)
        "w2": jnp.stack(w2), "b2": jnp.stack(b2),                    # (L, 4C, C), (L, 1, C)
        "lnf_g": jnp.ones((1, N_EMBD), jnp.float32),
        "lnf_b": jnp.zeros((1, N_EMBD), jnp.float32),
        "wlm": wlm,                                                  # (C, VOCAB_PAD) bf16
        "blm": jnp.zeros((1, VOCAB_PAD), jnp.float32),
    }


# ----------------------- pure-JAX reference (same precision) ------------------

def _ref_forward(idx, params):
    B, T = idx.shape
    C = N_EMBD
    x = (jnp.take(params["tok_table"], idx, axis=0)
         + params["pos_table"][:T][None, :, :]).astype(jnp.float32).reshape(B * T, C)

    def ln(v, g, b):
        mu = jnp.mean(v, -1, keepdims=True)
        var = jnp.mean((v - mu) ** 2, -1, keepdims=True)
        return (v - mu) * jax.lax.rsqrt(var + LN_EPS) * g + b

    mask = jnp.tril(jnp.ones((T, T), dtype=bool))[None]
    for li in range(N_LAYER):
        xn = ln(x, params["ln1_g"][li], params["ln1_b"][li]).astype(jnp.bfloat16)
        qkv = jnp.dot(xn, params["wqkv"][li], preferred_element_type=jnp.float32)
        q, k, v = qkv[:, :C], qkv[:, C:2 * C], qkv[:, 2 * C:]
        outs = []
        for b in range(B):
            sl = slice(b * T, (b + 1) * T)
            qh = q[sl].reshape(T, N_HEAD, HEAD_SIZE).transpose(1, 0, 2).astype(jnp.bfloat16)
            kh = k[sl].reshape(T, N_HEAD, HEAD_SIZE).transpose(1, 0, 2).astype(jnp.bfloat16)
            vh = v[sl].reshape(T, N_HEAD, HEAD_SIZE).transpose(1, 0, 2).astype(jnp.bfloat16)
            wei = jnp.einsum('hqd,hkd->hqk', qh, kh, preferred_element_type=jnp.float32)
            wei = jnp.where(mask, wei, NEG_INF)
            p = jax.nn.softmax(wei, axis=-1)
            out = jnp.einsum('hqk,hkd->hqd', p.astype(jnp.bfloat16), vh,
                             preferred_element_type=jnp.float32)
            outs.append(out.transpose(1, 0, 2).reshape(T, C))
        att = jnp.concatenate(outs, axis=0).astype(jnp.bfloat16)
        x = x + jnp.dot(att, params["wp"][li],
                        preferred_element_type=jnp.float32) + params["bp"][li]
        xn2 = ln(x, params["ln2_g"][li], params["ln2_b"][li]).astype(jnp.bfloat16)
        h1 = jnp.maximum(jnp.dot(xn2, params["w1"][li],
                                 preferred_element_type=jnp.float32)
                         + params["b1"][li], 0.0).astype(jnp.bfloat16)
        x = x + jnp.dot(h1, params["w2"][li],
                        preferred_element_type=jnp.float32) + params["b2"][li]
    xf = ln(x, params["lnf_g"], params["lnf_b"]).astype(jnp.bfloat16)
    logits = jnp.dot(xf, params["wlm"], preferred_element_type=jnp.float32) + params["blm"]
    return logits.reshape(B, T, VOCAB_PAD)[:, :, :VOCAB_SIZE]


# ------------------------------ main ------------------------------------------

if __name__ == "__main__":
    key = jax.random.PRNGKey(0)
    pkey, ikey = jax.random.split(key)
    params = init_params(pkey)

    B, T = 2, 8                                # T <= BLOCK_SIZE
    idx = jax.random.randint(ikey, (B, T), 0, VOCAB_SIZE, dtype=jnp.int32)

    logits, loss = gpt_forward(idx, params)
    logits = jax.block_until_ready(logits)

    assert logits.shape == (B, T, VOCAB_SIZE)
    assert loss is None
    assert bool(jnp.all(jnp.isfinite(logits)))

    # correctness vs matched-precision pure-JAX reference (approx softmax recip
    # is the only intended deviation)
    ref = _ref_forward(idx, params)
    max_err = float(jnp.max(jnp.abs(logits - ref)))
    assert max_err < 5e-2, f"kernel/reference mismatch: max|diff|={max_err}"

    print("KERNEL_OK")
</pallas_src>

<mosaic_0001>
module attributes {stable_mosaic.version = 11 : i64} {
  func.func @gpt_kernel(%arg0: i32, %arg1: memref<1x8x128xf32, #tpu.memory_space<vmem>>, %arg2: memref<2x1x128xf32, #tpu.memory_space<vmem>>, %arg3: memref<2x1x128xf32, #tpu.memory_space<vmem>>, %arg4: memref<2x128x384xbf16, #tpu.memory_space<vmem>>, %arg5: memref<2x128x128xbf16, #tpu.memory_space<vmem>>, %arg6: memref<2x1x128xf32, #tpu.memory_space<vmem>>, %arg7: memref<2x1x128xf32, #tpu.memory_space<vmem>>, %arg8: memref<2x1x128xf32, #tpu.memory_space<vmem>>, %arg9: memref<2x128x512xbf16, #tpu.memory_space<vmem>>, %arg10: memref<2x1x512xf32, #tpu.memory_space<vmem>>, %arg11: memref<2x512x128xbf16, #tpu.memory_space<vmem>>, %arg12: memref<2x1x128xf32, #tpu.memory_space<vmem>>, %arg13: memref<1x128xf32, #tpu.memory_space<vmem>>, %arg14: memref<1x128xf32, #tpu.memory_space<vmem>>, %arg15: memref<128x128xbf16, #tpu.memory_space<vmem>>, %arg16: memref<1x128xf32, #tpu.memory_space<vmem>>, %arg17: memref<1x8x128xf32, #tpu.memory_space<vmem>>) attributes {dimension_semantics = [#tpu.dimension_semantics<parallel>], iteration_bounds = array<i64: 2>, scalar_prefetch = 0 : i64, scratch_operands = 0 : i64, tpu.core_type = #tpu.core_type<tc>, window_params = [{transform_indices = @transform_0, window_bounds = array<i64: 1, 8, 128>}, {pipeline_mode = #tpu.pipeline_mode<synchronous>, transform_indices = @transform_1, window_bounds = array<i64: 2, 1, 128>}, {pipeline_mode = #tpu.pipeline_mode<synchronous>, transform_indices = @transform_2, window_bounds = array<i64: 2, 1, 128>}, {pipeline_mode = #tpu.pipeline_mode<synchronous>, transform_indices = @transform_3, window_bounds = array<i64: 2, 128, 384>}, {pipeline_mode = #tpu.pipeline_mode<synchronous>, transform_indices = @transform_4, window_bounds = array<i64: 2, 128, 128>}, {pipeline_mode = #tpu.pipeline_mode<synchronous>, transform_indices = @transform_5, window_bounds = array<i64: 2, 1, 128>}, {pipeline_mode = #tpu.pipeline_mode<synchronous>, transform_indices = @transform_6, window_bounds = array<i64: 2, 1, 128>}, {pipeline_mode = #tpu.pipeline_mode<synchronous>, transform_indices = @transform_7, window_bounds = array<i64: 2, 1, 128>}, {pipeline_mode = #tpu.pipeline_mode<synchronous>, transform_indices = @transform_8, window_bounds = array<i64: 2, 128, 512>}, {pipeline_mode = #tpu.pipeline_mode<synchronous>, transform_indices = @transform_9, window_bounds = array<i64: 2, 1, 512>}, {pipeline_mode = #tpu.pipeline_mode<synchronous>, transform_indices = @transform_10, window_bounds = array<i64: 2, 512, 128>}, {pipeline_mode = #tpu.pipeline_mode<synchronous>, transform_indices = @transform_11, window_bounds = array<i64: 2, 1, 128>}, {pipeline_mode = #tpu.pipeline_mode<synchronous>, transform_indices = @transform_12, window_bounds = array<i64: 1, 128>}, {pipeline_mode = #tpu.pipeline_mode<synchronous>, transform_indices = @transform_13, window_bounds = array<i64: 1, 128>}, {pipeline_mode = #tpu.pipeline_mode<synchronous>, transform_indices = @transform_14, window_bounds = array<i64: 128, 128>}, {pipeline_mode = #tpu.pipeline_mode<synchronous>, transform_indices = @transform_15, window_bounds = array<i64: 1, 128>}, {transform_indices = @transform_16, window_bounds = array<i64: 1, 8, 128>}]} {
    %c0 = arith.constant 0 : index
    %c0_0 = arith.constant 0 : index
    %c0_1 = arith.constant 0 : index
    %0 = vector.load %arg1[%c0, %c0_0, %c0_1] : memref<1x8x128xf32, #tpu.memory_space<vmem>>, vector<1x8x128xf32>
    %1 = vector.shape_cast %0 : vector<1x8x128xf32> to vector<8x128xf32>
    %2 = tpu.iota {dimensions = array<i32: 0>} : vector<8x8xi32>
    %3 = tpu.iota {dimensions = array<i32: 1>} : vector<8x8xi32>
    %4 = arith.cmpi sle, %3, %2 : vector<8x8xi32>
    %5 = vector.shape_cast %4 : vector<8x8xi1> to vector<1x8x8xi1>
    %c0_2 = arith.constant 0 : index
    %c0_3 = arith.constant 0 : index
    %c0_4 = arith.constant 0 : index
    %6 = vector.load %arg2[%c0_2, %c0_3, %c0_4] : memref<2x1x128xf32, #tpu.memory_space<vmem>>, vector<1x1x128xf32>
    %7 = vector.shape_cast %6 : vector<1x1x128xf32> to vector<1x128xf32>
    %c0_5 = arith.constant 0 : index
    %c0_6 = arith.constant 0 : index
    %c0_7 = arith.constant 0 : index
    %8 = vector.load %arg3[%c0_5, %c0_6, %c0_7] : memref<2x1x128xf32, #tpu.memory_space<vmem>>, vector<1x1x128xf32>
    %9 = vector.shape_cast %8 : vector<1x1x128xf32> to vector<1x128xf32>
    %cst = arith.constant dense<0.000000e+00> : vector<8xf32>
    %10 = vector.multi_reduction <add>, %1, %cst [1] : vector<8x128xf32> to vector<8xf32>
    %11 = vector.shape_cast %10 : vector<8xf32> to vector<8x1xf32>
    %cst_8 = arith.constant 1.280000e+02 : f32
    %12 = vector.broadcast %cst_8 : f32 to vector<8x1xf32>
    %13 = arith.divf %11, %12 : vector<8x1xf32>
    %14 = vector.broadcast %13 : vector<8x1xf32> to vector<8x128xf32>
    %15 = arith.subf %1, %14 : vector<8x128xf32>
    %16 = arith.mulf %15, %15 : vector<8x128xf32>
    %cst_9 = arith.constant dense<0.000000e+00> : vector<8xf32>
    %17 = vector.multi_reduction <add>, %16, %cst_9 [1] : vector<8x128xf32> to vector<8xf32>
    %18 = vector.shape_cast %17 : vector<8xf32> to vector<8x1xf32>
    %cst_10 = arith.constant 1.280000e+02 : f32
    %19 = vector.broadcast %cst_10 : f32 to vector<8x1xf32>
    %20 = arith.divf %18, %19 : vector<8x1xf32>
    %21 = vector.broadcast %13 : vector<8x1xf32> to vector<8x128xf32>
    %22 = arith.subf %1, %21 : vector<8x128xf32>
    %cst_11 = arith.constant 9.99999974E-6 : f32
    %23 = vector.broadcast %cst_11 : f32 to vector<8x1xf32>
    %24 = arith.addf %20, %23 : vector<8x1xf32>
    %25 = math.rsqrt %24 : vector<8x1xf32>
    %26 = vector.broadcast %25 : vector<8x1xf32> to vector<8x128xf32>
    %27 = arith.mulf %22, %26 : vector<8x128xf32>
    %28 = vector.broadcast %7 : vector<1x128xf32> to vector<8x128xf32>
    %29 = arith.mulf %27, %28 : vector<8x128xf32>
    %30 = vector.broadcast %9 : vector<1x128xf32> to vector<8x128xf32>
    %31 = arith.addf %29, %30 : vector<8x128xf32>
    %32 = arith.truncf %31 : vector<8x128xf32> to vector<8x128xbf16>
    %c0_12 = arith.constant 0 : index
    %c0_13 = arith.constant 0 : index
    %c0_14 = arith.constant 0 : index
    %33 = vector.load %arg4[%c0_12, %c0_13, %c0_14] : memref<2x128x384xbf16, #tpu.memory_space<vmem>>, vector<1x128x384xbf16>
    %34 = vector.shape_cast %33 : vector<1x128x384xbf16> to vector<128x384xbf16>
    %cst_15 = arith.constant dense<0.000000e+00> : vector<8x384xf32>
    %35 = tpu.matmul %32, %34, %cst_15 {dimension_numbers = #tpu.dot_dimension_numbers<[1], [0], [0], [1], [0, 0, 1, 1], [], []>} : vector<8x128xbf16>, vector<128x384xbf16>, vector<8x384xf32> -> vector<8x384xf32>
    %36 = vector.extract_strided_slice %35 {offsets = [0, 0], sizes = [8, 128], strides = [1, 1]} : vector<8x384xf32> to vector<8x128xf32>
    %37 = vector.extract_strided_slice %35 {offsets = [0, 128], sizes = [8, 128], strides = [1, 1]} : vector<8x384xf32> to vector<8x128xf32>
    %38 = vector.extract_strided_slice %35 {offsets = [0, 256], sizes = [8, 128], strides = [1, 1]} : vector<8x384xf32> to vector<8x128xf32>
    %39 = vector.shape_cast %36 : vector<8x128xf32> to vector<8x4x32xf32>
    %40 = tpu.transpose %39, [1, 0, 2] : vector<8x4x32xf32> -> vector<4x8x32xf32>
    %41 = arith.truncf %40 : vector<4x8x32xf32> to vector<4x8x32xbf16>
    %42 = vector.shape_cast %37 : vector<8x128xf32> to vector<8x4x32xf32>
    %43 = tpu.transpose %42, [1, 0, 2] : vector<8x4x32xf32> -> vector<4x8x32xf32>
    %44 = arith.truncf %43 : vector<4x8x32xf32> to vector<4x8x32xbf16>
    %45 = vector.shape_cast %38 : vector<8x128xf32> to vector<8x4x32xf32>
    %46 = tpu.transpose %45, [1, 0, 2] : vector<8x4x32xf32> -> vector<4x8x32xf32>
    %47 = arith.truncf %46 : vector<4x8x32xf32> to vector<4x8x32xbf16>
    "tpu.trace_start"() <{level = 10 : i32, message = "hqd,hkd->hqk"}> : () -> ()
    %cst_16 = arith.constant dense<0.000000e+00> : vector<4x8x8xf32>
    %48 = tpu.matmul %41, %44, %cst_16 {dimension_numbers = #tpu.dot_dimension_numbers<[2], [2], [1], [1], [0, 0, 0, 1, 1, 1], [0], [0]>} : vector<4x8x32xbf16>, vector<4x8x32xbf16>, vector<4x8x8xf32> -> vector<4x8x8xf32>
    %cst_17 = arith.constant -1.000000e+30 : f32
    "tpu.trace_stop"() : () -> ()
    %49 = vector.shape_cast %5 : vector<1x8x8xi1> to vector<1x8x8xi1>
    %50 = vector.broadcast %49 : vector<1x8x8xi1> to vector<4x8x8xi1>
    %51 = vector.broadcast %cst_17 : f32 to vector<4x8x8xf32>
    %52 = arith.select %50, %48, %51 : vector<4x8x8xi1>, vector<4x8x8xf32>
    %cst_18 = arith.constant dense<0xFF800000> : vector<4x8xf32>
    %53 = vector.multi_reduction <maximumf>, %52, %cst_18 [2] : vector<4x8x8xf32> to vector<4x8xf32>
    %54 = vector.shape_cast %53 : vector<4x8xf32> to vector<4x8x1xf32>
    %55 = vector.broadcast %54 : vector<4x8x1xf32> to vector<4x8x8xf32>
    %56 = arith.subf %52, %55 : vector<4x8x8xf32>
    %57 = math.exp %56 : vector<4x8x8xf32>
    %cst_19 = arith.constant dense<0.000000e+00> : vector<4x8xf32>
    %58 = vector.multi_reduction <add>, %57, %cst_19 [2] : vector<4x8x8xf32> to vector<4x8xf32>
    %59 = vector.shape_cast %58 : vector<4x8xf32> to vector<4x8x1xf32>
    %60 = tpu.reciprocal %59 {approx = true} : vector<4x8x1xf32> -> vector<4x8x1xf32>
    %61 = vector.broadcast %60 : vector<4x8x1xf32> to vector<4x8x8xf32>
    %62 = arith.mulf %57, %61 : vector<4x8x8xf32>
    %63 = arith.truncf %62 : vector<4x8x8xf32> to vector<4x8x8xbf16>
    "tpu.trace_start"() <{level = 10 : i32, message = "hqk,hkd->hqd"}> : () -> ()
    %cst_20 = arith.constant dense<0.000000e+00> : vector<4x8x32xf32>
    %64 = tpu.matmul %63, %47, %cst_20 {dimension_numbers = #tpu.dot_dimension_numbers<[2], [1], [1], [2], [0, 0, 0, 1, 1, 2], [0], [0]>} : vector<4x8x8xbf16>, vector<4x8x32xbf16>, vector<4x8x32xf32> -> vector<4x8x32xf32>
    "tpu.trace_stop"() : () -> ()
    %65 = tpu.transpose %64, [1, 0, 2] : vector<4x8x32xf32> -> vector<8x4x32xf32>
    %66 = vector.shape_cast %65 : vector<8x4x32xf32> to vector<8x128xf32>
    %67 = arith.truncf %66 : vector<8x128xf32> to vector<8x128xbf16>
    %c0_21 = arith.constant 0 : index
    %c0_22 = arith.constant 0 : index
    %c0_23 = arith.constant 0 : index
    %68 = vector.load %arg5[%c0_21, %c0_22, %c0_23] : memref<2x128x128xbf16, #tpu.memory_space<vmem>>, vector<1x128x128xbf16>
    %69 = vector.shape_cast %68 : vector<1x128x128xbf16> to vector<128x128xbf16>
    %cst_24 = arith.constant dense<0.000000e+00> : vector<8x128xf32>
    %70 = tpu.matmul %67, %69, %cst_24 {dimension_numbers = #tpu.dot_dimension_numbers<[1], [0], [0], [1], [0, 0, 1, 1], [], []>} : vector<8x128xbf16>, vector<128x128xbf16>, vector<8x128xf32> -> vector<8x128xf32>
    %c0_25 = arith.constant 0 : index
    %c0_26 = arith.constant 0 : index
    %c0_27 = arith.constant 0 : index
    %71 = vector.load %arg6[%c0_25, %c0_26, %c0_27] : memref<2x1x128xf32, #tpu.memory_space<vmem>>, vector<1x1x128xf32>
    %72 = vector.shape_cast %71 : vector<1x1x128xf32> to vector<1x128xf32>
    %73 = vector.broadcast %72 : vector<1x128xf32> to vector<8x128xf32>
    %74 = arith.addf %70, %73 : vector<8x128xf32>
    %75 = arith.addf %1, %74 : vector<8x128xf32>
    %c0_28 = arith.constant 0 : index
    %c0_29 = arith.constant 0 : index
    %c0_30 = arith.constant 0 : index
    %76 = vector.load %arg7[%c0_28, %c0_29, %c0_30] : memref<2x1x128xf32, #tpu.memory_space<vmem>>, vector<1x1x128xf32>
    %77 = vector.shape_cast %76 : vector<1x1x128xf32> to vector<1x128xf32>
    %c0_31 = arith.constant 0 : index
    %c0_32 = arith.constant 0 : index
    %c0_33 = arith.constant 0 : index
    %78 = vector.load %arg8[%c0_31, %c0_32, %c0_33] : memref<2x1x128xf32, #tpu.memory_space<vmem>>, vector<1x1x128xf32>
    %79 = vector.shape_cast %78 : vector<1x1x128xf32> to vector<1x128xf32>
    %cst_34 = arith.constant dense<0.000000e+00> : vector<8xf32>
    %80 = vector.multi_reduction <add>, %75, %cst_34 [1] : vector<8x128xf32> to vector<8xf32>
    %81 = vector.shape_cast %80 : vector<8xf32> to vector<8x1xf32>
    %cst_35 = arith.constant 1.280000e+02 : f32
    %82 = vector.broadcast %cst_35 : f32 to vector<8x1xf32>
    %83 = arith.divf %81, %82 : vector<8x1xf32>
    %84 = vector.broadcast %83 : vector<8x1xf32> to vector<8x128xf32>
    %85 = arith.subf %75, %84 : vector<8x128xf32>
    %86 = arith.mulf %85, %85 : vector<8x128xf32>
    %cst_36 = arith.constant dense<0.000000e+00> : vector<8xf32>
    %87 = vector.multi_reduction <add>, %86, %cst_36 [1] : vector<8x128xf32> to vector<8xf32>
    %88 = vector.shape_cast %87 : vector<8xf32> to vector<8x1xf32>
    %cst_37 = arith.constant 1.280000e+02 : f32
    %89 = vector.broadcast %cst_37 : f32 to vector<8x1xf32>
    %90 = arith.divf %88, %89 : vector<8x1xf32>
    %91 = vector.broadcast %83 : vector<8x1xf32> to vector<8x128xf32>
    %92 = arith.subf %75, %91 : vector<8x128xf32>
    %cst_38 = arith.constant 9.99999974E-6 : f32
    %93 = vector.broadcast %cst_38 : f32 to vector<8x1xf32>
    %94 = arith.addf %90, %93 : vector<8x1xf32>
    %95 = math.rsqrt %94 : vector<8x1xf32>
    %96 = vector.broadcast %95 : vector<8x1xf32> to vector<8x128xf32>
    %97 = arith.mulf %92, %96 : vector<8x128xf32>
    %98 = vector.broadcast %77 : vector<1x128xf32> to vector<8x128xf32>
    %99 = arith.mulf %97, %98 : vector<8x128xf32>
    %100 = vector.broadcast %79 : vector<1x128xf32> to vector<8x128xf32>
    %101 = arith.addf %99, %100 : vector<8x128xf32>
    %102 = arith.truncf %101 : vector<8x128xf32> to vector<8x128xbf16>
    %c0_39 = arith.constant 0 : index
    %c0_40 = arith.constant 0 : index
    %c0_41 = arith.constant 0 : index
    %103 = vector.load %arg9[%c0_39, %c0_40, %c0_41] : memref<2x128x512xbf16, #tpu.memory_space<vmem>>, vector<1x128x512xbf16>
    %104 = vector.shape_cast %103 : vector<1x128x512xbf16> to vector<128x512xbf16>
    %cst_42 = arith.constant dense<0.000000e+00> : vector<8x512xf32>
    %105 = tpu.matmul %102, %104, %cst_42 {dimension_numbers = #tpu.dot_dimension_numbers<[1], [0], [0], [1], [0, 0, 1, 1], [], []>} : vector<8x128xbf16>, vector<128x512xbf16>, vector<8x512xf32> -> vector<8x512xf32>
    %c0_43 = arith.constant 0 : index
    %c0_44 = arith.constant 0 : index
    %c0_45 = arith.constant 0 : index
    %106 = vector.load %arg10[%c0_43, %c0_44, %c0_45] : memref<2x1x512xf32, #tpu.memory_space<vmem>>, vector<1x1x512xf32>
    %107 = vector.shape_cast %106 : vector<1x1x512xf32> to vector<1x512xf32>
    %108 = vector.broadcast %107 : vector<1x512xf32> to vector<8x512xf32>
    %109 = arith.addf %105, %108 : vector<8x512xf32>
    %cst_46 = arith.constant 0.000000e+00 : f32
    %110 = vector.broadcast %cst_46 : f32 to vector<8x512xf32>
    %111 = arith.maximumf %109, %110 : vector<8x512xf32>
    %112 = arith.truncf %111 : vector<8x512xf32> to vector<8x512xbf16>
    %c0_47 = arith.constant 0 : index
    %c0_48 = arith.constant 0 : index
    %c0_49 = arith.constant 0 : index
    %113 = vector.load %arg11[%c0_47, %c0_48, %c0_49] : memref<2x512x128xbf16, #tpu.memory_space<vmem>>, vector<1x512x128xbf16>
    %114 = vector.shape_cast %113 : vector<1x512x128xbf16> to vector<512x128xbf16>
    %cst_50 = arith.constant dense<0.000000e+00> : vector<8x128xf32>
    %115 = tpu.matmul %112, %114, %cst_50 {dimension_numbers = #tpu.dot_dimension_numbers<[1], [0], [0], [1], [0, 0, 1, 1], [], []>} : vector<8x512xbf16>, vector<512x128xbf16>, vector<8x128xf32> -> vector<8x128xf32>
    %c0_51 = arith.constant 0 : index
    %c0_52 = arith.constant 0 : index
    %c0_53 = arith.constant 0 : index
    %116 = vector.load %arg12[%c0_51, %c0_52, %c0_53] : memref<2x1x128xf32, #tpu.memory_space<vmem>>, vector<1x1x128xf32>
    %117 = vector.shape_cast %116 : vector<1x1x128xf32> to vector<1x128xf32>
    %118 = vector.broadcast %117 : vector<1x128xf32> to vector<8x128xf32>
    %119 = arith.addf %115, %118 : vector<8x128xf32>
    %120 = arith.addf %75, %119 : vector<8x128xf32>
    %c1 = arith.constant 1 : index
    %c0_54 = arith.constant 0 : index
    %c0_55 = arith.constant 0 : index
    %121 = vector.load %arg2[%c1, %c0_54, %c0_55] : memref<2x1x128xf32, #tpu.memory_space<vmem>>, vector<1x1x128xf32>
    %122 = vector.shape_cast %121 : vector<1x1x128xf32> to vector<1x128xf32>
    %c1_56 = arith.constant 1 : index
    %c0_57 = arith.constant 0 : index
    %c0_58 = arith.constant 0 : index
    %123 = vector.load %arg3[%c1_56, %c0_57, %c0_58] : memref<2x1x128xf32, #tpu.memory_space<vmem>>, vector<1x1x128xf32>
    %124 = vector.shape_cast %123 : vector<1x1x128xf32> to vector<1x128xf32>
    %cst_59 = arith.constant dense<0.000000e+00> : vector<8xf32>
    %125 = vector.multi_reduction <add>, %120, %cst_59 [1] : vector<8x128xf32> to vector<8xf32>
    %126 = vector.shape_cast %125 : vector<8xf32> to vector<8x1xf32>
    %cst_60 = arith.constant 1.280000e+02 : f32
    %127 = vector.broadcast %cst_60 : f32 to vector<8x1xf32>
    %128 = arith.divf %126, %127 : vector<8x1xf32>
    %129 = vector.broadcast %128 : vector<8x1xf32> to vector<8x128xf32>
    %130 = arith.subf %120, %129 : vector<8x128xf32>
    %131 = arith.mulf %130, %130 : vector<8x128xf32>
    %cst_61 = arith.constant dense<0.000000e+00> : vector<8xf32>
    %132 = vector.multi_reduction <add>, %131, %cst_61 [1] : vector<8x128xf32> to vector<8xf32>
    %133 = vector.shape_cast %132 : vector<8xf32> to vector<8x1xf32>
    %cst_62 = arith.constant 1.280000e+02 : f32
    %134 = vector.broadcast %cst_62 : f32 to vector<8x1xf32>
    %135 = arith.divf %133, %134 : vector<8x1xf32>
    %136 = vector.broadcast %128 : vector<8x1xf32> to vector<8x128xf32>
    %137 = arith.subf %120, %136 : vector<8x128xf32>
    %cst_63 = arith.constant 9.99999974E-6 : f32
    %138 = vector.broadcast %cst_63 : f32 to vector<8x1xf32>
    %139 = arith.addf %135, %138 : vector<8x1xf32>
    %140 = math.rsqrt %139 : vector<8x1xf32>
    %141 = vector.broadcast %140 : vector<8x1xf32> to vector<8x128xf32>
    %142 = arith.mulf %137, %141 : vector<8x128xf32>
    %143 = vector.broadcast %122 : vector<1x128xf32> to vector<8x128xf32>
    %144 = arith.mulf %142, %143 : vector<8x128xf32>
    %145 = vector.broadcast %124 : vector<1x128xf32> to vector<8x128xf32>
    %146 = arith.addf %144, %145 : vector<8x128xf32>
    %147 = arith.truncf %146 : vector<8x128xf32> to vector<8x128xbf16>
    %c1_64 = arith.constant 1 : index
    %c0_65 = arith.constant 0 : index
    %c0_66 = arith.constant 0 : index
    %148 = vector.load %arg4[%c1_64, %c0_65, %c0_66] : memref<2x128x384xbf16, #tpu.memory_space<vmem>>, vector<1x128x384xbf16>
    %149 = vector.shape_cast %148 : vector<1x128x384xbf16> to vector<128x384xbf16>
    %cst_67 = arith.constant dense<0.000000e+00> : vector<8x384xf32>
    %150 = tpu.matmul %147, %149, %cst_67 {dimension_numbers = #tpu.dot_dimension_numbers<[1], [0], [0], [1], [0, 0, 1, 1], [], []>} : vector<8x128xbf16>, vector<128x384xbf16>, vector<8x384xf32> -> vector<8x384xf32>
    %151 = vector.extract_strided_slice %150 {offsets = [0, 0], sizes = [8, 128], strides = [1, 1]} : vector<8x384xf32> to vector<8x128xf32>
    %152 = vector.extract_strided_slice %150 {offsets = [0, 128], sizes = [8, 128], strides = [1, 1]} : vector<8x384xf32> to vector<8x128xf32>
    %153 = vector.extract_strided_slice %150 {offsets = [0, 256], sizes = [8, 128], strides = [1, 1]} : vector<8x384xf32> to vector<8x128xf32>
    %154 = vector.shape_cast %151 : vector<8x128xf32> to vector<8x4x32xf32>
    %155 = tpu.transpose %154, [1, 0, 2] : vector<8x4x32xf32> -> vector<4x8x32xf32>
    %156 = arith.truncf %155 : vector<4x8x32xf32> to vector<4x8x32xbf16>
    %157 = vector.shape_cast %152 : vector<8x128xf32> to vector<8x4x32xf32>
    %158 = tpu.transpose %157, [1, 0, 2] : vector<8x4x32xf32> -> vector<4x8x32xf32>
    %159 = arith.truncf %158 : vector<4x8x32xf32> to vector<4x8x32xbf16>
    %160 = vector.shape_cast %153 : vector<8x128xf32> to vector<8x4x32xf32>
    %161 = tpu.transpose %160, [1, 0, 2] : vector<8x4x32xf32> -> vector<4x8x32xf32>
    %162 = arith.truncf %161 : vector<4x8x32xf32> to vector<4x8x32xbf16>
    "tpu.trace_start"() <{level = 10 : i32, message = "hqd,hkd->hqk"}> : () -> ()
    %cst_68 = arith.constant dense<0.000000e+00> : vector<4x8x8xf32>
    %163 = tpu.matmul %156, %159, %cst_68 {dimension_numbers = #tpu.dot_dimension_numbers<[2], [2], [1], [1], [0, 0, 0, 1, 1, 1], [0], [0]>} : vector<4x8x32xbf16>, vector<4x8x32xbf16>, vector<4x8x8xf32> -> vector<4x8x8xf32>
    %cst_69 = arith.constant -1.000000e+30 : f32
    "tpu.trace_stop"() : () -> ()
    %164 = vector.shape_cast %5 : vector<1x8x8xi1> to vector<1x8x8xi1>
    %165 = vector.broadcast %164 : vector<1x8x8xi1> to vector<4x8x8xi1>
    %166 = vector.broadcast %cst_69 : f32 to vector<4x8x8xf32>
    %167 = arith.select %165, %163, %166 : vector<4x8x8xi1>, vector<4x8x8xf32>
    %cst_70 = arith.constant dense<0xFF800000> : vector<4x8xf32>
    %168 = vector.multi_reduction <maximumf>, %167, %cst_70 [2] : vector<4x8x8xf32> to vector<4x8xf32>
    %169 = vector.shape_cast %168 : vector<4x8xf32> to vector<4x8x1xf32>
    %170 = vector.broadcast %169 : vector<4x8x1xf32> to vector<4x8x8xf32>
    %171 = arith.subf %167, %170 : vector<4x8x8xf32>
    %172 = math.exp %171 : vector<4x8x8xf32>
    %cst_71 = arith.constant dense<0.000000e+00> : vector<4x8xf32>
    %173 = vector.multi_reduction <add>, %172, %cst_71 [2] : vector<4x8x8xf32> to vector<4x8xf32>
    %174 = vector.shape_cast %173 : vector<4x8xf32> to vector<4x8x1xf32>
    %175 = tpu.reciprocal %174 {approx = true} : vector<4x8x1xf32> -> vector<4x8x1xf32>
    %176 = vector.broadcast %175 : vector<4x8x1xf32> to vector<4x8x8xf32>
    %177 = arith.mulf %172, %176 : vector<4x8x8xf32>
    %178 = arith.truncf %177 : vector<4x8x8xf32> to vector<4x8x8xbf16>
    "tpu.trace_start"() <{level = 10 : i32, message = "hqk,hkd->hqd"}> : () -> ()
    %cst_72 = arith.constant dense<0.000000e+00> : vector<4x8x32xf32>
    %179 = tpu.matmul %178, %162, %cst_72 {dimension_numbers = #tpu.dot_dimension_numbers<[2], [1], [1], [2], [0, 0, 0, 1, 1, 2], [0], [0]>} : vector<4x8x8xbf16>, vector<4x8x32xbf16>, vector<4x8x32xf32> -> vector<4x8x32xf32>
    "tpu.trace_stop"() : () -> ()
    %180 = tpu.transpose %179, [1, 0, 2] : vector<4x8x32xf32> -> vector<8x4x32xf32>
    %181 = vector.shape_cast %180 : vector<8x4x32xf32> to vector<8x128xf32>
    %182 = arith.truncf %181 : vector<8x128xf32> to vector<8x128xbf16>
    %c1_73 = arith.constant 1 : index
    %c0_74 = arith.constant 0 : index
    %c0_75 = arith.constant 0 : index
    %183 = vector.load %arg5[%c1_73, %c0_74, %c0_75] : memref<2x128x128xbf16, #tpu.memory_space<vmem>>, vector<1x128x128xbf16>
    %184 = vector.shape_cast %183 : vector<1x128x128xbf16> to vector<128x128xbf16>
    %cst_76 = arith.constant dense<0.000000e+00> : vector<8x128xf32>
    %185 = tpu.matmul %182, %184, %cst_76 {dimension_numbers = #tpu.dot_dimension_numbers<[1], [0], [0], [1], [0, 0, 1, 1], [], []>} : vector<8x128xbf16>, vector<128x128xbf16>, vector<8x128xf32> -> vector<8x128xf32>
    %c1_77 = arith.constant 1 : index
    %c0_78 = arith.constant 0 : index
    %c0_79 = arith.constant 0 : index
    %186 = vector.load %arg6[%c1_77, %c0_78, %c0_79] : memref<2x1x128xf32, #tpu.memory_space<vmem>>, vector<1x1x128xf32>
    %187 = vector.shape_cast %186 : vector<1x1x128xf32> to vector<1x128xf32>
    %188 = vector.broadcast %187 : vector<1x128xf32> to vector<8x128xf32>
    %189 = arith.addf %185, %188 : vector<8x128xf32>
    %190 = arith.addf %120, %189 : vector<8x128xf32>
    %c1_80 = arith.constant 1 : index
    %c0_81 = arith.constant 0 : index
    %c0_82 = arith.constant 0 : index
    %191 = vector.load %arg7[%c1_80, %c0_81, %c0_82] : memref<2x1x128xf32, #tpu.memory_space<vmem>>, vector<1x1x128xf32>
    %192 = vector.shape_cast %191 : vector<1x1x128xf32> to vector<1x128xf32>
    %c1_83 = arith.constant 1 : index
    %c0_84 = arith.constant 0 : index
    %c0_85 = arith.constant 0 : index
    %193 = vector.load %arg8[%c1_83, %c0_84, %c0_85] : memref<2x1x128xf32, #tpu.memory_space<vmem>>, vector<1x1x128xf32>
    %194 = vector.shape_cast %193 : vector<1x1x128xf32> to vector<1x128xf32>
    %cst_86 = arith.constant dense<0.000000e+00> : vector<8xf32>
    %195 = vector.multi_reduction <add>, %190, %cst_86 [1] : vector<8x128xf32> to vector<8xf32>
    %196 = vector.shape_cast %195 : vector<8xf32> to vector<8x1xf32>
    %cst_87 = arith.constant 1.280000e+02 : f32
    %197 = vector.broadcast %cst_87 : f32 to vector<8x1xf32>
    %198 = arith.divf %196, %197 : vector<8x1xf32>
    %199 = vector.broadcast %198 : vector<8x1xf32> to vector<8x128xf32>
    %200 = arith.subf %190, %199 : vector<8x128xf32>
    %201 = arith.mulf %200, %200 : vector<8x128xf32>
    %cst_88 = arith.constant dense<0.000000e+00> : vector<8xf32>
    %202 = vector.multi_reduction <add>, %201, %cst_88 [1] : vector<8x128xf32> to vector<8xf32>
    %203 = vector.shape_cast %202 : vector<8xf32> to vector<8x1xf32>
    %cst_89 = arith.constant 1.280000e+02 : f32
    %204 = vector.broadcast %cst_89 : f32 to vector<8x1xf32>
    %205 = arith.divf %203, %204 : vector<8x1xf32>
    %206 = vector.broadcast %198 : vector<8x1xf32> to vector<8x128xf32>
    %207 = arith.subf %190, %206 : vector<8x128xf32>
    %cst_90 = arith.constant 9.99999974E-6 : f32
    %208 = vector.broadcast %cst_90 : f32 to vector<8x1xf32>
    %209 = arith.addf %205, %208 : vector<8x1xf32>
    %210 = math.rsqrt %209 : vector<8x1xf32>
    %211 = vector.broadcast %210 : vector<8x1xf32> to vector<8x128xf32>
    %212 = arith.mulf %207, %211 : vector<8x128xf32>
    %213 = vector.broadcast %192 : vector<1x128xf32> to vector<8x128xf32>
    %214 = arith.mulf %212, %213 : vector<8x128xf32>
    %215 = vector.broadcast %194 : vector<1x128xf32> to vector<8x128xf32>
    %216 = arith.addf %214, %215 : vector<8x128xf32>
    %217 = arith.truncf %216 : vector<8x128xf32> to vector<8x128xbf16>
    %c1_91 = arith.constant 1 : index
    %c0_92 = arith.constant 0 : index
    %c0_93 = arith.constant 0 : index
    %218 = vector.load %arg9[%c1_91, %c0_92, %c0_93] : memref<2x128x512xbf16, #tpu.memory_space<vmem>>, vector<1x128x512xbf16>
    %219 = vector.shape_cast %218 : vector<1x128x512xbf16> to vector<128x512xbf16>
    %cst_94 = arith.constant dense<0.000000e+00> : vector<8x512xf32>
    %220 = tpu.matmul %217, %219, %cst_94 {dimension_numbers = #tpu.dot_dimension_numbers<[1], [0], [0], [1], [0, 0, 1, 1], [], []>} : vector<8x128xbf16>, vector<128x512xbf16>, vector<8x512xf32> -> vector<8x512xf32>
    %c1_95 = arith.constant 1 : index
    %c0_96 = arith.constant 0 : index
    %c0_97 = arith.constant 0 : index
    %221 = vector.load %arg10[%c1_95, %c0_96, %c0_97] : memref<2x1x512xf32, #tpu.memory_space<vmem>>, vector<1x1x512xf32>
    %222 = vector.shape_cast %221 : vector<1x1x512xf32> to vector<1x512xf32>
    %223 = vector.broadcast %222 : vector<1x512xf32> to vector<8x512xf32>
    %224 = arith.addf %220, %223 : vector<8x512xf32>
    %cst_98 = arith.constant 0.000000e+00 : f32
    %225 = vector.broadcast %cst_98 : f32 to vector<8x512xf32>
    %226 = arith.maximumf %224, %225 : vector<8x512xf32>
    %227 = arith.truncf %226 : vector<8x512xf32> to vector<8x512xbf16>
    %c1_99 = arith.constant 1 : index
    %c0_100 = arith.constant 0 : index
    %c0_101 = arith.constant 0 : index
    %228 = vector.load %arg11[%c1_99, %c0_100, %c0_101] : memref<2x512x128xbf16, #tpu.memory_space<vmem>>, vector<1x512x128xbf16>
    %229 = vector.shape_cast %228 : vector<1x512x128xbf16> to vector<512x128xbf16>
    %cst_102 = arith.constant dense<0.000000e+00> : vector<8x128xf32>
    %230 = tpu.matmul %227, %229, %cst_102 {dimension_numbers = #tpu.dot_dimension_numbers<[1], [0], [0], [1], [0, 0, 1, 1], [], []>} : vector<8x512xbf16>, vector<512x128xbf16>, vector<8x128xf32> -> vector<8x128xf32>
    %c1_103 = arith.constant 1 : index
    %c0_104 = arith.constant 0 : index
    %c0_105 = arith.constant 0 : index
    %231 = vector.load %arg12[%c1_103, %c0_104, %c0_105] : memref<2x1x128xf32, #tpu.memory_space<vmem>>, vector<1x1x128xf32>
    %232 = vector.shape_cast %231 : vector<1x1x128xf32> to vector<1x128xf32>
    %233 = vector.broadcast %232 : vector<1x128xf32> to vector<8x128xf32>
    %234 = arith.addf %230, %233 : vector<8x128xf32>
    %235 = arith.addf %190, %234 : vector<8x128xf32>
    %c0_106 = arith.constant 0 : index
    %c0_107 = arith.constant 0 : index
    %236 = vector.load %arg13[%c0_106, %c0_107] : memref<1x128xf32, #tpu.memory_space<vmem>>, vector<1x128xf32>
    %c0_108 = arith.constant 0 : index
    %c0_109 = arith.constant 0 : index
    %237 = vector.load %arg14[%c0_108, %c0_109] : memref<1x128xf32, #tpu.memory_space<vmem>>, vector<1x128xf32>
    %cst_110 = arith.constant dense<0.000000e+00> : vector<8xf32>
    %238 = vector.multi_reduction <add>, %235, %cst_110 [1] : vector<8x128xf32> to vector<8xf32>
    %239 = vector.shape_cast %238 : vector<8xf32> to vector<8x1xf32>
    %cst_111 = arith.constant 1.280000e+02 : f32
    %240 = vector.broadcast %cst_111 : f32 to vector<8x1xf32>
    %241 = arith.divf %239, %240 : vector<8x1xf32>
    %242 = vector.broadcast %241 : vector<8x1xf32> to vector<8x128xf32>
    %243 = arith.subf %235, %242 : vector<8x128xf32>
    %244 = arith.mulf %243, %243 : vector<8x128xf32>
    %cst_112 = arith.constant dense<0.000000e+00> : vector<8xf32>
    %245 = vector.multi_reduction <add>, %244, %cst_112 [1] : vector<8x128xf32> to vector<8xf32>
    %246 = vector.shape_cast %245 : vector<8xf32> to vector<8x1xf32>
    %cst_113 = arith.constant 1.280000e+02 : f32
    %247 = vector.broadcast %cst_113 : f32 to vector<8x1xf32>
    %248 = arith.divf %246, %247 : vector<8x1xf32>
    %249 = vector.broadcast %241 : vector<8x1xf32> to vector<8x128xf32>
    %250 = arith.subf %235, %249 : vector<8x128xf32>
    %cst_114 = arith.constant 9.99999974E-6 : f32
    %251 = vector.broadcast %cst_114 : f32 to vector<8x1xf32>
    %252 = arith.addf %248, %251 : vector<8x1xf32>
    %253 = math.rsqrt %252 : vector<8x1xf32>
    %254 = vector.broadcast %253 : vector<8x1xf32> to vector<8x128xf32>
    %255 = arith.mulf %250, %254 : vector<8x128xf32>
    %256 = vector.broadcast %236 : vector<1x128xf32> to vector<8x128xf32>
    %257 = arith.mulf %255, %256 : vector<8x128xf32>
    %258 = vector.broadcast %237 : vector<1x128xf32> to vector<8x128xf32>
    %259 = arith.addf %257, %258 : vector<8x128xf32>
    %260 = arith.truncf %259 : vector<8x128xf32> to vector<8x128xbf16>
    %c0_115 = arith.constant 0 : index
    %c0_116 = arith.constant 0 : index
    %261 = vector.load %arg15[%c0_115, %c0_116] : memref<128x128xbf16, #tpu.memory_space<vmem>>, vector<128x128xbf16>
    %cst_117 = arith.constant dense<0.000000e+00> : vector<8x128xf32>
    %262 = tpu.matmul %260, %261, %cst_117 {dimension_numbers = #tpu.dot_dimension_numbers<[1], [0], [0], [1], [0, 0, 1, 1], [], []>} : vector<8x128xbf16>, vector<128x128xbf16>, vector<8x128xf32> -> vector<8x128xf32>
    %c0_118 = arith.constant 0 : index
    %c0_119 = arith.constant 0 : index
    %263 = vector.load %arg16[%c0_118, %c0_119] : memref<1x128xf32, #tpu.memory_space<vmem>>, vector<1x128xf32>
    %264 = vector.broadcast %263 : vector<1x128xf32> to vector<8x128xf32>
    %265 = arith.addf %262, %264 : vector<8x128xf32>
    %266 = vector.shape_cast %265 : vector<8x128xf32> to vector<1x8x128xf32>
    %c0_120 = arith.constant 0 : index
    %c0_121 = arith.constant 0 : index
    %c0_122 = arith.constant 0 : index
    %267 = vector.load %arg17[%c0_120, %c0_121, %c0_122] : memref<1x8x128xf32, #tpu.memory_space<vmem>>, vector<1x8x128xf32>
    tpu.vector_store %arg17[%c0_120, %c0_121, %c0_122], %266 {strides = array<i32>} : memref<1x8x128xf32, #tpu.memory_space<vmem>>, vector<1x8x128xf32>,
    return
  }
  func.func @transform_0(%arg0: i32) -> (i32, i32, i32) {
    %c0_i32 = arith.constant 0 : i32
    %c0_i32_0 = arith.constant 0 : i32
    %c0_i32_1 = arith.constant 0 : i32
    return %arg0, %c0_i32, %c0_i32_0 : i32, i32, i32
  }
  func.func @transform_1(%arg0: i32) -> (i32, i32, i32) {
    %c0_i32 = arith.constant 0 : i32
    %c0_i32_0 = arith.constant 0 : i32
    %c0_i32_1 = arith.constant 0 : i32
    %c0_i32_2 = arith.constant 0 : i32
    return %c0_i32, %c0_i32_0, %c0_i32_1 : i32, i32, i32
  }
  func.func @transform_2(%arg0: i32) -> (i32, i32, i32) {
    %c0_i32 = arith.constant 0 : i32
    %c0_i32_0 = arith.constant 0 : i32
    %c0_i32_1 = arith.constant 0 : i32
    %c0_i32_2 = arith.constant 0 : i32
    return %c0_i32, %c0_i32_0, %c0_i32_1 : i32, i32, i32
  }
  func.func @transform_3(%arg0: i32) -> (i32, i32, i32) {
    %c0_i32 = arith.constant 0 : i32
    %c0_i32_0 = arith.constant 0 : i32
    %c0_i32_1 = arith.constant 0 : i32
    %c0_i32_2 = arith.constant 0 : i32
    return %c0_i32, %c0_i32_0, %c0_i32_1 : i32, i32, i32
  }
  func.func @transform_4(%arg0: i32) -> (i32, i32, i32) {
    %c0_i32 = arith.constant 0 : i32
    %c0_i32_0 = arith.constant 0 : i32
    %c0_i32_1 = arith.constant 0 : i32
    %c0_i32_2 = arith.constant 0 : i32
    return %c0_i32, %c0_i32_0, %c0_i32_1 : i32, i32, i32
  }
  func.func @transform_5(%arg0: i32) -> (i32, i32, i32) {
    %c0_i32 = arith.constant 0 : i32
    %c0_i32_0 = arith.constant 0 : i32
    %c0_i32_1 = arith.constant 0 : i32
    %c0_i32_2 = arith.constant 0 : i32
    return %c0_i32, %c0_i32_0, %c0_i32_1 : i32, i32, i32
  }
  func.func @transform_6(%arg0: i32) -> (i32, i32, i32) {
    %c0_i32 = arith.constant 0 : i32
    %c0_i32_0 = arith.constant 0 : i32
    %c0_i32_1 = arith.constant 0 : i32
    %c0_i32_2 = arith.constant 0 : i32
    return %c0_i32, %c0_i32_0, %c0_i32_1 : i32, i32, i32
  }
  func.func @transform_7(%arg0: i32) -> (i32, i32, i32) {
    %c0_i32 = arith.constant 0 : i32
    %c0_i32_0 = arith.constant 0 : i32
    %c0_i32_1 = arith.constant 0 : i32
    %c0_i32_2 = arith.constant 0 : i32
    return %c0_i32, %c0_i32_0, %c0_i32_1 : i32, i32, i32
  }
  func.func @transform_8(%arg0: i32) -> (i32, i32, i32) {
    %c0_i32 = arith.constant 0 : i32
    %c0_i32_0 = arith.constant 0 : i32
    %c0_i32_1 = arith.constant 0 : i32
    %c0_i32_2 = arith.constant 0 : i32
    return %c0_i32, %c0_i32_0, %c0_i32_1 : i32, i32, i32
  }
  func.func @transform_9(%arg0: i32) -> (i32, i32, i32) {
    %c0_i32 = arith.constant 0 : i32
    %c0_i32_0 = arith.constant 0 : i32
    %c0_i32_1 = arith.constant 0 : i32
    %c0_i32_2 = arith.constant 0 : i32
    return %c0_i32, %c0_i32_0, %c0_i32_1 : i32, i32, i32
  }
  func.func @transform_10(%arg0: i32) -> (i32, i32, i32) {
    %c0_i32 = arith.constant 0 : i32
    %c0_i32_0 = arith.constant 0 : i32
    %c0_i32_1 = arith.constant 0 : i32
    %c0_i32_2 = arith.constant 0 : i32
    return %c0_i32, %c0_i32_0, %c0_i32_1 : i32, i32, i32
  }
  func.func @transform_11(%arg0: i32) -> (i32, i32, i32) {
    %c0_i32 = arith.constant 0 : i32
    %c0_i32_0 = arith.constant 0 : i32
    %c0_i32_1 = arith.constant 0 : i32
    %c0_i32_2 = arith.constant 0 : i32
    return %c0_i32, %c0_i32_0, %c0_i32_1 : i32, i32, i32
  }
  func.func @transform_12(%arg0: i32) -> (i32, i32) {
    %c0_i32 = arith.constant 0 : i32
    %c0_i32_0 = arith.constant 0 : i32
    %c0_i32_1 = arith.constant 0 : i32
    return %c0_i32, %c0_i32_0 : i32, i32
  }
  func.func @transform_13(%arg0: i32) -> (i32, i32) {
    %c0_i32 = arith.constant 0 : i32
    %c0_i32_0 = arith.constant 0 : i32
    %c0_i32_1 = arith.constant 0 : i32
    return %c0_i32, %c0_i32_0 : i32, i32
  }
  func.func @transform_14(%arg0: i32) -> (i32, i32) {
    %c0_i32 = arith.constant 0 : i32
    %c0_i32_0 = arith.constant 0 : i32
    %c0_i32_1 = arith.constant 0 : i32
    return %c0_i32, %c0_i32_0 : i32, i32
  }
  func.func @transform_15(%arg0: i32) -> (i32, i32) {
    %c0_i32 = arith.constant 0 : i32
    %c0_i32_0 = arith.constant 0 : i32
    %c0_i32_1 = arith.constant 0 : i32
    return %c0_i32, %c0_i32_0 : i32, i32
  }
  func.func @transform_16(%arg0: i32) -> (i32, i32, i32) {
    %c0_i32 = arith.constant 0 : i32
    %c0_i32_0 = arith.constant 0 : i32
    %c0_i32_1 = arith.constant 0 : i32
    return %arg0, %c0_i32, %c0_i32_0 : i32, i32, i32
  }
}

</mosaic_0001>

<bundles_post_ra>
// kernel: tpu_custom_call.1
= control target key start
LH: loop header
LB: loop body
LE: loop exit
PB: predicated region body
PF: predicated region fallthrough
CT: control target
= control target key end

     0   :  { %s7227_s0 = inlined_call_operand.hbm [shape: f32[2,8,128], index: 0, kind: input, shape index: {}]   ;;  %s7228_s1 = inlined_call_operand.hbm [shape: f32[2,1,128], index: 1, kind: input, shape index: {}]   ;;  %s7229_s2 = inlined_call_operand.vmem [shape: f32[2,1,128], index: 2, kind: input, shape index: {}]   ;;  %s7230_s3 = inlined_call_operand.hbm [shape: bf16[2,128,384], index: 3, kind: input, shape index: {}]   ;;  %s7231_s4 = inlined_call_operand.hbm [shape: bf16[2,128,128], index: 4, kind: input, shape index: {}]   ;;  %s7232_s5 = inlined_call_operand.vmem [shape: f32[2,1,128], index: 5, kind: input, shape index: {}]   ;;  %s7233_s6 = inlined_call_operand.vmem [shape: f32[2,1,128], index: 6, kind: input, shape index: {}]   ;;  %s7234_s7 = inlined_call_operand.vmem [shape: f32[2,1,128], index: 7, kind: input, shape index: {}]   ;;  %s7235_s8 = inlined_call_operand.hbm [shape: bf16[2,128,512], index: 8, kind: input, shape index: {}]   ;;  %s7236_s9 = inlined_call_operand.vmem [shape: f32[2,1,512], index: 9, kind: input, shape index: {}]   ;;  %s7237_s10 = inlined_call_operand.hbm [shape: bf16[2,512,128], index: 10, kind: input, shape index: {}]   ;;  %s7238_s11 = inlined_call_operand.vmem [shape: f32[2,1,128], index: 11, kind: input, shape index: {}]   ;;  %s7239_s12 = inlined_call_operand.vmem [shape: f32[1,128], index: 12, kind: input, shape index: {}]   ;;  %s7240_s13 = inlined_call_operand.vmem [shape: f32[1,128], index: 13, kind: input, shape index: {}]   ;;  %s7241_s14 = inlined_call_operand.hbm [shape: bf16[128,128], index: 14, kind: input, shape index: {}]   ;;  %s7242_s15 = inlined_call_operand.vmem [shape: f32[1,128], index: 15, kind: input, shape index: {}]   ;;  %s7243_s16 = inlined_call_operand.hbm [shape: f32[2,8,128], index: 16, kind: output, shape index: {}]  }
   0x1   :  { %7254 = sst [smem:[#allocation22_spill]] %s7227_s0 }
   0x2   :  { %7255 = sst [smem:[#allocation23_spill]] %s7228_s1 }
   0x3   :  { %7256 = sst [smem:[#allocation24_spill]] %s7230_s3 }
   0x4   :  { %7257 = sst [smem:[#allocation25_spill]] %s7231_s4 }
   0x5   :  { %7258 = sst [smem:[#allocation26_spill]] %s7235_s8 }
   0x6   :  { %7259 = sst [smem:[#allocation27_spill]] %s7237_s10 }
   0x7   :  { %7260 = sst [smem:[#allocation28_spill]] %s7240_s13 }
   0x8   :  { %7261 = sst [smem:[#allocation29_spill]] %s7241_s14 }
   0x9   :  { %7262 = sst [smem:[#allocation30_spill]] %s7242_s15 }
   0xa   :  { %7263 = sst [smem:[#allocation31_spill]] %s7243_s16 }
   0xb   :  { %21 = vsyncpa [#allocation3], 0 }
   0xc   :  { %23 = vsyncpa [#allocation3 + $0x1], 0 }
   0xd   :  { %24 = vsyncpa [#allocation6], 0 }
   0xe   :  { %25 = vsyncpa [#allocation9], 0 }
   0xf   :  { %26 = vsyncpa [#allocation12], 0 }
  0x10   :  { %27 = vsyncpa [#allocation4], 0 }
  0x11   :  { %29 = vsyncpa [#allocation4 + $0x1], 0  ;;  %s6510_s21 = smov 0   ;;  %s6512_s22 = smov 0  }
  0x12   :  { %s6514_s23 = smov 0   ;;  %s6516_s24 = smov 0  }
  0x13 LB: > { %7264 = sst [smem:[#allocation20_spill]] %s6396_s23  ;;  %s6402_s25 = smov [#allocation5]   ;;  %s6400_s24 = sphi %s6516_s24, %s7303_s24   ;;  %s6396_s23 = sphi %s6514_s23, %s7300_s23   ;;  %s6392_s22 = sphi %s6512_s22, %s7302_s22   ;;  %s6388_s21 = sphi %s6510_s21, %s7301_s21  }
  0x14   : > { %s419_s26 = sshll.u32 %s6402_s25, 4  ;;  %s6531_s27 = sadd.s32 4294967295, %s6400_s24   ;;  %s420_s26 = int_to_ptr.vmem [resolvable:$true] %s419_s26 }
  0x15   : > { %p5090_p0 = scmp.ge.s32.totalorder %s6400_s24, 1  ;;  %p7249_p1 = scmp.eq.s32.totalorder %s6531_s27, 0 }
  0x16   : > { %p407_p2 = scmp.lt.s32.totalorder %s6400_s24, 3  ;;  %s6403_s29 = smov [#allocation8]  }
  0x17   : > { %s448_s30 = sshll.u32 %s6403_s29, 4  ;;  %s6404_s17 = smov [#allocation11]   ;;  %s6549_s30 = int_to_ptr.vmem [resolvable:$true] %s448_s30 }
  0x18   : > { %p6536_p3 = pnand %p5090_p0, %p407_p2  ;;  %s6551_s18 = sshll.u32 %s6404_s17, 4  ;;  %s487_s18 = int_to_ptr.vmem [resolvable:$true] %s6551_s18 }
  0x19   : > { %s6151_s20 = scalar_lea.vmem %s420_s26, 32  ;;  %p6159_p11 = scmp.lt.s32.totalorder %s420_s26, %s420_s26 }
  0x1a   : > { %s7265_s28 = scalar_select %p6536_p3, 1, 0 }
  0x1b   : > { %p5755_p5 = pneg %p6536_p3  ;;  %p6152_p8 = scmp.ne.s32.totalorder %s420_s26, %s6151_s20 }
  0x1c   : > { %p6160_p12 = scmp.lt.s32.totalorder %s6151_s20, %s6151_s20 }
  0x1d   : > { %p6545_p6 = pnand %p5755_p5, %p7249_p1 }
  0x1e   : > { %p6161_p13 = por %p6160_p12, %p6159_p11 }
  0x1f   : > { %p6555_p7 = pneg %p6545_p6 }
  0x21   : > { %p6154_p9 = pnand %p6152_p8, %p6555_p7 }
  0x23   : > { %p6155_p10 = pneg %p6154_p9 }
  0x25   : > { %p6162_p0 = pnand %p6161_p13, %p6155_p10 }
  0x27   : > { %6165 = shalt.err (!%p6162_p0)
}
  0x28   : > { %s7246_s25 = smov 16   ;;  %s6406_s29 = smov 1  }
  0x29   : > { %s7268_s1 = sld [smem:[#allocation23_spill]]  ;;  %s6177_s15 = scalar_lea.vmem %s6549_s30, 2048 }
  0x2a   : > { %p6178_p2 = scmp.ne.s32.totalorder %s6549_s30, %s6177_s15  ;;  %p6185_p9 = scmp.lt.s32.totalorder %s6549_s30, %s6549_s30 }
  0x2b   : > { %p6186_p10 = scmp.lt.s32.totalorder %s6177_s15, %s6177_s15 }
  0x2c   : > { %p6180_p5 = pnand %p6178_p2, %p6555_p7 }
  0x2d   : > { %p6187_p11 = por %p6186_p10, %p6185_p9 }
  0x2e   : > { %p6181_p8 = pneg %p6180_p5 }
  0x2f   : > { %5758 = dma.hbm_to_vmem [thread:$0]  (!%p6545_p6), %s7268_s1, 32, %s420_s26, [#allocation6], %s7246_s25, %s7246_s25, %s6406_s29  }
  0x30   : > { %p6188_p12 = pnand %p6187_p11, %p6181_p8 }
  0x32   : > { %6191 = shalt.err (!%p6188_p12)
}
  0x33   : > { %s7247_s20 = smov 64   ;;  %s7248_s13 = smov 4  }
  0x34   : > { %s7269_s4 = sld [smem:[#allocation25_spill]]  ;;  %s6203_s29 = scalar_lea.vmem %s487_s18, 8192 }
  0x35   : > { %p6204_p13 = scmp.ne.s32.totalorder %s487_s18, %s6203_s29  ;;  %p6211_p5 = scmp.lt.s32.totalorder %s487_s18, %s487_s18 }
  0x36   : > { %p6212_p8 = scmp.lt.s32.totalorder %s6203_s29, %s6203_s29 }
  0x37   : > { %p6206_p0 = pnand %p6204_p13, %p6555_p7 }
  0x38   : > { %p6213_p9 = por %p6212_p8, %p6211_p5 }
  0x39   : > { %p6207_p2 = pneg %p6206_p0 }
  0x3a   : > { %5764 = dma.hbm_to_vmem [thread:$0]  (!%p6545_p6), %s7269_s4, 2048, %s6549_s30, [#allocation9], %s7247_s20, %s7247_s20, %s7248_s13  }
  0x3b   : > { %p6214_p10 = pnand %p6213_p9, %p6207_p2 }
  0x3d   : > { %6217 = shalt.err (!%p6214_p10)
}
  0x3e   : > { %s7270_s10 = sld [smem:[#allocation27_spill]]  ;;  %s6409_s30 = smov [#allocation7]  }
  0x3f   : > { %s435_s16 = sshll.u32 %s6409_s30, 4  ;;  %s436_s16 = int_to_ptr.vmem [resolvable:$true] %s435_s16 }
  0x40   : > { %s6229_s26 = scalar_lea.vmem %s436_s16, 6144  ;;  %p6237_p0 = scmp.lt.s32.totalorder %s436_s16, %s436_s16 }
  0x41   : > { %p6230_p11 = scmp.ne.s32.totalorder %s436_s16, %s6229_s26  ;;  %p6238_p2 = scmp.lt.s32.totalorder %s6229_s26, %s6229_s26 }
  0x43   : > { %p6232_p12 = pnand %p6230_p11, %p6555_p7  ;;  %p6239_p5 = por %p6238_p2, %p6237_p0 }
  0x44   : > { %5770 = dma.hbm_to_vmem [thread:$0]  (!%p6545_p6), %s7270_s10, 8192, %s487_s18, [#allocation12], %s7247_s20, %s7247_s20, %s7248_s13  }
  0x45   : > { %p6233_p13 = pneg %p6232_p12 }
  0x47   : > { %p6240_p8 = pnand %p6239_p5, %p6233_p13 }
  0x49   : > { %6243 = shalt.err (!%p6240_p8)
}
  0x4a   : > { %s6410_s29 = smov 192   ;;  %s6411_s25 = smov 12  }
  0x4b   : > { %s7271_s3 = sld [smem:[#allocation24_spill]]  ;;  %s6412_s17 = smov [#allocation10]  }
  0x4c   : > { %s470_s30 = sshll.u32 %s6412_s17, 4  ;;  %s6413_s20 = smov [#allocation13]   ;;  %s471_s30 = int_to_ptr.vmem [resolvable:$true] %s470_s30 }
  0x4d   : > { %s508_s13 = sshll.u32 %s6413_s20, 4  ;;  %s6255_s1 = scalar_lea.vmem %s471_s30, 8192  ;;  %s509_s13 = int_to_ptr.vmem [resolvable:$true] %s508_s13 }
  0x4e   : > { %p6256_p9 = scmp.ne.s32.totalorder %s471_s30, %s6255_s1  ;;  %p6263_p12 = scmp.lt.s32.totalorder %s471_s30, %s471_s30 }
  0x4f   : > { %p6264_p13 = scmp.lt.s32.totalorder %s6255_s1, %s6255_s1 }
  0x50   : > { %p6258_p10 = pnand %p6256_p9, %p6555_p7 }
  0x51   : > { %5761 = dma.hbm_to_vmem [thread:$0]  (!%p6545_p6), %s7271_s3, 6144, %s436_s16, [#allocation6], %s6410_s29, %s6410_s29, %s6411_s25  }
  0x52   : > { %p6259_p11 = pneg %p6258_p10  ;;  %p6265_p0 = por %p6264_p13, %p6263_p12 }
  0x54   : > { %p6266_p2 = pnand %p6265_p0, %p6259_p11 }
  0x56   : > { %6269 = shalt.err (!%p6266_p2)
}
  0x57   : > { %s6414_s26 = smov 256   ;;  %s7272_s15 = smov 16  }
  0x58   : > { %s7273_s8 = sld [smem:[#allocation26_spill]]  ;;  %s6281_s20 = scalar_lea.vmem %s509_s13, 1024 }
  0x59   : > { %p6282_p5 = scmp.ne.s32.totalorder %s509_s13, %s6281_s20  ;;  %p6289_p10 = scmp.lt.s32.totalorder %s509_s13, %s509_s13 }
  0x5a   : > { %p6290_p4 = scmp.lt.s32.totalorder %s6281_s20, %s6281_s20 }
  0x5b   : > { %p6284_p8 = pnand %p6282_p5, %p6555_p7 }
  0x5c   : > { %p6291_p12 = por %p6290_p4, %p6289_p10 }
  0x5d   : > { %p6285_p9 = pneg %p6284_p8 }
  0x5e   : > { %5767 = dma.hbm_to_vmem [thread:$0]  (!%p6545_p6), %s7273_s8, 8192, %s471_s30, [#allocation9], %s6414_s26, %s6414_s26, %s7272_s15  }
  0x5f   : > { %p6292_p11 = pnand %p6291_p12, %p6285_p9 }
  0x61   : > { %6295 = shalt.err (!%p6292_p11)
}
  0x62   : > { %s7274_s1 = smov 4   ;;  %s7275_s29 = smov 64  }
  0x63   : > { %s7276_s14 = sld [smem:[#allocation29_spill]]  ;;  %s5089_s0 = sadd.s32 4294967294, %s6400_s24  }
  0x64   : > { %s6621_s19 = sadd.s32 1, %s6400_s24   ;;  %s42_s30 = sadd.s32 1, %s6396_s23 }
  0x65   : > { %s39_s26 = ssub.s32 %s6400_s24, %s6621_s19  ;;  %p49_p4 = scmp.ne.s32.totalorder %s6396_s23, %s6392_s22 }
  0x66   : > { %p40_p7 = scmp.eq.s32.totalorder %s39_s26, 0  ;;  %p50_p13 = scmp.eq.s32.totalorder %s6400_s24, 0 }
  0x67   : > { %p55_p0 = scmp.ne.s32.totalorder %s6392_s22, %s6388_s21  ;;  %p394_p2 = scmp.eq.s32.totalorder %s6531_s27, 1 }
  0x68   : > { %s6633_s15 = scalar_select %p40_p7, %s6396_s23, %s42_s30  }
  0x69   : > { %5773 = dma.hbm_to_vmem [thread:$0]  (!%p6545_p6), %s7276_s14, 1024, %s509_s13, [#allocation12], %s7275_s29, %s7275_s29, %s7274_s1  }
  0x6a   : > { %7277 = sst [smem:[#allocation21_spill]] %s6633_s15  ;;  %p51_p5 = por %p50_p13, %p49_p4 }
  0x6b   : > { %p6637_p8 = por %p7249_p1, %p55_p0  ;;  %p6641_p6 = por %p394_p2, %p49_p4 }
  0x6c   : > { %p400_p9 = scmp.eq.s32.totalorder %s5089_s0, 1  ;;  %p5788_p10 = scmp.lt.s32.totalorder %s6400_s24, 2 }
  0x6d   : > { %s7278_s25 = scalar_select %p6637_p8, 1, 0 }
  0x6e   : > { %s7279_s13 = scalar_select %p6641_p6, 1, 0 }
  0x6f   : > { %s525_s16 = sand.u32 1, %s6396_s23   ;;  %p6647_p12 = por %p400_p9, %p55_p0 }
  0x70   : > { %s5098_s1 = sshll.u32 %s525_s16, 3  ;;  %s5099_s29 = sshll.u32 %s6400_s24, 7 }
  0x71   : > { %s7280_s20 = scalar_select %p6647_p12, 1, 0 }
  0x72   : > { %s7281_s30 = sld [smem:[#allocation22_spill]]  ;;  %s529_s3 = scalar_lea.vmem [#allocation2], %s5098_s1 }
  0x73   : > { %s536_s4 = sshll.u32 %s529_s3, 4  ;;  %p6657_p11 = pnand %p5788_p10, %p51_p5  ;;  %s537_s4 = int_to_ptr.vmem [resolvable:$true] %s536_s4 }
  0x74   : > { %s526_s8 = scalar_lea.sflag [#allocation3], %s525_s16 }
  0x75   : > { %p6298_p7 = pneg %p6657_p11 }
  0x78   : > { %s6655_s26 = scalar_lea.hbm %s7281_s30, %s5099_s29  ;;  %s6301_s17 = scalar_lea.hbm %s7281_s30, 256 }
  0x79   : > { %s6296_s10 = scalar_lea.hbm %s6655_s26, 128  ;;  %p6302_p2 = scmp.lt.s32.totalorder %s6655_s26, %s7281_s30 }
  0x7a   : > { %p6297_p4 = scmp.ne.s32.totalorder %s6655_s26, %s6296_s10  ;;  %p6303_p5 = scmp.lt.s32.totalorder %s6301_s17, %s6296_s10 }
  0x7c   : > { %p6299_p13 = pnand %p6298_p7, %p6297_p4  ;;  %p6304_p9 = por %p6303_p5, %p6302_p2 }
  0x7e   : > { %p6300_p0 = pneg %p6299_p13 }
  0x80   : > { %p6305_p10 = pnand %p6304_p9, %p6300_p0 }
  0x82   : > { %6308 = shalt.err (!%p6305_p10)
}
  0x83   : > { %s6309_s3 = scalar_lea.vmem %s537_s4, 128  ;;  %s6415_s16 = smov [#allocation2]  }
  0x84   : > { %p6310_p1 = scmp.ne.s32.totalorder %s537_s4, %s6309_s3  ;;  %s6314_s15 = sshll.u32 %s6415_s16, 4  ;;  %s6315_s15 = int_to_ptr.vmem [resolvable:$false] %s6314_s15 }
  0x85   : > { %s6316_s23 = scalar_lea.vmem %s6315_s15, 256  ;;  %p6317_p4 = scmp.lt.s32.totalorder %s537_s4, %s6315_s15 }
  0x86   : > { %p6312_p12 = pnand %p6310_p1, %p6298_p7  ;;  %p6318_p13 = scmp.lt.s32.totalorder %s6316_s23, %s6309_s3 }
  0x88   : > { %p6313_p6 = pneg %p6312_p12  ;;  %p6319_p8 = por %p6318_p13, %p6317_p4 }
  0x8a   : > { %p6320_p3 = pnand %p6319_p8, %p6313_p6 }
  0x8c   : > { %6323 = shalt.err (!%p6320_p3)
}
  0x8d   : > { %5777 = dma.hbm_to_vmem [thread:$0]  (!%p6657_p11), %s6655_s26, 128, %s537_s4, %s526_s8  }
  0x8e   : > { %p7283_p0 = scmp.ne.s32.totalorder %s7265_s28, 0 }
  0x8f   : > { %s6678_s10 = sand.u32 (!%p7283_p0), 1, %s6392_s22   ;;  %p7284_p1 = scmp.ne.s32.totalorder (!%p7283_p0), %s7278_s25, 0 }
  0x90   : > { %545 = sbr.rel (%p7283_p0) target bundleno = 5598 (0x15de), region = 84  ;;  %s5101_s14 = sshll.u32 (!%p7283_p0), %s6678_s10, 3 }
  0x91   : > { %s548_s15 = scalar_lea.sflag (!%p7283_p0), [#allocation3], %s6678_s10  ;;  %s6684_s23 = scalar_lea.vmem (!%p7283_p0), [#allocation2], %s5101_s14 }
  0x95   : > { %6367 = dma.done.wait (%p7284_p1), %s548_s15, 128  }
  0x96   : > { %6369 = vsyncadd (%p7284_p1), %s548_s15, 4294967168  ;;  %p7285_p3 = scmp.eq.s32.totalorder %s6531_s27, 0 }
  0x98   : > { %6371 = dma.done.wait (%p7285_p3), [#allocation6], 6176   ;;  %p7286_p8 = pmov %p7285_p3 }
  0x99   : > { %p7287_p6 = pmov %p7285_p3 }
  0x9a   : > { %6373 = vsyncadd (%p7286_p8), [#allocation6], 4294961120 }
  0x9b   : > { %6375 = dma.done.wait (%p7287_p6), [#allocation9], 10240   ;;  %p7288_p12 = pmov %p7285_p3 }
  0x9c   : > { %p7289_p11 = pmov %p7285_p3 }
  0x9d   : > { %6377 = vsyncadd (%p7288_p12), [#allocation9], 4294957056 }
  0x9e   : > { %6379 = dma.done.wait (%p7289_p11), [#allocation12], 9216   ;;  %p7290_p7 = pmov %p7285_p3 }
  0x9f   : > { %v625_v0 = vld [vmem:[%s6684_s23] sm:$0xff]  ;;  %v6416_v3 = vmov 0.0   ;;  %v6417_v22 = vmov 0   ;;  %vm6418_vm0 = vmmov 0   ;;  %v5109_v35 = vld [vmem:[#allocation5] ss:$0 sm:$0xff]  ;;  %v626_v49 = vlaneseq }
  0xa0   : > { %6381 = vsyncadd (%p7290_p7), [#allocation12], 4294958080  ;;  %633 = vadd.xlane.f32.xlu0 %v625_v0  ;;  %v5849_v1 = vld [vmem:[#allocation7 + $0xac] ss:$12 sps:$4 sm:$0xff]   ;;  %v5851_v2 = vld [vmem:[#allocation7 + $0xa8] ss:$12 sps:$4 sm:$0xff]   ;;  %5531 = vmatprep.subr.bf16.mxu1 %v6416_v3 }
  0xa1   : > { %v5852_v4 = vld [vmem:[#allocation7 + $0xb0] ss:$12 sps:$4 sm:$0xff]   ;;  %v5853_v5 = vld [vmem:[#allocation7 + $0x94] ss:$12 sps:$4 sm:$0xff]   ;;  %820 = vmatprep.subr.bf16.mxu0 %v5849_v1  ;;  %v5856_v7 = vld [vmem:[#allocation7 + $0x98] ss:$12 sps:$4 sm:$0xff]   ;;  %852 = vmatprep.mubr.bf16.mxu0 %v6417_v22 }
  0xa2   : > { %v5855_v6 = vld [vmem:[#allocation7 + $0x90] ss:$12 sps:$4 sm:$0xff]   ;;  %821 = vmatpush1.bf16.msra.mxu0 %v5851_v2  ;;  %5532 = vmatpush3.bf16.msra.mxu1 %v5852_v4  ;;  %v5859_v13 = vld [vmem:[#allocation7 + $0x78] ss:$12 sps:$4 sm:$0xff]   ;;  %v5860_v14 = vld [vmem:[#allocation7 + $0x80] ss:$12 sps:$4 sm:$0xff]  }
  0xa3   : > { %822 = vmatprep.subr.bf16.mxu0 %v5853_v5  ;;  %5533 = vmatprep.subr.bf16.mxu1 %v6416_v3  ;;  %v5857_v12 = vld [vmem:[#allocation7 + $0x7c] ss:$12 sps:$4 sm:$0xff]   ;;  %v5861_v15 = vld [vmem:[#allocation7 + $0x64] ss:$12 sps:$4 sm:$0xff]   ;;  %v5863_v16 = vld [vmem:[#allocation7 + $0x60] ss:$12 sps:$4 sm:$0xff]  }
  0xa4   : > { %v5864_v17 = vld [vmem:[#allocation7 + $0x68] ss:$12 sps:$4 sm:$0xff]   ;;  %v5865_v18 = vld [vmem:[#allocation7 + $0x4c] ss:$12 sps:$4 sm:$0xff]   ;;  %v5868_v20 = vld [vmem:[#allocation7 + $0x50] ss:$12 sps:$4 sm:$0xff]   ;;  %5547 = vmatprep.mubr.msk.bf16.mxu1 %vm6418_vm0, %v6416_v3 }
  0xa5   : > { %v5867_v19 = vld [vmem:[#allocation7 + $0x48] ss:$12 sps:$4 sm:$0xff]   ;;  %v5871_v23 = vld [vmem:[#allocation7 + $0x30] ss:$12 sps:$4 sm:$0xff]   ;;  %v5872_v24 = vld [vmem:[#allocation7 + $0x38] ss:$12 sps:$4 sm:$0xff]  }
  0xa6   : > { %823 = vmatpush1.bf16.msra.mxu0 %v5855_v6  ;;  %5534 = vmatpush3.bf16.msra.mxu1 %v5856_v7  ;;  %v5869_v21 = vld [vmem:[#allocation7 + $0x34] ss:$12 sps:$4 sm:$0xff]   ;;  %v5873_v25 = vld [vmem:[#allocation7 + $0x1c] ss:$12 sps:$4 sm:$0xff]   ;;  %v5875_v26 = vld [vmem:[#allocation7 + $0x18] ss:$12 sps:$4 sm:$0xff]  }
  0xa7   : > { %5535 = vmatprep.subr.bf16.mxu1 %v6416_v3  ;;  %824 = vmatprep.subr.bf16.mxu0 %v5857_v12  ;;  %v5876_v27 = vld [vmem:[#allocation7 + $0x20] ss:$12 sps:$4 sm:$0xff]   ;;  %v5877_v28 = vld [vmem:[#allocation7 + $0x4] ss:$12 sps:$4 sm:$0xff]   ;;  %v5880_v30 = vld [vmem:[#allocation7 + $0x8] ss:$12 sps:$4 sm:$0xff]  }
  0xa8   : > { %v5879_v29 = vld [vmem:[#allocation7] ss:$12 sps:$4 sm:$0xff]   ;;  %s6419_s28 = smov 32   ;;  %s6420_s25 = smov 96   ;;  %v6422_v50 = vmov 1983009808  }
  0xa9   : > { %v5110_v37 = vld [vmem:[%s7229_s2] ss:$0 sm:$0xff]  ;;  %s6421_s26 = smov 64   ;;  %v914_v51 = vunpack.c.l.s4 %v6422_v50  ;;  %v6423_v52 = vmov 1934713408   ;;  %v6737_v54 = vshrl.u32 %v626_v49, 7 }
  0xaa   : > { %825 = vmatpush1.bf16.msra.mxu0 %v5859_v13  ;;  %5536 = vmatpush3.bf16.msra.mxu1 %v5860_v14  ;;  %v946_v53 = vunpack.c.l.s4 %v6423_v52  ;;  %vm1351_vm1 = vcmask 261120   ;;  %vm1542_vm3 = vcmask 64512   ;;  %vm1594_vm4 = vcmask 1043456   ;;  %s7293_s29 = sld [smem:[#allocation28_spill]]  ;;  %s5363_s18 = sshll.u32 %s6531_s27, 7 }
  0xab   : > { %5537 = vmatprep.subr.bf16.mxu1 %v6416_v3  ;;  %826 = vmatprep.subr.bf16.mxu0 %v5861_v15  ;;  %v915_v55 = vunpack.c.0.s8 %v914_v51  ;;  %vm1925_vm5 = vcmask 523264   ;;  %vm1927_vm6 = vcmask 785408   ;;  %s623_s17 = scalar_lea.vmem [#allocation14], %s5101_s14  ;;  %s7295_s15 = sld [smem:[#allocation31_spill]] }
  0xac   : > { %v947_v58 = vunpack.c.0.s8 %v946_v53  ;;  %s4962_s1 = sshll.u32 %s623_s17, 4  ;;  %s4949_s4 = scalar_lea.sflag [#allocation4], %s6678_s10  ;;  %s7186_s1 = int_to_ptr.vmem [resolvable:$true] %s4962_s1 }
  0xad   : > { %v6740_v59 = vsub.s32 %v915_v55, %v6737_v54  ;;  %s6324_s27 = scalar_lea.vmem %s7186_s1, 128  ;;  %p7296_p5 = scmp.ne.s32.totalorder %s7279_s13, 0 }
  0xae   : > { %827 = vmatpush1.bf16.msra.mxu0 %v5863_v16  ;;  %5538 = vmatpush3.bf16.msra.mxu1 %v5864_v17  ;;  %v6743_v1 = vsub.s32 %v947_v58, %v6737_v54  ;;  %p6325_p2 = scmp.ne.s32.totalorder %s7186_s1, %s6324_s27  ;;  %s6424_s14 = smov [#allocation14]  }
  0xaf   : > { %828 = vmatprep.subr.bf16.mxu0 %v5865_v18  ;;  %5539 = vmatprep.subr.bf16.mxu1 %v6416_v3  ;;  %s6328_s8 = sshll.u32 %s6424_s14, 4  ;;  %s6329_s8 = int_to_ptr.vmem [resolvable:$false] %s6328_s8 }
  0xb0   : > { %p6326_p9 = pnand %p6325_p2, %p7296_p5  ;;  %s6330_s0 = scalar_lea.vmem %s6329_s8, 256 }
  0xb1   : > { %p6331_p4 = scmp.lt.s32.totalorder %s7186_s1, %s6329_s8  ;;  %p6332_p13 = scmp.lt.s32.totalorder %s6330_s0, %s6324_s27 }
  0xb2   : > { %829 = vmatpush1.bf16.msra.mxu0 %v5867_v19  ;;  %5540 = vmatpush3.bf16.msra.mxu1 %v5868_v20  ;;  %p6327_p10 = pneg %p6326_p9 }
  0xb3   : > { %830 = vmatprep.subr.bf16.mxu0 %v5869_v21  ;;  %5541 = vmatprep.subr.bf16.mxu1 %v6416_v3  ;;  %p6333_p0 = por %p6332_p13, %p6331_p4 }
  0xb5   : > { %p6334_p1 = pnand %p6333_p0, %p6327_p10 }
  0xb6   : > { %831 = vmatpush1.bf16.msra.mxu0 %v5871_v23  ;;  %5542 = vmatpush3.bf16.msra.mxu1 %v5872_v24 }
  0xb7   : > { %832 = vmatprep.subr.bf16.mxu0 %v5873_v25  ;;  %5543 = vmatprep.subr.bf16.mxu1 %v6416_v3 }
  0xba   : > { %833 = vmatpush1.bf16.msra.mxu0 %v5875_v26  ;;  %5544 = vmatpush3.bf16.msra.mxu1 %v5876_v27 }
  0xbb   : > { %834 = vmatprep.subr.bf16.mxu0 %v5877_v28  ;;  %5545 = vmatprep.subr.bf16.mxu1 %v6416_v3 }
  0xbe   : > { %835 = vmatpush1.bf16.msra.mxu0 %v5879_v29  ;;  %5546 = vmatpush3.bf16.msra.mxu1 %v5880_v30 }
  0xbf   : > { %5551 = vmatprep.subr.bf16.mxu0 %v6416_v3  ;;  %5557 = vmatprep.subr.bf16.mxu1 %v6416_v3 }
 0x129   : > { %v634_v8 = vpop.xlane.xlu0 %633 }
 0x12a   : > { %v636_v9 = vmul.f32 0.0078125, %v634_v8 }
 0x12c   : > { %v637_v10 = vsub.f32 %v625_v0, %v636_v9 }
 0x12e   : > { %v638_v11 = vmul.f32 %v637_v10, %v637_v10 }
 0x130   : > { %639 = vadd.xlane.f32.xlu0 %v638_v11 }
 0x1b9   : > { %v640_v31 = vpop.xlane.xlu0 %639 }
 0x1ba   : > { %v641_v32 = vmul.f32 0.0078125, %v640_v31 }
 0x1bc   : > { %v642_v33 = vadd.f32 1e-05, %v641_v32 }
 0x1be   : > { %6097 = vrsqrt.f32 %v642_v33 }
 0x1cb   : > { %v6098_v34 = vpop.eup %6097 }
 0x1cc   : > { %v644_v36 = vmul.f32 %v6098_v34, %v637_v10 }
 0x1ce   : > { %v651_v38 = vmul.f32 %v5109_v35, %v644_v36 }
 0x1d0   : > { %v658_v39 = vadd.f32 %v5110_v37, %v651_v38 }
 0x1d2   : > { %v659_v40 = vpack.c.bf16 %v658_v39, %v658_v39 }
 0x1d4   : > { %853 = vmatmul.mubr.bf16.vlgmr.msra.gmra.mxu0 %v659_v40  ;;  %5548 = vmatmul.mubr.bf16.vlgmr.msra.gmra.mxu1 %v659_v40 }
 0x1d5   : > { %5553 = vmatprep.mubr.msk.bf16.mxu0 %vm6418_vm0, %v6416_v3  ;;  %5559 = vmatprep.mubr.msk.bf16.mxu1 %vm6418_vm0, %v6416_v3 }
 0x294   : > { %v6723_v41 = vpop.f32.mrf.mxu0  ;;  %v6725_v42 = vpop.f32.mrf.mxu1 }
 0x296   : > { %v856_v43 = vpop.f32.mrf.mxu0  ;;  %v5549_v44 = vpop.f32.mrf.mxu1 }
 0x297   : > { %1058 = vrot.lane.b32.xlu0 %v856_v43, %s6419_s28  ;;  %1052 = vrot.lane.b32.xlu1 %v856_v43, %s6420_s25 }
 0x298   : > { %v858_v45 = vpop.f32.mrf.mxu0  ;;  %v898_v46 = vpop.f32.mrf.mxu1 }
 0x29a   : > { %v859_v47 = vpop.f32.mrf.mxu0  ;;  %v5550_v48 = vpop.f32.mrf.mxu1 }
 0x29b   : > { %1055 = vrot.lane.b32.xlu1 %v856_v43, %s6421_s26 }
 0x29f   : > { %902 = vrot.lane.b32.xlu1 %v6723_v41, %s6420_s25 }
 0x2a3   : > { %905 = vrot.lane.b32.xlu1 %v6723_v41, %s6421_s26 }
 0x2a7   : > { %908 = vrot.lane.b32.xlu1 %v6723_v41, %s6419_s28 }
 0x309   : > { %v1059_v56 = vpop.permute.xlu0 %1058  ;;  %v1053_v57 = vpop.permute.xlu1 %1052 }
 0x30a   : > { %v1077_v60 = vcombine.low %v1053_v57, %v1059_v56  ;;  %v1078_v61 = vcombine.high %v1053_v57, %v1059_v56 }
 0x30c   : > { %v1085_v2 = vrot.slane %v1077_v60, %v6740_v59  ;;  %v1092_v4 = vrot.slane %v1078_v61, %v6740_v59 }
 0x30d   : > { %v1056_v62 = vpop.permute.xlu1 %1055 }
 0x30e   : > { %v1061_v63 = vcombine.low %v856_v43, %v1056_v62  ;;  %v1062_v0 = vcombine.high %v856_v43, %v1056_v62 }
 0x310   : > { %v1069_v5 = vrot.slane %v1061_v63, %v6740_v59  ;;  %v1076_v6 = vrot.slane %v1062_v0, %v6740_v59 }
 0x311   : > { %v903_v7 = vpop.permute.xlu1 %902 }
 0x312   : > { %v1093_v8 = vcombine.low %v1069_v5, %v1085_v2  ;;  %v1094_v9 = vcombine.high %v1069_v5, %v1085_v2  ;;  %v1109_v10 = vcombine.low %v1076_v6, %v1092_v4  ;;  %v1110_v11 = vcombine.high %v1076_v6, %v1092_v4 }
 0x314   : > { %v1101_v12 = vrot.slane %v1093_v8, %v6743_v1  ;;  %v1108_v13 = vrot.slane %v1094_v9, %v6743_v1  ;;  %v1117_v14 = vrot.slane %v1109_v10, %v6743_v1  ;;  %v1124_v15 = vrot.slane %v1110_v11, %v6743_v1 }
 0x315   : > { %v906_v16 = vpop.permute.xlu1 %905 }
 0x316   : > { %v1129_v17 = vcombine.low %v1101_v12, %v1108_v13  ;;  %v5137_v18 = vcombine.high %v1101_v12, %v1108_v13  ;;  %v1145_v19 = vcombine.low %v1117_v14, %v1124_v15  ;;  %v5138_v20 = vcombine.high %v1117_v14, %v1124_v15 }
 0x317   : > { %v911_v21 = vcombine.low %v6723_v41, %v906_v16  ;;  %v912_v23 = vcombine.high %v6723_v41, %v906_v16 }
 0x318   : > { %v1136_v24 = vrot.slane %v1129_v17, %v6740_v59  ;;  %v1144_v25 = vrot.slane %v5137_v18, %v6740_v59  ;;  %v1152_v26 = vrot.slane %v1145_v19, %v6740_v59  ;;  %v1160_v27 = vrot.slane %v5138_v20, %v6740_v59 }
 0x319   : > { %v909_v28 = vpop.permute.xlu1 %908  ;;  %v919_v33 = vrot.slane %v911_v21, %v6740_v59  ;;  %v926_v34 = vrot.slane %v912_v23, %v6740_v59 }
 0x31a   : > { %v927_v29 = vcombine.low %v903_v7, %v909_v28  ;;  %v928_v30 = vcombine.high %v903_v7, %v909_v28  ;;  %v1161_v31 = vcombine.low %v1136_v24, %v1144_v25  ;;  %v1177_v32 = vcombine.low %v1152_v26, %v1160_v27 }
 0x31b   : > { %v1162_v39 = vcombine.high %v1136_v24, %v1144_v25  ;;  %v1178_v40 = vcombine.high %v1152_v26, %v1160_v27 }
 0x31c   : > { %v935_v35 = vrot.slane %v927_v29, %v6740_v59  ;;  %v942_v36 = vrot.slane %v928_v30, %v6740_v59  ;;  %v1169_v37 = vrot.slane %v1161_v31, %v6743_v1  ;;  %v1185_v38 = vrot.slane %v1177_v32, %v6743_v1 }
 0x31d   : > { %v1176_v56 = vrot.slane %v1162_v39, %v6743_v1  ;;  %v1192_v57 = vrot.slane %v1178_v40, %v6743_v1  ;;  %v629_v30 = vand.u32 127, %v626_v49 }
 0x31e   : > { %v943_v41 = vcombine.low %v919_v33, %v935_v35  ;;  %v944_v43 = vcombine.high %v919_v33, %v935_v35  ;;  %v959_v44 = vcombine.low %v926_v34, %v942_v36  ;;  %v960_v45 = vcombine.high %v926_v34, %v942_v36 }
 0x31f   : > { %v1193_v46 = vcombine.low %v1169_v37, %v1185_v38  ;;  %v1194_v47 = vcombine.high %v1169_v37, %v1185_v38  ;;  %v1195_v9 = vcombine.low %v1176_v56, %v1192_v57  ;;  %v1196_v10 = vcombine.high %v1176_v56, %v1192_v57 }
 0x320   : > { %v951_v48 = vrot.slane %v943_v41, %v6743_v1  ;;  %v958_v50 = vrot.slane %v944_v43, %v6743_v1  ;;  %v967_v51 = vrot.slane %v959_v44, %v6743_v1  ;;  %v974_v52 = vrot.slane %v960_v45, %v6743_v1 }
 0x321   : > { %v1197_v53 = vpack.c.bf16 %v1193_v46, %v1193_v46  ;;  %v1198_v55 = vpack.c.bf16 %v1194_v47, %v1194_v47  ;;  %v1199_v17 = vpack.c.bf16 %v1195_v9, %v1195_v9  ;;  %v1200_v18 = vpack.c.bf16 %v1196_v10, %v1196_v10 }
 0x322   : > { %v979_v58 = vcombine.low %v951_v48, %v958_v50  ;;  %v5135_v60 = vcombine.high %v951_v48, %v958_v50  ;;  %v995_v61 = vcombine.low %v967_v51, %v974_v52  ;;  %v5136_v62 = vcombine.high %v967_v51, %v974_v52 }
 0x323   : > { %v1356_v63 = vsel %vm1351_vm1, %v1197_v53, 0  ;;  %v1402_v0 = vsel %vm1351_vm1, %v1198_v55, 0  ;;  %v1448_v24 = vsel %vm1351_vm1, %v1199_v17, 0  ;;  %v1494_v25 = vsel %vm1351_vm1, %v1200_v18, 0 }
 0x324   : > { %v986_v2 = vrot.slane %v979_v58, %v6740_v59  ;;  %v994_v4 = vrot.slane %v5135_v60, %v6740_v59  ;;  %v1002_v5 = vrot.slane %v995_v61, %v6740_v59  ;;  %v1010_v6 = vrot.slane %v5136_v62, %v6740_v59  ;;  %5552 = vmatpush3.bf16.xpose.msra.mxu0 %v1356_v63 }
 0x325   : > { %5558 = vmatpush3.bf16.xpose.msra.mxu1 %v1402_v0  ;;  %5563 = vmatprep.subr.bf16.mxu0 %v6416_v3  ;;  %vm6801_vm2 = vcmp.le.s32.totalorder %v629_v30, %v6737_v54 }
 0x326   : > { %v1011_v7 = vcombine.low %v986_v2, %v994_v4  ;;  %v1027_v8 = vcombine.low %v1002_v5, %v1010_v6  ;;  %5569 = vmatprep.subr.bf16.mxu1 %v6416_v3  ;;  %v1012_v11 = vcombine.high %v986_v2, %v994_v4  ;;  %v1028_v12 = vcombine.high %v1002_v5, %v1010_v6 }
 0x328   : > { %v1019_v13 = vrot.slane %v1011_v7, %v6743_v1  ;;  %v1035_v14 = vrot.slane %v1027_v8, %v6743_v1  ;;  %v1026_v21 = vrot.slane %v1012_v11, %v6743_v1  ;;  %v1042_v23 = vrot.slane %v1028_v12, %v6743_v1 }
 0x32a   : > { %v1043_v15 = vcombine.low %v1019_v13, %v1035_v14  ;;  %v1044_v16 = vcombine.high %v1019_v13, %v1035_v14  ;;  %v1045_v26 = vcombine.low %v1026_v21, %v1042_v23  ;;  %v1046_v27 = vcombine.high %v1026_v21, %v1042_v23 }
 0x32c   : > { %v1047_v19 = vpack.c.bf16 %v1043_v15, %v1043_v15  ;;  %v1048_v20 = vpack.c.bf16 %v1044_v16, %v1044_v16  ;;  %v1049_v28 = vpack.c.bf16 %v1045_v26, %v1045_v26  ;;  %v1050_v29 = vpack.c.bf16 %v1046_v27, %v1046_v27 }
 0x32e   : > { %5554 = vmatmul.mubr.msk.bf16.vlgmr.msra.gmra.mxu0 %vm1351_vm1, %v1047_v19  ;;  %5560 = vmatmul.mubr.msk.bf16.vlgmr.msra.gmra.mxu1 %vm1351_vm1, %v1048_v20 }
 0x32f   : > { %5564 = vmatpush3.bf16.xpose.msra.mxu0 %v1448_v24  ;;  %5570 = vmatpush3.bf16.xpose.msra.mxu1 %v1494_v25 }
 0x330   : > { %5565 = vmatprep.mubr.msk.bf16.mxu0 %vm6418_vm0, %v6416_v3  ;;  %5571 = vmatprep.mubr.msk.bf16.mxu1 %vm6418_vm0, %v6416_v3 }
 0x331   : > { %5575 = vmatprep.subr.bf16.mxu0 %v6416_v3  ;;  %5581 = vmatprep.subr.bf16.mxu1 %v6416_v3 }
 0x336   : > { %5566 = vmatmul.mubr.msk.bf16.vlgmr.msra.gmra.mxu0 %vm1351_vm1, %v1049_v28  ;;  %5572 = vmatmul.mubr.msk.bf16.vlgmr.msra.gmra.mxu1 %vm1351_vm1, %v1050_v29 }
 0x337   : > { %5577 = vmatprep.mubr.msk.bf16.mxu0 %vm6418_vm0, %v6416_v3  ;;  %5583 = vmatprep.mubr.msk.bf16.mxu1 %vm6418_vm0, %v6416_v3 }
 0x3ee   : > { %v1392_v32 = vpop.f32.mrf.mxu0  ;;  %v1438_v33 = vpop.f32.mrf.mxu1 }
 0x3ef   : > { %v1538_v34 = vsel %vm6801_vm2, %v1392_v32, -1e+30  ;;  %v1539_v35 = vsel %vm6801_vm2, %v1438_v33, -1e+30 }
 0x3f0   : > { %v5555_v36 = vpop.f32.mrf.mxu0  ;;  %v5561_v37 = vpop.f32.mrf.mxu1  ;;  %v1546_v38 = vsel %vm1542_vm3, %v1539_v35, -inf  ;;  %v1543_v49 = vsel %vm1542_vm3, %v1538_v34, -inf }
 0x3f1   : > { %1547 = vmax.xlane.f32.xlu0 %v1546_v38  ;;  %1544 = vmax.xlane.f32.xlu1 %v1543_v49 }
 0x3f2   : > { %v1395_v39 = vpop.f32.mrf.mxu0  ;;  %v1441_v40 = vpop.f32.mrf.mxu1 }
 0x3f4   : > { %v5556_v41 = vpop.f32.mrf.mxu0  ;;  %v5562_v43 = vpop.f32.mrf.mxu1 }
 0x3f6   : > { %v1484_v44 = vpop.f32.mrf.mxu0  ;;  %v1530_v45 = vpop.f32.mrf.mxu1 }
 0x3f7   : > { %v1540_v46 = vsel %vm6801_vm2, %v1484_v44, -1e+30  ;;  %v1541_v51 = vsel %vm6801_vm2, %v1530_v45, -1e+30 }
 0x3f8   : > { %v5567_v47 = vpop.f32.mrf.mxu0  ;;  %v5573_v48 = vpop.f32.mrf.mxu1  ;;  %v1549_v50 = vsel %vm1542_vm3, %v1540_v46, -inf  ;;  %v1552_v57 = vsel %vm1542_vm3, %v1541_v51, -inf }
 0x3f9   : > { %1550 = vmax.xlane.f32.xlu1 %v1549_v50 }
 0x3fa   : > { %v1487_v52 = vpop.f32.mrf.mxu0  ;;  %v1533_v53 = vpop.f32.mrf.mxu1 }
 0x3fc   : > { %v5568_v55 = vpop.f32.mrf.mxu0  ;;  %v5574_v56 = vpop.f32.mrf.mxu1 }
 0x3fd   : > { %1553 = vmax.xlane.f32.xlu1 %v1552_v57 }
 0x40e   : > { %1205 = vrot.lane.b32.xlu1 %v6725_v42, %s6421_s26 }
 0x47a   : > { %v1548_v58 = vpop.xlane.xlu0 %1547  ;;  %v1545_v60 = vpop.xlane.xlu1 %1544 }
 0x47b   : > { %v1556_v61 = vsub.f32 %v1539_v35, %v1548_v58  ;;  %v1555_v62 = vsub.f32 %v1538_v34, %v1545_v60 }
 0x47d   : > { %v1561_v63 = vmul.f32 1.442695, %v1556_v61  ;;  %v1559_v0 = vmul.f32 1.442695, %v1555_v62 }
 0x47f   : > { %6099 = vpow2.f32 %v1561_v63 }
 0x480   : > { %6101 = vpow2.f32 %v1559_v0 }
 0x482   : > { %v1551_v7 = vpop.xlane.xlu1 %1550 }
 0x483   : > { %v1557_v10 = vsub.f32 %v1540_v46, %v1551_v7 }
 0x485   : > { %v1563_v12 = vmul.f32 1.442695, %v1557_v10 }
 0x486   : > { %v1554_v8 = vpop.xlane.xlu1 %1553 }
 0x487   : > { %v1558_v9 = vsub.f32 %v1541_v51, %v1554_v8 }
 0x489   : > { %v1565_v11 = vmul.f32 1.442695, %v1558_v9 }
 0x48a   : > { %v1206_v17 = vpop.permute.xlu1 %1205 }
 0x48b   : > { %6103 = vpow2.f32 %v1565_v11  ;;  %v1211_v20 = vcombine.low %v6725_v42, %v1206_v17  ;;  %v1212_v21 = vcombine.high %v6725_v42, %v1206_v17 }
 0x48c   : > { %v6819_v2 = vpop.eup %6099  ;;  %6105 = vpow2.f32 %v1563_v12 }
 0x48d   : > { %v6821_v4 = vpop.eup %6101  ;;  %v1570_v5 = vsel %vm1542_vm3, %v6819_v2, 0.0  ;;  %v1219_v27 = vrot.slane %v1211_v20, %v6740_v59  ;;  %v1226_v28 = vrot.slane %v1212_v21, %v6740_v59 }
 0x48e   : > { %v1567_v6 = vsel %vm1542_vm3, %v6821_v4, 0.0  ;;  %1571 = vadd.xlane.f32.xlu1 %v1570_v5 }
 0x48f   : > { %1568 = vadd.xlane.f32.xlu0 %v1567_v6 }
 0x498   : > { %v6831_v13 = vpop.eup %6103 }
 0x499   : > { %v6833_v14 = vpop.eup %6105  ;;  %v1576_v15 = vsel %vm1542_vm3, %v6831_v13, 0.0 }
 0x49a   : > { %v1573_v16 = vsel %vm1542_vm3, %v6833_v14, 0.0 }
 0x49f   : > { %1208 = vrot.lane.b32.xlu1 %v6725_v42, %s6419_s28 }
 0x4a5   : > { %1202 = vrot.lane.b32.xlu0 %v6725_v42, %s6420_s25 }
 0x4c3   : > { %1577 = vadd.xlane.f32.xlu1 %v1576_v15 }
 0x4c4   : > { %1574 = vadd.xlane.f32.xlu0 %v1573_v16 }
 0x517   : > { %v1572_v18 = vpop.xlane.xlu1 %1571 }
 0x518   : > { %v1569_v19 = vpop.xlane.xlu0 %1568  ;;  %6107 = vrcp.f32 %v1572_v18 }
 0x519   : > { %6109 = vrcp.f32 %v1569_v19 }
 0x51b   : > { %v1209_v23 = vpop.permute.xlu1 %1208 }
 0x51c   : > { %v1203_v24 = vpop.permute.xlu0 %1202 }
 0x51d   : > { %v1227_v25 = vcombine.low %v1203_v24, %v1209_v23  ;;  %v1228_v26 = vcombine.high %v1203_v24, %v1209_v23 }
 0x51f   : > { %v1235_v29 = vrot.slane %v1227_v25, %v6740_v59  ;;  %v1242_v30 = vrot.slane %v1228_v26, %v6740_v59  ;;  %v5881_v25 = vld [vmem:[#allocation8 + $0x38] sm:$0xff]   ;;  %v5882_v26 = vld [vmem:[#allocation8 + $0x30] sm:$0xff]  }
 0x521   : > { %v1243_v32 = vcombine.low %v1219_v27, %v1235_v29  ;;  %v1244_v33 = vcombine.high %v1219_v27, %v1235_v29  ;;  %v1259_v34 = vcombine.low %v1226_v28, %v1242_v30  ;;  %v1260_v35 = vcombine.high %v1226_v28, %v1242_v30  ;;  %v5885_v27 = vld [vmem:[#allocation8 + $0x18] sm:$0xff]   ;;  %v5886_v28 = vld [vmem:[#allocation8 + $0x10] sm:$0xff]  }
 0x523   : > { %v1251_v42 = vrot.slane %v1243_v32, %v6743_v1  ;;  %v1258_v36 = vrot.slane %v1244_v33, %v6743_v1  ;;  %v1267_v37 = vrot.slane %v1259_v34, %v6743_v1  ;;  %v1274_v38 = vrot.slane %v1260_v35, %v6743_v1 }
 0x525   : > { %v1279_v49 = vcombine.low %v1251_v42, %v1258_v36  ;;  %v5139_v39 = vcombine.high %v1251_v42, %v1258_v36  ;;  %v1295_v40 = vcombine.low %v1267_v37, %v1274_v38  ;;  %v5140_v41 = vcombine.high %v1267_v37, %v1274_v38  ;;  %v6108_v52 = vpop.eup %6107 }
 0x526   : > { %v6110_v58 = vpop.eup %6109  ;;  %v1584_v7 = vmul.f32 %v6108_v52, %v6819_v2 }
 0x527   : > { %v1286_v43 = vrot.slane %v1279_v49, %v6740_v59  ;;  %v1294_v44 = vrot.slane %v5139_v39, %v6740_v59  ;;  %v1302_v45 = vrot.slane %v1295_v40, %v6740_v59  ;;  %v1310_v46 = vrot.slane %v5140_v41, %v6740_v59 }
 0x528   : > { %v1583_v6 = vmul.f32 %v6110_v58, %v6821_v4  ;;  %v1588_v15 = vpack.c.bf16 %v1584_v7, %v1584_v7  ;;  %v5887_v58 = vld [vmem:[#allocation8 + $0x8] sm:$0xff]  }
 0x529   : > { %v1311_v47 = vcombine.low %v1286_v43, %v1294_v44  ;;  %v1327_v48 = vcombine.low %v1302_v45, %v1310_v46  ;;  %v1312_v50 = vcombine.high %v1286_v43, %v1294_v44  ;;  %v1328_v51 = vcombine.high %v1302_v45, %v1310_v46 }
 0x52a   : > { %v1587_v12 = vpack.c.bf16 %v1583_v6, %v1583_v6 }
 0x52b   : > { %v1319_v53 = vrot.slane %v1311_v47, %v6743_v1  ;;  %v1335_v55 = vrot.slane %v1327_v48, %v6743_v1  ;;  %v1326_v56 = vrot.slane %v1312_v50, %v6743_v1  ;;  %v1342_v57 = vrot.slane %v1328_v51, %v6743_v1 }
 0x52d   : > { %v1343_v60 = vcombine.low %v1319_v53, %v1335_v55  ;;  %v1344_v61 = vcombine.high %v1319_v53, %v1335_v55  ;;  %v1345_v62 = vcombine.low %v1326_v56, %v1342_v57  ;;  %v1346_v63 = vcombine.high %v1326_v56, %v1342_v57 }
 0x52f   : > { %v1347_v0 = vpack.c.bf16 %v1343_v60, %v1343_v60  ;;  %v1348_v5 = vpack.c.bf16 %v1344_v61, %v1344_v61  ;;  %v1349_v10 = vpack.c.bf16 %v1345_v62, %v1345_v62  ;;  %v1350_v11 = vpack.c.bf16 %v1346_v63, %v1346_v63 }
 0x531   : > { %v1596_v8 = vsel %vm1594_vm4, %v1347_v0, 0  ;;  %v1642_v9 = vsel %vm1594_vm4, %v1348_v5, 0  ;;  %v1688_v2 = vsel %vm1594_vm4, %v1349_v10, 0  ;;  %v1734_v4 = vsel %vm1594_vm4, %v1350_v11, 0 }
 0x532   : > { %5576 = vmatpush3.bf16.msra.mxu0 %v1596_v8  ;;  %5582 = vmatpush3.bf16.msra.mxu1 %v1642_v9  ;;  %v5888_v9 = vld [vmem:[#allocation8] sm:$0xff]  }
 0x533   : > { %5587 = vmatprep.subr.bf16.mxu0 %v6416_v3  ;;  %5593 = vmatprep.subr.bf16.mxu1 %v6416_v3 }
 0x535   : > { %5578 = vmatmul.mubr.msk.bf16.vlgmr.msra.gmra.mxu0 %vm1542_vm3, %v1587_v12  ;;  %5584 = vmatmul.mubr.msk.bf16.vlgmr.msra.gmra.mxu1 %vm1542_vm3, %v1588_v15 }
 0x536   : > { %5588 = vmatpush3.bf16.msra.mxu0 %v1688_v2  ;;  %5594 = vmatpush3.bf16.msra.mxu1 %v1734_v4 }
 0x537   : > { %5589 = vmatprep.mubr.msk.bf16.mxu0 %vm6418_vm0, %v6416_v3  ;;  %5595 = vmatprep.mubr.msk.bf16.mxu1 %vm6418_vm0, %v6416_v3 }
 0x538   : > { %5599 = vmatprep.subr.bf16.mxu0 %v6416_v3 }
 0x54c   : > { %v1578_v16 = vpop.xlane.xlu1 %1577 }
 0x54d   : > { %v1575_v17 = vpop.xlane.xlu0 %1574  ;;  %6111 = vrcp.f32 %v1578_v16 }
 0x54e   : > { %6113 = vrcp.f32 %v1575_v17 }
 0x55a   : > { %v6112_v18 = vpop.eup %6111 }
 0x55b   : > { %v6114_v19 = vpop.eup %6113  ;;  %v1586_v20 = vmul.f32 %v6112_v18, %v6831_v13  ;;  %v5883_v13 = vld [vmem:[#allocation8 + $0x28] sm:$0xff]  }
 0x55c   : > { %v1585_v21 = vmul.f32 %v6114_v19, %v6833_v14  ;;  %v5884_v14 = vld [vmem:[#allocation8 + $0x20] sm:$0xff]  }
 0x55d   : > { %v1590_v23 = vpack.c.bf16 %v1586_v20, %v1586_v20 }
 0x55e   : > { %v1589_v24 = vpack.c.bf16 %v1585_v21, %v1585_v21 }
 0x55f   : > { %5596 = vmatmul.mubr.msk.bf16.vlgmr.msra.gmra.mxu1 %vm1542_vm3, %v1590_v23 }
 0x560   : > { %5590 = vmatmul.mubr.msk.bf16.vlgmr.msra.gmra.mxu0 %vm1542_vm3, %v1589_v24  ;;  %2316 = vmatprep.mubr.bf16.mxu1 %v6417_v22 }
 0x561   : > { %5615 = vmatprep.mubr.msk.bf16.mxu0 %vm6418_vm0, %v6416_v3  ;;  %5600 = vmatpush3.bf16.msra.mxu0 %v5881_v25 }
 0x562   : > { %5601 = vmatprep.subr.bf16.mxu0 %v6416_v3 }
 0x565   : > { %5602 = vmatpush3.bf16.msra.mxu0 %v5882_v26 }
 0x566   : > { %5603 = vmatprep.subr.bf16.mxu0 %v6416_v3 }
 0x569   : > { %5604 = vmatpush3.bf16.msra.mxu0 %v5883_v13 }
 0x56a   : > { %5605 = vmatprep.subr.bf16.mxu0 %v6416_v3 }
 0x56d   : > { %5606 = vmatpush3.bf16.msra.mxu0 %v5884_v14 }
 0x56e   : > { %5607 = vmatprep.subr.bf16.mxu0 %v6416_v3 }
 0x571   : > { %5608 = vmatpush3.bf16.msra.mxu0 %v5885_v27 }
 0x572   : > { %5609 = vmatprep.subr.bf16.mxu0 %v6416_v3 }
 0x575   : > { %5610 = vmatpush3.bf16.msra.mxu0 %v5886_v28 }
 0x576   : > { %5611 = vmatprep.subr.bf16.mxu0 %v6416_v3 }
 0x579   : > { %5612 = vmatpush3.bf16.msra.mxu0 %v5887_v58  ;;  %v5907_v58 = vld [vmem:[#allocation10 + $0x80] ss:$16 sps:$4 sm:$0xff]  }
 0x57a   : > { %5613 = vmatprep.subr.bf16.mxu0 %v6416_v3 }
 0x57d   : > { %5614 = vmatpush3.bf16.msra.mxu0 %v5888_v9  ;;  %v5919_v9 = vld [vmem:[#allocation10 + $0x40] ss:$16 sps:$4 sm:$0xff]  }
 0x5f5   : > { %v1632_v29 = vpop.f32.mrf.mxu0  ;;  %v1678_v30 = vpop.f32.mrf.mxu1 }
 0x5f7   : > { %v5579_v32 = vpop.f32.mrf.mxu0  ;;  %v5585_v33 = vpop.f32.mrf.mxu1 }
 0x5f8   : > { %v5151_v33 = vld [vmem:[%s7232_s5] ss:$0 sm:$0xff] }
 0x5f9   : > { %v1635_v34 = vpop.f32.mrf.mxu0  ;;  %v1681_v35 = vpop.f32.mrf.mxu1 }
 0x5fb   : > { %v5580_v42 = vpop.f32.mrf.mxu0  ;;  %v5586_v36 = vpop.f32.mrf.mxu1 }
 0x5fc   : > { %v6139_v36 = vld [vmem:[%s6684_s23] sm:$0xff]  ;;  %s7184_s23 = scalar_lea.hbm %s7295_s15, %s5363_s18 }
 0x61f   : > { %v1770_v37 = vpop.f32.mrf.mxu1 }
 0x620   : > { %v1724_v38 = vpop.f32.mrf.mxu0  ;;  %v1792_v49 = vcombine.low %v1678_v30, %v1770_v37  ;;  %v1793_v39 = vcombine.high %v1678_v30, %v1770_v37 }
 0x621   : > { %v1776_v40 = vcombine.low %v1632_v29, %v1724_v38  ;;  %v1777_v41 = vcombine.high %v1632_v29, %v1724_v38  ;;  %v5597_v43 = vpop.f32.mrf.mxu1 }
 0x622   : > { %v1800_v44 = vrot.slane %v1792_v49, %v6740_v59  ;;  %v1807_v45 = vrot.slane %v1793_v39, %v6740_v59  ;;  %v5591_v46 = vpop.f32.mrf.mxu0  ;;  %v5889_v39 = vld [vmem:[#allocation10 + $0xe0] ss:$16 sps:$4 sm:$0xff]   ;;  %v5894_v43 = vld [vmem:[#allocation10 + $0xec] ss:$16 sps:$4 sm:$0xff]  }
 0x623   : > { %v1784_v47 = vrot.slane %v1776_v40, %v6740_v59  ;;  %v1791_v48 = vrot.slane %v1777_v41, %v6740_v59  ;;  %v1773_v50 = vpop.f32.mrf.mxu1  ;;  %v5891_v40 = vld [vmem:[#allocation10 + $0xe4] ss:$16 sps:$4 sm:$0xff]   ;;  %v5892_v41 = vld [vmem:[#allocation10 + $0xe8] ss:$16 sps:$4 sm:$0xff]   ;;  %2325 = vmatprep.subr.bf16.mxu0 %v5894_v43  ;;  %v5895_v46 = vld [vmem:[#allocation10 + $0xc0] ss:$16 sps:$4 sm:$0xff]  }
 0x624   : > { %v1727_v51 = vpop.f32.mrf.mxu0  ;;  %2284 = vmatprep.subr.bf16.mxu1 %v5891_v40  ;;  %v5949_v40 = vld [vmem:[#allocation11 + $0x60] sm:$0xff]  }
 0x625   : > { %v1808_v52 = vcombine.low %v1784_v47, %v1800_v44  ;;  %v1809_v53 = vcombine.high %v1784_v47, %v1800_v44  ;;  %v1824_v55 = vcombine.low %v1791_v48, %v1807_v45  ;;  %v1825_v56 = vcombine.high %v1791_v48, %v1807_v45  ;;  %v5598_v57 = vpop.f32.mrf.mxu1  ;;  %v5897_v44 = vld [vmem:[#allocation10 + $0xc4] ss:$16 sps:$4 sm:$0xff]   ;;  %v5900_v45 = vld [vmem:[#allocation10 + $0xcc] ss:$16 sps:$4 sm:$0xff]   ;;  %2285 = vmatpush1.bf16.msra.mxu1 %v5889_v39  ;;  %v5898_v47 = vld [vmem:[#allocation10 + $0xc8] ss:$16 sps:$4 sm:$0xff]  }
 0x626   : > { %v5592_v60 = vpop.f32.mrf.mxu0  ;;  %2286 = vmatprep.subr.bf16.mxu1 %v5897_v44  ;;  %v5904_v57 = vld [vmem:[#allocation10 + $0xa8] ss:$16 sps:$4 sm:$0xff]   ;;  %v5951_v43 = vld [vmem:[#allocation11 + $0x20] sm:$0xff]  }
 0x627   : > { %v1816_v61 = vrot.slane %v1808_v52, %v6743_v1  ;;  %v1823_v62 = vrot.slane %v1809_v53, %v6743_v1  ;;  %v1832_v63 = vrot.slane %v1824_v55, %v6743_v1  ;;  %v1839_v0 = vrot.slane %v1825_v56, %v6743_v1  ;;  %v5903_v53 = vld [vmem:[#allocation10 + $0xa4] ss:$16 sps:$4 sm:$0xff]   ;;  %v5906_v55 = vld [vmem:[#allocation10 + $0xac] ss:$16 sps:$4 sm:$0xff]   ;;  %v5901_v56 = vld [vmem:[#allocation10 + $0xa0] ss:$16 sps:$4 sm:$0xff]  }
 0x628   : > { %v5909_v60 = vld [vmem:[#allocation10 + $0x84] ss:$16 sps:$4 sm:$0xff]   ;;  %v5948_v39 = vld [vmem:[#allocation11 + $0xa8] sm:$0xff]  }
 0x629   : > { %v1844_v5 = vcombine.low %v1816_v61, %v1823_v62  ;;  %v5149_v6 = vcombine.high %v1816_v61, %v1823_v62  ;;  %v1860_v7 = vcombine.low %v1832_v63, %v1839_v0  ;;  %v5150_v8 = vcombine.high %v1832_v63, %v1839_v0  ;;  %2287 = vmatpush1.bf16.msra.mxu1 %v5895_v46  ;;  %v5910_v61 = vld [vmem:[#allocation10 + $0x88] ss:$16 sps:$4 sm:$0xff]   ;;  %v5912_v62 = vld [vmem:[#allocation10 + $0x8c] ss:$16 sps:$4 sm:$0xff]   ;;  %v5915_v63 = vld [vmem:[#allocation10 + $0x64] ss:$16 sps:$4 sm:$0xff]  }
 0x62a   : > { %2288 = vmatprep.subr.bf16.mxu1 %v5903_v53  ;;  %v5918_v0 = vld [vmem:[#allocation10 + $0x6c] ss:$16 sps:$4 sm:$0xff]   ;;  %v5952_v44 = vld [vmem:[#allocation11 + $0xa0] sm:$0xff]   ;;  %v5960_v53 = vld [vmem:[#allocation11 + $0x90] sm:$0xff]  }
 0x62b   : > { %v1851_v10 = vrot.slane %v1844_v5, %v6740_v59  ;;  %v1859_v11 = vrot.slane %v5149_v6, %v6740_v59  ;;  %v1867_v12 = vrot.slane %v1860_v7, %v6740_v59  ;;  %v1875_v15 = vrot.slane %v5150_v8, %v6740_v59  ;;  %v5913_v5 = vld [vmem:[#allocation10 + $0x60] ss:$16 sps:$4 sm:$0xff]   ;;  %v5916_v6 = vld [vmem:[#allocation10 + $0x68] ss:$16 sps:$4 sm:$0xff]   ;;  %v5921_v7 = vld [vmem:[#allocation10 + $0x44] ss:$16 sps:$4 sm:$0xff]  }
 0x62c   : > { %v5924_v8 = vld [vmem:[#allocation10 + $0x4c] ss:$16 sps:$4 sm:$0xff]  }
 0x62d   : > { %v1877_v2 = vcombine.high %v1851_v10, %v1859_v11  ;;  %v1893_v4 = vcombine.high %v1867_v12, %v1875_v15  ;;  %v1876_v16 = vcombine.low %v1851_v10, %v1859_v11  ;;  %v1892_v17 = vcombine.low %v1867_v12, %v1875_v15  ;;  %2289 = vmatpush1.bf16.msra.mxu1 %v5901_v56  ;;  %v5922_v10 = vld [vmem:[#allocation10 + $0x48] ss:$16 sps:$4 sm:$0xff]   ;;  %v5927_v11 = vld [vmem:[#allocation10 + $0x24] ss:$16 sps:$4 sm:$0xff]   ;;  %v5930_v12 = vld [vmem:[#allocation10 + $0x2c] ss:$16 sps:$4 sm:$0xff]  }
 0x62e   : > { %2290 = vmatprep.subr.bf16.mxu1 %v5909_v60  ;;  %v5925_v15 = vld [vmem:[#allocation10 + $0x20] ss:$16 sps:$4 sm:$0xff]   ;;  %v5954_v46 = vld [vmem:[#allocation11 + $0xd8] sm:$0xff]   ;;  %v5962_v56 = vld [vmem:[#allocation11 + $0xc8] sm:$0xff]  }
 0x62f   : > { %v1891_v18 = vrot.slane %v1877_v2, %v6743_v1  ;;  %v1907_v19 = vrot.slane %v1893_v4, %v6743_v1  ;;  %v1884_v20 = vrot.slane %v1876_v16, %v6743_v1  ;;  %v1900_v21 = vrot.slane %v1892_v17, %v6743_v1  ;;  %v5928_v2 = vld [vmem:[#allocation10 + $0x28] ss:$16 sps:$4 sm:$0xff]   ;;  %v5933_v4 = vld [vmem:[#allocation10 + $0x4] ss:$16 sps:$4 sm:$0xff]   ;;  %v5936_v16 = vld [vmem:[#allocation10 + $0xc] ss:$16 sps:$4 sm:$0xff]  }
 0x630   : > { %v5931_v17 = vld [vmem:[#allocation10] ss:$16 sps:$4 sm:$0xff]  }
 0x631   : > { %v1910_v23 = vcombine.low %v1891_v18, %v1907_v19  ;;  %v1909_v24 = vcombine.high %v1884_v20, %v1900_v21  ;;  %v1908_v25 = vcombine.low %v1884_v20, %v1900_v21  ;;  %v1911_v26 = vcombine.high %v1891_v18, %v1907_v19  ;;  %2291 = vmatpush1.bf16.msra.mxu1 %v5907_v58  ;;  %v5934_v18 = vld [vmem:[#allocation10 + $0x8] ss:$16 sps:$4 sm:$0xff]   ;;  %v5965_v60 = vld [vmem:[#allocation11 + $0x40] sm:$0xff]  }
 0x632   : > { %2292 = vmatprep.subr.bf16.mxu1 %v5915_v63  ;;  %v5937_v19 = vld [vmem:[#allocation11 + $0x78] sm:$0xff]   ;;  %v5964_v58 = vld [vmem:[#allocation11 + $0x88] sm:$0xff]   ;;  %v5968_v63 = vld [vmem:[#allocation11 + $0x80] sm:$0xff]  }
 0x633   : > { %1917 = vrot.lane.b32.xlu1 %v1910_v23, %s6421_s26  ;;  %1913 = vrot.lane.b32.xlu0 %v1909_v24, %s6419_s28  ;;  %v5938_v20 = vld [vmem:[#allocation11 + $0xf8] sm:$0xff]  }
 0x635   : > { %2293 = vmatpush1.bf16.msra.mxu1 %v5913_v5  ;;  %v2114_v5 = vsub.s32 2, %v6737_v54 }
 0x636   : > { %2294 = vmatprep.subr.bf16.mxu1 %v5921_v7  ;;  %v2110_v7 = vsub.s32 1, %v6737_v54 }
 0x637   : > { %1921 = vrot.lane.b32.xlu0 %v1911_v26, %s6420_s25  ;;  %v5160_v26 = vld [vmem:[%s7233_s6] ss:$0 sm:$0xff] }
 0x639   : > { %2295 = vmatpush1.bf16.msra.mxu1 %v5919_v9 }
 0x63a   : > { %2296 = vmatprep.subr.bf16.mxu1 %v5927_v11 }
 0x63d   : > { %2297 = vmatpush1.bf16.msra.mxu1 %v5925_v15 }
 0x63e   : > { %2298 = vmatprep.subr.bf16.mxu1 %v5933_v4 }
 0x641   : > { %2299 = vmatpush1.bf16.msra.mxu1 %v5931_v17 }
 0x642   : > { %5400 = vmatprep.subr.bf16.mxu1 %v5937_v19 }
 0x6a5   : > { %v1914_v13 = vpop.permute.xlu0 %1913  ;;  %v1918_v14 = vpop.permute.xlu1 %1917 }
 0x6a6   : > { %v1924_v27 = vsel %vm1351_vm1, %v1908_v25, %v1914_v13 }
 0x6a7   : > { %v1926_v29 = vsel %vm1925_vm5, %v1924_v27, %v1918_v14  ;;  %v5161_v14 = vld [vmem:[%s7234_s7] ss:$0 sm:$0xff] }
 0x6a9   : > { %v1922_v28 = vpop.permute.xlu0 %1921 }
 0x6aa   : > { %v1928_v30 = vsel %vm1927_vm6, %v1926_v29, %v1922_v28  ;;  %v5939_v29 = vld [vmem:[#allocation11 + $0x38] sm:$0xff]  }
 0x6ab   : > { %v1929_v32 = vpack.c.bf16 %v1928_v30, %v1928_v30  ;;  %v5940_v30 = vld [vmem:[#allocation11 + $0xb8] sm:$0xff]  }
 0x6ad   : > { %5616 = vmatmul.mubr.bf16.vlgmr.msra.gmra.mxu0 %v1929_v32 }
 0x6ae   : > { %2357 = vmatprep.mubr.bf16.mxu0 %v6417_v22  ;;  %2326 = vmatpush1.bf16.msra.mxu0 %v5892_v41  ;;  %v5950_v41 = vld [vmem:[#allocation11 + $0xe0] sm:$0xff]  }
 0x6af   : > { %2327 = vmatprep.subr.bf16.mxu0 %v5900_v45  ;;  %v5953_v45 = vld [vmem:[#allocation11 + $0x58] sm:$0xff]  }
 0x6b2   : > { %2328 = vmatpush1.bf16.msra.mxu0 %v5898_v47  ;;  %v5955_v47 = vld [vmem:[#allocation11 + $0x18] sm:$0xff]  }
 0x6b3   : > { %2329 = vmatprep.subr.bf16.mxu0 %v5906_v55  ;;  %v5961_v55 = vld [vmem:[#allocation11 + $0x48] sm:$0xff]  }
 0x6b6   : > { %2330 = vmatpush1.bf16.msra.mxu0 %v5904_v57  ;;  %v5963_v57 = vld [vmem:[#allocation11 + $0x8] sm:$0xff]  }
 0x6b7   : > { %2331 = vmatprep.subr.bf16.mxu0 %v5912_v62  ;;  %v5967_v62 = vld [vmem:[#allocation11] sm:$0xff]  }
 0x6ba   : > { %2332 = vmatpush1.bf16.msra.mxu0 %v5910_v61  ;;  %v5966_v61 = vld [vmem:[#allocation11 + $0xc0] sm:$0xff]  }
 0x6bb   : > { %2333 = vmatprep.subr.bf16.mxu0 %v5918_v0  ;;  %v2106_v0 = vsub.s32 0, %v6737_v54 }
 0x6be   : > { %2334 = vmatpush1.bf16.msra.mxu0 %v5916_v6  ;;  %v2102_v6 = vld [vmem:[%s7236_s9] sm:$0xf] }
 0x6bf   : > { %2335 = vmatprep.subr.bf16.mxu0 %v5924_v8  ;;  %v2118_v8 = vsub.s32 3, %v6737_v54  ;;  %v2107_v9 = vrot.slane %v2102_v6, %v2106_v0  ;;  %v2111_v11 = vrot.slane %v2102_v6, %v2110_v7 }
 0x6c2   : > { %2336 = vmatpush1.bf16.msra.mxu0 %v5922_v10  ;;  %v2115_v10 = vrot.slane %v2102_v6, %v2114_v5 }
 0x6c3   : > { %2337 = vmatprep.subr.bf16.mxu0 %v5930_v12  ;;  %v2119_v12 = vrot.slane %v2102_v6, %v2118_v8  ;;  %v5984_v6 = vld [vmem:[#allocation7 + $0x128] ss:$12 sps:$4 sm:$0xff]  }
 0x6c6   : > { %2338 = vmatpush1.bf16.msra.mxu0 %v5928_v2 }
 0x6c7   : > { %2339 = vmatprep.subr.bf16.mxu0 %v5936_v16 }
 0x6ca   : > { %2340 = vmatpush1.bf16.msra.mxu0 %v5934_v18 }
 0x6cb   : > { %5422 = vmatprep.subr.bf16.mxu0 %v5938_v20 }
 0x76d   : > { %v2035_v34 = vpop.f32.mrf.mxu0 }
 0x76e   : > { %v2036_v35 = vadd.f32 %v5151_v33, %v2035_v34  ;;  %v5941_v33 = vld [vmem:[#allocation11 + $0x70] sm:$0xff]  }
 0x76f   : > { %v5617_v42 = vpop.f32.mrf.mxu0  ;;  %v5942_v34 = vld [vmem:[#allocation11 + $0xf0] sm:$0xff]  }
 0x770   : > { %v6913_v37 = vadd.f32 %v6139_v36, %v2036_v35  ;;  %v5943_v35 = vld [vmem:[#allocation11 + $0x30] sm:$0xff]   ;;  %v5945_v36 = vld [vmem:[#allocation11 + $0x68] sm:$0xff]  }
 0x771   : > { %v2038_v38 = vpop.f32.mrf.mxu0  ;;  %v5944_v42 = vld [vmem:[#allocation11 + $0xb0] sm:$0xff]  }
 0x772   : > { %2044 = vadd.xlane.f32.xlu1 %v6913_v37  ;;  %v5946_v38 = vld [vmem:[#allocation11 + $0xe8] sm:$0xff]  }
 0x773   : > { %v5618_v49 = vpop.f32.mrf.mxu0 }
 0x774   : > { %v5947_v49 = vld [vmem:[#allocation11 + $0x28] sm:$0xff]  }
 0x7fb   : > { %v2045_v48 = vpop.xlane.xlu1 %2044 }
 0x7fc   : > { %v2046_v50 = vmul.f32 0.0078125, %v2045_v48  ;;  %v5956_v48 = vld [vmem:[#allocation11 + $0x98] sm:$0xff]  }
 0x7fe   : > { %v2047_v51 = vsub.f32 %v6913_v37, %v2046_v50  ;;  %v5957_v50 = vld [vmem:[#allocation11 + $0x50] sm:$0xff]  }
 0x800   : > { %v2048_v52 = vmul.f32 %v2047_v51, %v2047_v51 }
 0x802   : > { %2049 = vadd.xlane.f32.xlu0 %v2048_v52  ;;  %v5959_v52 = vld [vmem:[#allocation11 + $0x10] sm:$0xff]  }
 0x88b   : > { %v2050_v21 = vpop.xlane.xlu0 %2049 }
 0x88c   : > { %v2051_v23 = vmul.f32 0.0078125, %v2050_v21 }
 0x88e   : > { %v2052_v24 = vadd.f32 1e-05, %v2051_v23 }
 0x890   : > { %6115 = vrsqrt.f32 %v2052_v24 }
 0x89d   : > { %v6116_v25 = vpop.eup %6115 }
 0x89e   : > { %v2054_v13 = vmul.f32 %v6116_v25, %v2047_v51  ;;  %v5958_v51 = vld [vmem:[#allocation11 + $0xd0] sm:$0xff]  }
 0x8a0   : > { %v2061_v27 = vmul.f32 %v5160_v26, %v2054_v13 }
 0x8a2   : > { %v2068_v28 = vadd.f32 %v5161_v14, %v2061_v27 }
 0x8a4   : > { %v2069_v32 = vpack.c.bf16 %v2068_v28, %v2068_v28 }
 0x8a6   : > { %2317 = vmatmul.mubr.bf16.vlgmr.msra.gmra.mxu1 %v2069_v32  ;;  %2358 = vmatmul.mubr.bf16.vlgmr.msra.gmra.mxu0 %v2069_v32 }
 0x8a7   : > { %5401 = vmatpush3.bf16.msra.mxu1 %v5939_v29  ;;  %5423 = vmatpush3.bf16.msra.mxu0 %v5940_v30 }
 0x8a8   : > { %5402 = vmatprep.subr.bf16.mxu1 %v5941_v33  ;;  %5424 = vmatprep.subr.bf16.mxu0 %v5942_v34 }
 0x8ab   : > { %5403 = vmatpush3.bf16.msra.mxu1 %v5943_v35  ;;  %5425 = vmatpush3.bf16.msra.mxu0 %v5944_v42  ;;  %v5194_v35 = vld [vmem:[%s7238_s11] ss:$0 sm:$0xff] }
 0x8ac   : > { %5404 = vmatprep.subr.bf16.mxu1 %v5945_v36  ;;  %5426 = vmatprep.subr.bf16.mxu0 %v5946_v38 }
 0x8af   : > { %5405 = vmatpush3.bf16.msra.mxu1 %v5947_v49  ;;  %5427 = vmatpush3.bf16.msra.mxu0 %v5948_v39 }
 0x8b0   : > { %5406 = vmatprep.subr.bf16.mxu1 %v5949_v40  ;;  %5428 = vmatprep.subr.bf16.mxu0 %v5950_v41 }
 0x8b3   : > { %5407 = vmatpush3.bf16.msra.mxu1 %v5951_v43  ;;  %5429 = vmatpush3.bf16.msra.mxu0 %v5952_v44 }
 0x8b4   : > { %5408 = vmatprep.subr.bf16.mxu1 %v5953_v45  ;;  %5430 = vmatprep.subr.bf16.mxu0 %v5954_v46 }
 0x8b7   : > { %5409 = vmatpush3.bf16.msra.mxu1 %v5955_v47  ;;  %5431 = vmatpush3.bf16.msra.mxu0 %v5956_v48  ;;  %v5969_v47 = vld [vmem:[#allocation7 + $0x168] ss:$12 sps:$4 sm:$0xff]   ;;  %v5971_v48 = vld [vmem:[#allocation7 + $0x16c] ss:$12 sps:$4 sm:$0xff]  }
 0x8b8   : > { %5410 = vmatprep.subr.bf16.mxu1 %v5957_v50  ;;  %5432 = vmatprep.subr.bf16.mxu0 %v5958_v51  ;;  %v5972_v50 = vld [vmem:[#allocation7 + $0x170] ss:$12 sps:$4 sm:$0xff]   ;;  %v5975_v51 = vld [vmem:[#allocation7 + $0x154] ss:$12 sps:$4 sm:$0xff]  }
 0x8bb   : > { %5411 = vmatpush3.bf16.msra.mxu1 %v5959_v52  ;;  %5433 = vmatpush3.bf16.msra.mxu0 %v5960_v53  ;;  %v5976_v52 = vld [vmem:[#allocation7 + $0x158] ss:$12 sps:$4 sm:$0xff]   ;;  %v5973_v53 = vld [vmem:[#allocation7 + $0x150] ss:$12 sps:$4 sm:$0xff]  }
 0x8bc   : > { %5412 = vmatprep.subr.bf16.mxu1 %v5961_v55  ;;  %5434 = vmatprep.subr.bf16.mxu0 %v5962_v56 }
 0x8bf   : > { %5413 = vmatpush3.bf16.msra.mxu1 %v5963_v57  ;;  %5435 = vmatpush3.bf16.msra.mxu0 %v5964_v58  ;;  %v5979_v58 = vld [vmem:[#allocation7 + $0x13c] ss:$12 sps:$4 sm:$0xff]  }
 0x8c0   : > { %5414 = vmatprep.subr.bf16.mxu1 %v5965_v60  ;;  %5436 = vmatprep.subr.bf16.mxu0 %v5966_v61  ;;  %v5977_v60 = vld [vmem:[#allocation7 + $0x138] ss:$12 sps:$4 sm:$0xff]   ;;  %v5980_v61 = vld [vmem:[#allocation7 + $0x140] ss:$12 sps:$4 sm:$0xff]  }
 0x8c3   : > { %5415 = vmatpush3.bf16.msra.mxu1 %v5967_v62  ;;  %5437 = vmatpush3.bf16.msra.mxu0 %v5968_v63  ;;  %v5981_v62 = vld [vmem:[#allocation7 + $0x120] ss:$12 sps:$4 sm:$0xff]   ;;  %v5983_v63 = vld [vmem:[#allocation7 + $0x124] ss:$12 sps:$4 sm:$0xff]  }
 0x8c4   : > { %5619 = vmatprep.subr.bf16.mxu0 %v6416_v3  ;;  %2909 = vmatprep.subr.bf16.mxu1 %v5971_v48 }
 0x966   : > { %v2318_v15 = vpop.f32.mrf.mxu1  ;;  %v2359_v2 = vpop.f32.mrf.mxu0 }
 0x967   : > { %v2319_v4 = vadd.f32 %v2318_v15, %v2107_v9  ;;  %v2360_v16 = vadd.f32 %v2359_v2, %v2115_v10  ;;  %v5987_v9 = vld [vmem:[#allocation7 + $0x10c] ss:$12 sps:$4 sm:$0xff]   ;;  %v5985_v10 = vld [vmem:[#allocation7 + $0x108] ss:$12 sps:$4 sm:$0xff]   ;;  %v5989_v15 = vld [vmem:[#allocation7 + $0xf0] ss:$12 sps:$4 sm:$0xff]  }
 0x968   : > { %v2320_v17 = vpop.f32.mrf.mxu1  ;;  %v2361_v18 = vpop.f32.mrf.mxu0  ;;  %v5992_v2 = vld [vmem:[#allocation7 + $0xf8] ss:$12 sps:$4 sm:$0xff]  }
 0x969   : > { %v2321_v19 = vadd.f32 %v2320_v17, %v2111_v11  ;;  %v2362_v20 = vadd.f32 %v2361_v18, %v2119_v12  ;;  %v2366_v21 = vmax.f32 %v2319_v4, 0.0  ;;  %v2368_v23 = vmax.f32 %v2360_v16, 0.0  ;;  %v5988_v11 = vld [vmem:[#allocation7 + $0x110] ss:$12 sps:$4 sm:$0xff]   ;;  %v5991_v12 = vld [vmem:[#allocation7 + $0xf4] ss:$12 sps:$4 sm:$0xff]  }
 0x96a   : > { %v2322_v24 = vpop.f32.mrf.mxu1  ;;  %v2363_v25 = vpop.f32.mrf.mxu0  ;;  %v5995_v4 = vld [vmem:[#allocation7 + $0xdc] ss:$12 sps:$4 sm:$0xff]   ;;  %v5993_v16 = vld [vmem:[#allocation7 + $0xd8] ss:$12 sps:$4 sm:$0xff]   ;;  %v5996_v17 = vld [vmem:[#allocation7 + $0xe0] ss:$12 sps:$4 sm:$0xff]  }
 0x96b   : > { %v2367_v26 = vmax.f32 %v2321_v19, 0.0  ;;  %v2369_v13 = vmax.f32 %v2362_v20, 0.0  ;;  %v2370_v30 = vpack.c.bf16 %v2366_v21, %v2366_v21  ;;  %v2372_v32 = vpack.c.bf16 %v2368_v23, %v2368_v23  ;;  %v5999_v18 = vld [vmem:[#allocation7 + $0xc4] ss:$12 sps:$4 sm:$0xff]   ;;  %v5997_v19 = vld [vmem:[#allocation7 + $0xc0] ss:$12 sps:$4 sm:$0xff]  }
 0x96c   : > { %v2323_v14 = vpop.f32.mrf.mxu1  ;;  %v2364_v27 = vpop.f32.mrf.mxu0  ;;  %v6000_v20 = vld [vmem:[#allocation7 + $0xc8] ss:$12 sps:$4 sm:$0xff]  }
 0x96d   : > { %v2371_v28 = vpack.c.bf16 %v2367_v26, %v2367_v26  ;;  %v2373_v29 = vpack.c.bf16 %v2369_v13, %v2369_v13  ;;  %v5228_v26 = vld [vmem:[#allocation5 + $0x1] ss:$0 sm:$0xff]  ;;  %v5229_v14 = vld [vmem:[%s7229_s2 + $0x1] ss:$0 sm:$0xff] }
 0x96f   : > { %2669 = vmatprep.mubr.bf16.mxu1 %v2371_v28  ;;  %2709 = vmatprep.mubr.bf16.mxu0 %v2373_v29 }
 0x970   : > { %2670 = vmatmul.mubr.bf16.vlgmr.msra.gmra.mxu1 %v2370_v30  ;;  %2710 = vmatmul.mubr.bf16.vlgmr.msra.gmra.mxu0 %v2372_v32 }
 0x971   : > { %2941 = vmatprep.mubr.bf16.mxu1 %v6417_v22  ;;  %5635 = vmatprep.mubr.msk.bf16.mxu0 %vm6418_vm0, %v6416_v3 }
 0x972   : > { %5620 = vmatpush3.bf16.msra.mxu0 %v5972_v50  ;;  %2910 = vmatpush1.bf16.msra.mxu1 %v5969_v47 }
 0x973   : > { %5621 = vmatprep.subr.bf16.mxu0 %v6416_v3  ;;  %2911 = vmatprep.subr.bf16.mxu1 %v5975_v51 }
 0x976   : > { %5622 = vmatpush3.bf16.msra.mxu0 %v5976_v52  ;;  %2912 = vmatpush1.bf16.msra.mxu1 %v5973_v53 }
 0x977   : > { %5623 = vmatprep.subr.bf16.mxu0 %v6416_v3  ;;  %2913 = vmatprep.subr.bf16.mxu1 %v5979_v58 }
 0x97a   : > { %2914 = vmatpush1.bf16.msra.mxu1 %v5977_v60  ;;  %5624 = vmatpush3.bf16.msra.mxu0 %v5980_v61 }
 0x97b   : > { %5625 = vmatprep.subr.bf16.mxu0 %v6416_v3  ;;  %2915 = vmatprep.subr.bf16.mxu1 %v5983_v63 }
 0x97e   : > { %2916 = vmatpush1.bf16.msra.mxu1 %v5981_v62  ;;  %5626 = vmatpush3.bf16.msra.mxu0 %v5984_v6 }
 0x97f   : > { %2917 = vmatprep.subr.bf16.mxu1 %v5987_v9  ;;  %5627 = vmatprep.subr.bf16.mxu0 %v6416_v3 }
 0x982   : > { %2918 = vmatpush1.bf16.msra.mxu1 %v5985_v10  ;;  %5628 = vmatpush3.bf16.msra.mxu0 %v5988_v11 }
 0x983   : > { %2919 = vmatprep.subr.bf16.mxu1 %v5991_v12  ;;  %5629 = vmatprep.subr.bf16.mxu0 %v6416_v3 }
 0x986   : > { %2920 = vmatpush1.bf16.msra.mxu1 %v5989_v15  ;;  %5630 = vmatpush3.bf16.msra.mxu0 %v5992_v2 }
 0x987   : > { %2921 = vmatprep.subr.bf16.mxu1 %v5995_v4  ;;  %5631 = vmatprep.subr.bf16.mxu0 %v6416_v3 }
 0x98a   : > { %2922 = vmatpush1.bf16.msra.mxu1 %v5993_v16  ;;  %5632 = vmatpush3.bf16.msra.mxu0 %v5996_v17 }
 0x98b   : > { %2923 = vmatprep.subr.bf16.mxu1 %v5999_v18  ;;  %5633 = vmatprep.subr.bf16.mxu0 %v6416_v3 }
 0x98e   : > { %2924 = vmatpush1.bf16.msra.mxu1 %v5997_v19  ;;  %5634 = vmatpush3.bf16.msra.mxu0 %v6000_v20 }
 0x98f   : > { %5639 = vmatprep.subr.bf16.mxu1 %v6416_v3  ;;  %5663 = vmatprep.subr.bf16.mxu0 %v6416_v3 }
 0xa30   : > { %v5416_v33 = vpop.f32.mrf.mxu1  ;;  %v5438_v34 = vpop.f32.mrf.mxu0 }
 0xa32   : > { %v5417_v42 = vpop.f32.mrf.mxu1  ;;  %v5439_v36 = vpop.f32.mrf.mxu0 }
 0xa33   : > { %v5418_v38 = vadd.f32 %v5417_v42, %v5416_v33  ;;  %v5440_v41 = vadd.f32 %v5439_v36, %v5438_v34 }
 0xa34   : > { %v5419_v49 = vpop.f32.mrf.mxu1  ;;  %v5441_v39 = vpop.f32.mrf.mxu0 }
 0xa35   : > { %v2672_v40 = vadd.f32 %v5418_v38, %v5194_v35 }
 0xa36   : > { %v5420_v43 = vpop.f32.mrf.mxu1  ;;  %v5442_v44 = vpop.f32.mrf.mxu0 }
 0xa37   : > { %v2712_v45 = vadd.f32 %v5440_v41, %v2672_v40 }
 0xa39   : > { %v6946_v46 = vadd.f32 %v2712_v45, %v6913_v37 }
 0xa3b   : > { %2722 = vadd.xlane.f32.xlu0 %v6946_v46 }
 0xac4   : > { %v2723_v37 = vpop.xlane.xlu0 %2722 }
 0xac5   : > { %v2724_v55 = vmul.f32 0.0078125, %v2723_v37 }
 0xac7   : > { %v2725_v56 = vsub.f32 %v6946_v46, %v2724_v55 }
 0xac9   : > { %v2726_v57 = vmul.f32 %v2725_v56, %v2725_v56 }
 0xacb   : > { %2727 = vadd.xlane.f32.xlu1 %v2726_v57 }
 0xb54   : > { %v2728_v21 = vpop.xlane.xlu1 %2727 }
 0xb55   : > { %v2729_v23 = vmul.f32 0.0078125, %v2728_v21 }
 0xb57   : > { %v2730_v24 = vadd.f32 1e-05, %v2729_v23 }
 0xb59   : > { %6117 = vrsqrt.f32 %v2730_v24 }
 0xb66   : > { %v6118_v25 = vpop.eup %6117 }
 0xb67   : > { %v2732_v13 = vmul.f32 %v6118_v25, %v2725_v56 }
 0xb69   : > { %v2739_v27 = vmul.f32 %v5228_v26, %v2732_v13 }
 0xb6b   : > { %v2746_v28 = vadd.f32 %v5229_v14, %v2739_v27 }
 0xb6d   : > { %v2747_v29 = vpack.c.bf16 %v2746_v28, %v2746_v28 }
 0xb6f   : > { %2942 = vmatmul.mubr.bf16.vlgmr.msra.gmra.mxu1 %v2747_v29  ;;  %5636 = vmatmul.mubr.bf16.vlgmr.msra.gmra.mxu0 %v2747_v29 }
 0xb70   : > { %5641 = vmatprep.mubr.msk.bf16.mxu1 %vm6418_vm0, %v6416_v3  ;;  %5665 = vmatprep.mubr.msk.bf16.mxu0 %vm6418_vm0, %v6416_v3 }
 0xc2f   : > { %v2943_v30 = vpop.f32.mrf.mxu1  ;;  %v6966_v32 = vpop.f32.mrf.mxu0 }
 0xc31   : > { %v2945_v33 = vpop.f32.mrf.mxu1  ;;  %v5637_v34 = vpop.f32.mrf.mxu0 }
 0xc32   : > { %3144 = vrot.lane.b32.xlu1 %v2945_v33, %s6421_s26  ;;  %3141 = vrot.lane.b32.xlu0 %v2945_v33, %s6420_s25 }
 0xc33   : > { %v2947_v35 = vpop.f32.mrf.mxu1  ;;  %v2987_v42 = vpop.f32.mrf.mxu0 }
 0xc35   : > { %v2948_v36 = vpop.f32.mrf.mxu1  ;;  %v5638_v38 = vpop.f32.mrf.mxu0 }
 0xc36   : > { %3147 = vrot.lane.b32.xlu1 %v2945_v33, %s6419_s28  ;;  %2991 = vrot.lane.b32.xlu0 %v2943_v30, %s6420_s25 }
 0xc3a   : > { %2994 = vrot.lane.b32.xlu1 %v2943_v30, %s6421_s26  ;;  %2997 = vrot.lane.b32.xlu0 %v2943_v30, %s6419_s28 }
 0xca4   : > { %v3145_v49 = vpop.permute.xlu1 %3144  ;;  %v3142_v39 = vpop.permute.xlu0 %3141 }
 0xca5   : > { %v3150_v40 = vcombine.low %v2945_v33, %v3145_v49  ;;  %v3151_v41 = vcombine.high %v2945_v33, %v3145_v49 }
 0xca7   : > { %v3158_v48 = vrot.slane %v3150_v40, %v6740_v59  ;;  %v3165_v50 = vrot.slane %v3151_v41, %v6740_v59 }
 0xca8   : > { %v3148_v43 = vpop.permute.xlu1 %3147  ;;  %v2992_v44 = vpop.permute.xlu0 %2991 }
 0xca9   : > { %v3166_v45 = vcombine.low %v3142_v39, %v3148_v43  ;;  %v3167_v47 = vcombine.high %v3142_v39, %v3148_v43 }
 0xcab   : > { %v3174_v51 = vrot.slane %v3166_v45, %v6740_v59  ;;  %v3181_v52 = vrot.slane %v3167_v47, %v6740_v59 }
 0xcac   : > { %v2995_v53 = vpop.permute.xlu1 %2994  ;;  %v2998_v37 = vpop.permute.xlu0 %2997 }
 0xcad   : > { %v3182_v55 = vcombine.low %v3158_v48, %v3174_v51  ;;  %v3183_v56 = vcombine.high %v3158_v48, %v3174_v51  ;;  %v3198_v57 = vcombine.low %v3165_v50, %v3181_v52  ;;  %v3199_v58 = vcombine.high %v3165_v50, %v3181_v52 }
 0xcae   : > { %v3000_v60 = vcombine.low %v2943_v30, %v2995_v53  ;;  %v3001_v61 = vcombine.high %v2943_v30, %v2995_v53  ;;  %v3016_v62 = vcombine.low %v2992_v44, %v2998_v37  ;;  %v3017_v63 = vcombine.high %v2992_v44, %v2998_v37 }
 0xcaf   : > { %v3190_v6 = vrot.slane %v3182_v55, %v6743_v1  ;;  %v3197_v9 = vrot.slane %v3183_v56, %v6743_v1  ;;  %v3206_v10 = vrot.slane %v3198_v57, %v6743_v1  ;;  %v3213_v11 = vrot.slane %v3199_v58, %v6743_v1 }
 0xcb0   : > { %v3008_v12 = vrot.slane %v3000_v60, %v6740_v59  ;;  %v3015_v15 = vrot.slane %v3001_v61, %v6740_v59  ;;  %v3024_v2 = vrot.slane %v3016_v62, %v6740_v59  ;;  %v3031_v4 = vrot.slane %v3017_v63, %v6740_v59 }
 0xcb1   : > { %v3218_v16 = vcombine.low %v3190_v6, %v3197_v9  ;;  %v5256_v17 = vcombine.high %v3190_v6, %v3197_v9  ;;  %v3234_v18 = vcombine.low %v3206_v10, %v3213_v11  ;;  %v5257_v19 = vcombine.high %v3206_v10, %v3213_v11 }
 0xcb2   : > { %v3032_v20 = vcombine.low %v3008_v12, %v3024_v2  ;;  %v3033_v21 = vcombine.high %v3008_v12, %v3024_v2  ;;  %v3048_v23 = vcombine.low %v3015_v15, %v3031_v4  ;;  %v3049_v24 = vcombine.high %v3015_v15, %v3031_v4 }
 0xcb3   : > { %v3225_v25 = vrot.slane %v3218_v16, %v6740_v59  ;;  %v3233_v26 = vrot.slane %v5256_v17, %v6740_v59  ;;  %v3241_v13 = vrot.slane %v3234_v18, %v6740_v59  ;;  %v3249_v14 = vrot.slane %v5257_v19, %v6740_v59 }
 0xcb4   : > { %v3040_v27 = vrot.slane %v3032_v20, %v6743_v1  ;;  %v3047_v28 = vrot.slane %v3033_v21, %v6743_v1  ;;  %v3056_v29 = vrot.slane %v3048_v23, %v6743_v1  ;;  %v3063_v30 = vrot.slane %v3049_v24, %v6743_v1 }
 0xcb5   : > { %v3250_v33 = vcombine.low %v3225_v25, %v3233_v26  ;;  %v3266_v34 = vcombine.low %v3241_v13, %v3249_v14  ;;  %v3251_v55 = vcombine.high %v3225_v25, %v3233_v26  ;;  %v3267_v56 = vcombine.high %v3241_v13, %v3249_v14 }
 0xcb6   : > { %v3068_v35 = vcombine.low %v3040_v27, %v3047_v28  ;;  %v5254_v42 = vcombine.high %v3040_v27, %v3047_v28  ;;  %v3084_v36 = vcombine.low %v3056_v29, %v3063_v30  ;;  %v5255_v38 = vcombine.high %v3056_v29, %v3063_v30 }
 0xcb7   : > { %v3258_v49 = vrot.slane %v3250_v33, %v6743_v1  ;;  %v3274_v39 = vrot.slane %v3266_v34, %v6743_v1  ;;  %v3265_v60 = vrot.slane %v3251_v55, %v6743_v1  ;;  %v3281_v61 = vrot.slane %v3267_v56, %v6743_v1 }
 0xcb8   : > { %v3075_v40 = vrot.slane %v3068_v35, %v6740_v59  ;;  %v3083_v41 = vrot.slane %v5254_v42, %v6740_v59  ;;  %v3091_v43 = vrot.slane %v3084_v36, %v6740_v59  ;;  %v3099_v44 = vrot.slane %v5255_v38, %v6740_v59 }
 0xcb9   : > { %v3282_v45 = vcombine.low %v3258_v49, %v3274_v39  ;;  %v3283_v37 = vcombine.high %v3258_v49, %v3274_v39  ;;  %v3284_v6 = vcombine.low %v3265_v60, %v3281_v61  ;;  %v3285_v17 = vcombine.high %v3265_v60, %v3281_v61 }
 0xcba   : > { %v3100_v47 = vcombine.low %v3075_v40, %v3083_v41  ;;  %v3116_v48 = vcombine.low %v3091_v43, %v3099_v44  ;;  %v3101_v9 = vcombine.high %v3075_v40, %v3083_v41  ;;  %v3117_v10 = vcombine.high %v3091_v43, %v3099_v44 }
 0xcbb   : > { %v3286_v50 = vpack.c.bf16 %v3282_v45, %v3282_v45  ;;  %v3287_v58 = vpack.c.bf16 %v3283_v37, %v3283_v37  ;;  %v3288_v12 = vpack.c.bf16 %v3284_v6, %v3284_v6  ;;  %v3289_v19 = vpack.c.bf16 %v3285_v17, %v3285_v17 }
 0xcbc   : > { %v3108_v51 = vrot.slane %v3100_v47, %v6743_v1  ;;  %v3124_v52 = vrot.slane %v3116_v48, %v6743_v1  ;;  %v3115_v2 = vrot.slane %v3101_v9, %v6743_v1  ;;  %v3131_v4 = vrot.slane %v3117_v10, %v6743_v1 }
 0xcbd   : > { %v3444_v53 = vsel %vm1351_vm1, %v3286_v50, 0  ;;  %v3490_v63 = vsel %vm1351_vm1, %v3287_v58, 0  ;;  %v3536_v16 = vsel %vm1351_vm1, %v3288_v12, 0  ;;  %v3582_v21 = vsel %vm1351_vm1, %v3289_v19, 0 }
 0xcbe   : > { %5640 = vmatpush3.bf16.xpose.msra.mxu1 %v3444_v53  ;;  %v3132_v57 = vcombine.low %v3108_v51, %v3124_v52  ;;  %v3133_v11 = vcombine.high %v3108_v51, %v3124_v52  ;;  %v3134_v18 = vcombine.low %v3115_v2, %v3131_v4  ;;  %v3135_v23 = vcombine.high %v3115_v2, %v3131_v4 }
 0xcbf   : > { %5645 = vmatprep.subr.bf16.mxu1 %v6416_v3 }
 0xcc0   : > { %v3136_v62 = vpack.c.bf16 %v3132_v57, %v3132_v57  ;;  %v3137_v15 = vpack.c.bf16 %v3133_v11, %v3133_v11  ;;  %v3138_v20 = vpack.c.bf16 %v3134_v18, %v3134_v18  ;;  %v3139_v24 = vpack.c.bf16 %v3135_v23, %v3135_v23 }
 0xcc5   : > { %5642 = vmatmul.mubr.msk.bf16.vlgmr.msra.gmra.mxu1 %vm1351_vm1, %v3136_v62 }
 0xcc6   : > { %5646 = vmatpush3.bf16.xpose.msra.mxu1 %v3490_v63  ;;  %5647 = vmatprep.mubr.msk.bf16.mxu1 %vm6418_vm0, %v6416_v3 }
 0xcc7   : > { %5651 = vmatprep.subr.bf16.mxu1 %v6416_v3 }
 0xccd   : > { %5648 = vmatmul.mubr.msk.bf16.vlgmr.msra.gmra.mxu1 %vm1351_vm1, %v3137_v15 }
 0xcce   : > { %5652 = vmatpush3.bf16.xpose.msra.mxu1 %v3536_v16  ;;  %5653 = vmatprep.mubr.msk.bf16.mxu1 %vm6418_vm0, %v6416_v3 }
 0xccf   : > { %5657 = vmatprep.subr.bf16.mxu1 %v6416_v3 }
 0xcd5   : > { %5654 = vmatmul.mubr.msk.bf16.vlgmr.msra.gmra.mxu1 %vm1351_vm1, %v3138_v20 }
 0xcd6   : > { %5658 = vmatpush3.bf16.xpose.msra.mxu1 %v3582_v21  ;;  %5659 = vmatprep.mubr.msk.bf16.mxu1 %vm6418_vm0, %v6416_v3 }
 0xcd7   : > { %5669 = vmatprep.subr.bf16.mxu1 %v6416_v3 }
 0xcdd   : > { %5660 = vmatmul.mubr.msk.bf16.vlgmr.msra.gmra.mxu1 %vm1351_vm1, %v3139_v24 }
 0xcde   : > { %5671 = vmatprep.mubr.msk.bf16.mxu1 %vm6418_vm0, %v6416_v3 }
 0xd85   : > { %v3480_v25 = vpop.f32.mrf.mxu1 }
 0xd86   : > { %v3624_v26 = vsel %vm6801_vm2, %v3480_v25, -1e+30 }
 0xd87   : > { %v5643_v13 = vpop.f32.mrf.mxu1  ;;  %v3628_v14 = vsel %vm1542_vm3, %v3624_v26, -inf }
 0xd88   : > { %3629 = vmax.xlane.f32.xlu1 %v3628_v14 }
 0xd89   : > { %v3483_v27 = vpop.f32.mrf.mxu1 }
 0xd8b   : > { %v5644_v28 = vpop.f32.mrf.mxu1 }
 0xd8d   : > { %v3526_v29 = vpop.f32.mrf.mxu1 }
 0xd8e   : > { %v3625_v30 = vsel %vm6801_vm2, %v3526_v29, -1e+30 }
 0xd8f   : > { %v5649_v33 = vpop.f32.mrf.mxu1  ;;  %v3631_v34 = vsel %vm1542_vm3, %v3625_v30, -inf }
 0xd90   : > { %3632 = vmax.xlane.f32.xlu0 %v3631_v34 }
 0xd91   : > { %v3529_v35 = vpop.f32.mrf.mxu1 }
 0xd93   : > { %v5650_v42 = vpop.f32.mrf.mxu1 }
 0xd95   : > { %v3572_v36 = vpop.f32.mrf.mxu1 }
 0xd96   : > { %v3626_v38 = vsel %vm6801_vm2, %v3572_v36, -1e+30 }
 0xd97   : > { %v5655_v49 = vpop.f32.mrf.mxu1  ;;  %v3634_v39 = vsel %vm1542_vm3, %v3626_v38, -inf }
 0xd98   : > { %3635 = vmax.xlane.f32.xlu0 %v3634_v39 }
 0xd99   : > { %v3575_v40 = vpop.f32.mrf.mxu1 }
 0xd9b   : > { %v5656_v41 = vpop.f32.mrf.mxu1 }
 0xd9d   : > { %v3618_v43 = vpop.f32.mrf.mxu1 }
 0xd9e   : > { %v3627_v44 = vsel %vm6801_vm2, %v3618_v43, -1e+30 }
 0xd9f   : > { %v5661_v45 = vpop.f32.mrf.mxu1  ;;  %v3637_v47 = vsel %vm1542_vm3, %v3627_v44, -inf }
 0xda0   : > { %3638 = vmax.xlane.f32.xlu1 %v3637_v47 }
 0xda1   : > { %v3621_v48 = vpop.f32.mrf.mxu1 }
 0xda3   : > { %v5662_v50 = vpop.f32.mrf.mxu1 }
 0xdb1   : > { %3294 = vrot.lane.b32.xlu1 %v6966_v32, %s6421_s26 }
 0xe11   : > { %v3630_v51 = vpop.xlane.xlu1 %3629 }
 0xe12   : > { %v3640_v52 = vsub.f32 %v3624_v26, %v3630_v51 }
 0xe14   : > { %v3644_v53 = vmul.f32 1.442695, %v3640_v52 }
 0xe16   : > { %6119 = vpow2.f32 %v3644_v53 }
 0xe19   : > { %v3633_v37 = vpop.xlane.xlu0 %3632 }
 0xe1a   : > { %v3641_v55 = vsub.f32 %v3625_v30, %v3633_v37 }
 0xe1c   : > { %v3646_v56 = vmul.f32 1.442695, %v3641_v55 }
 0xe1e   : > { %6121 = vpow2.f32 %v3646_v56 }
 0xe21   : > { %v3636_v61 = vpop.xlane.xlu0 %3635 }
 0xe22   : > { %v3642_v62 = vsub.f32 %v3626_v38, %v3636_v61 }
 0xe23   : > { %v7040_v57 = vpop.eup %6119 }
 0xe24   : > { %v3652_v31 = vsel %vm1542_vm3, %v7040_v57, 0.0  ;;  %v3648_v63 = vmul.f32 1.442695, %v3642_v62 }
 0xe25   : > { %3653 = vadd.xlane.f32.xlu0 %v3652_v31 }
 0xe26   : > { %6123 = vpow2.f32 %v3648_v63 }
 0xe29   : > { %v3639_v6 = vpop.xlane.xlu1 %3638 }
 0xe2a   : > { %v3643_v9 = vsub.f32 %v3627_v44, %v3639_v6 }
 0xe2b   : > { %v7044_v58 = vpop.eup %6121 }
 0xe2c   : > { %v3655_v60 = vsel %vm1542_vm3, %v7044_v58, 0.0  ;;  %v3650_v10 = vmul.f32 1.442695, %v3643_v9 }
 0xe2d   : > { %3656 = vadd.xlane.f32.xlu1 %v3655_v60  ;;  %v3295_v4 = vpop.permute.xlu1 %3294 }
 0xe2e   : > { %6125 = vpow2.f32 %v3650_v10  ;;  %v3300_v18 = vcombine.low %v6966_v32, %v3295_v4  ;;  %v3301_v19 = vcombine.high %v6966_v32, %v3295_v4 }
 0xe30   : > { %v3308_v25 = vrot.slane %v3300_v18, %v6740_v59  ;;  %v3315_v26 = vrot.slane %v3301_v19, %v6740_v59 }
 0xe33   : > { %v7052_v11 = vpop.eup %6123 }
 0xe34   : > { %v3658_v12 = vsel %vm1542_vm3, %v7052_v11, 0.0 }
 0xe3b   : > { %3291 = vrot.lane.b32.xlu0 %v6966_v32, %s6420_s25  ;;  %v7056_v15 = vpop.eup %6125 }
 0xe3c   : > { %v3661_v2 = vsel %vm1542_vm3, %v7056_v15, 0.0 }
 0xe3e   : > { %3297 = vrot.lane.b32.xlu1 %v6966_v32, %s6419_s28 }
 0xe5a   : > { %3659 = vadd.xlane.f32.xlu0 %v3658_v12 }
 0xe62   : > { %3662 = vadd.xlane.f32.xlu1 %v3661_v2 }
 0xeae   : > { %v3654_v16 = vpop.xlane.xlu0 %3653 }
 0xeaf   : > { %6127 = vrcp.f32 %v3654_v16 }
 0xeb2   : > { %v3292_v20 = vpop.permute.xlu0 %3291 }
 0xeb6   : > { %v3657_v17 = vpop.xlane.xlu1 %3656 }
 0xeb7   : > { %6129 = vrcp.f32 %v3657_v17 }
 0xeba   : > { %v3298_v21 = vpop.permute.xlu1 %3297 }
 0xebb   : > { %v3316_v23 = vcombine.low %v3292_v20, %v3298_v21  ;;  %v3317_v24 = vcombine.high %v3292_v20, %v3298_v21 }
 0xebc   : > { %v6128_v50 = vpop.eup %6127 }
 0xebd   : > { %v3324_v13 = vrot.slane %v3316_v23, %v6740_v59  ;;  %v3331_v14 = vrot.slane %v3317_v24, %v6740_v59  ;;  %v3668_v6 = vmul.f32 %v6128_v50, %v7040_v57 }
 0xebf   : > { %v3332_v27 = vcombine.low %v3308_v25, %v3324_v13  ;;  %v3333_v28 = vcombine.high %v3308_v25, %v3324_v13  ;;  %v3348_v29 = vcombine.low %v3315_v26, %v3331_v14  ;;  %v3349_v30 = vcombine.high %v3315_v26, %v3331_v14  ;;  %v6001_v13 = vld [vmem:[#allocation8 + $0x78] sm:$0xff]   ;;  %v6002_v14 = vld [vmem:[#allocation8 + $0x70] sm:$0xff]  }
 0xec0   : > { %v3672_v16 = vpack.c.bf16 %v3668_v6, %v3668_v6 }
 0xec1   : > { %v3340_v32 = vrot.slane %v3332_v27, %v6743_v1  ;;  %v3347_v33 = vrot.slane %v3333_v28, %v6743_v1  ;;  %v3356_v34 = vrot.slane %v3348_v29, %v6743_v1  ;;  %v3363_v35 = vrot.slane %v3349_v30, %v6743_v1  ;;  %v6004_v27 = vld [vmem:[#allocation8 + $0x60] sm:$0xff]   ;;  %v6006_v28 = vld [vmem:[#allocation8 + $0x50] sm:$0xff]  }
 0xec3   : > { %v3368_v42 = vcombine.low %v3340_v32, %v3347_v33  ;;  %v5258_v36 = vcombine.high %v3340_v32, %v3347_v33  ;;  %v3384_v38 = vcombine.low %v3356_v34, %v3363_v35  ;;  %v5259_v49 = vcombine.high %v3356_v34, %v3363_v35 }
 0xec4   : > { %v6130_v55 = vpop.eup %6129 }
 0xec5   : > { %v3375_v39 = vrot.slane %v3368_v42, %v6740_v59  ;;  %v3383_v40 = vrot.slane %v5258_v36, %v6740_v59  ;;  %v3391_v41 = vrot.slane %v3384_v38, %v6740_v59  ;;  %v3399_v43 = vrot.slane %v5259_v49, %v6740_v59 }
 0xec6   : > { %v3669_v9 = vmul.f32 %v6130_v55, %v7044_v58 }
 0xec7   : > { %v3400_v44 = vcombine.low %v3375_v39, %v3383_v40  ;;  %v3416_v45 = vcombine.low %v3391_v41, %v3399_v43  ;;  %v3401_v47 = vcombine.high %v3375_v39, %v3383_v40  ;;  %v3417_v48 = vcombine.high %v3391_v41, %v3399_v43 }
 0xec8   : > { %v3673_v17 = vpack.c.bf16 %v3669_v9, %v3669_v9 }
 0xec9   : > { %v3408_v51 = vrot.slane %v3400_v44, %v6743_v1  ;;  %v3424_v52 = vrot.slane %v3416_v45, %v6743_v1  ;;  %v3415_v53 = vrot.slane %v3401_v47, %v6743_v1  ;;  %v3431_v37 = vrot.slane %v3417_v48, %v6743_v1 }
 0xecb   : > { %v3432_v56 = vcombine.low %v3408_v51, %v3424_v52  ;;  %v3433_v31 = vcombine.high %v3408_v51, %v3424_v52  ;;  %v3434_v60 = vcombine.low %v3415_v53, %v3431_v37  ;;  %v3435_v61 = vcombine.high %v3415_v53, %v3431_v37 }
 0xecd   : > { %v3436_v62 = vpack.c.bf16 %v3432_v56, %v3432_v56  ;;  %v3437_v63 = vpack.c.bf16 %v3433_v31, %v3433_v31  ;;  %v3438_v2 = vpack.c.bf16 %v3434_v60, %v3434_v60  ;;  %v3439_v4 = vpack.c.bf16 %v3435_v61, %v3435_v61  ;;  %v6007_v61 = vld [vmem:[#allocation8 + $0x48] sm:$0xff]  }
 0xecf   : > { %v3680_v10 = vsel %vm1594_vm4, %v3436_v62, 0  ;;  %v3726_v12 = vsel %vm1594_vm4, %v3437_v63, 0  ;;  %v3772_v57 = vsel %vm1594_vm4, %v3438_v2, 0  ;;  %v3818_v58 = vsel %vm1594_vm4, %v3439_v4, 0 }
 0xed0   : > { %5664 = vmatpush3.bf16.msra.mxu0 %v3680_v10  ;;  %5670 = vmatpush3.bf16.msra.mxu1 %v3726_v12 }
 0xed1   : > { %5675 = vmatprep.subr.bf16.mxu0 %v6416_v3  ;;  %5681 = vmatprep.subr.bf16.mxu1 %v6416_v3 }
 0xed3   : > { %5666 = vmatmul.mubr.msk.bf16.vlgmr.msra.gmra.mxu0 %vm1542_vm3, %v3672_v16  ;;  %5672 = vmatmul.mubr.msk.bf16.vlgmr.msra.gmra.mxu1 %vm1542_vm3, %v3673_v17  ;;  %v6008_v17 = vld [vmem:[#allocation8 + $0x40] sm:$0xff]  }
 0xed4   : > { %5676 = vmatpush3.bf16.msra.mxu0 %v3772_v57  ;;  %5682 = vmatpush3.bf16.msra.mxu1 %v3818_v58 }
 0xed5   : > { %5677 = vmatprep.mubr.msk.bf16.mxu0 %vm6418_vm0, %v6416_v3  ;;  %5683 = vmatprep.mubr.msk.bf16.mxu1 %vm6418_vm0, %v6416_v3 }
 0xed6   : > { %5687 = vmatprep.subr.bf16.mxu0 %v6416_v3 }
 0xee3   : > { %v3660_v18 = vpop.xlane.xlu0 %3659 }
 0xee4   : > { %6131 = vrcp.f32 %v3660_v18 }
 0xeeb   : > { %v3663_v19 = vpop.xlane.xlu1 %3662 }
 0xeec   : > { %6133 = vrcp.f32 %v3663_v19 }
 0xef1   : > { %v6132_v20 = vpop.eup %6131 }
 0xef2   : > { %v3670_v21 = vmul.f32 %v6132_v20, %v7052_v11  ;;  %v6003_v11 = vld [vmem:[#allocation8 + $0x68] sm:$0xff]  }
 0xef4   : > { %v3674_v23 = vpack.c.bf16 %v3670_v21, %v3670_v21 }
 0xef6   : > { %5678 = vmatmul.mubr.msk.bf16.vlgmr.msra.gmra.mxu0 %vm1542_vm3, %v3674_v23 }
 0xef7   : > { %5703 = vmatprep.mubr.msk.bf16.mxu0 %vm6418_vm0, %v6416_v3  ;;  %5688 = vmatpush3.bf16.msra.mxu0 %v6001_v13 }
 0xef8   : > { %5689 = vmatprep.subr.bf16.mxu0 %v6416_v3 }
 0xef9   : > { %v6134_v24 = vpop.eup %6133 }
 0xefa   : > { %v3671_v25 = vmul.f32 %v6134_v24, %v7056_v15  ;;  %v6005_v15 = vld [vmem:[#allocation8 + $0x58] sm:$0xff]  }
 0xefb   : > { %5690 = vmatpush3.bf16.msra.mxu0 %v6002_v14 }
 0xefc   : > { %v3675_v26 = vpack.c.bf16 %v3671_v25, %v3671_v25  ;;  %5691 = vmatprep.subr.bf16.mxu0 %v6416_v3 }
 0xefe   : > { %5684 = vmatmul.mubr.msk.bf16.vlgmr.msra.gmra.mxu1 %vm1542_vm3, %v3675_v26 }
 0xeff   : > { %4404 = vmatprep.mubr.bf16.mxu1 %v6417_v22  ;;  %5692 = vmatpush3.bf16.msra.mxu0 %v6003_v11 }
 0xf00   : > { %5693 = vmatprep.subr.bf16.mxu0 %v6416_v3 }
 0xf03   : > { %5694 = vmatpush3.bf16.msra.mxu0 %v6004_v27 }
 0xf04   : > { %5695 = vmatprep.subr.bf16.mxu0 %v6416_v3 }
 0xf07   : > { %5696 = vmatpush3.bf16.msra.mxu0 %v6005_v15 }
 0xf08   : > { %5697 = vmatprep.subr.bf16.mxu0 %v6416_v3 }
 0xf0b   : > { %5698 = vmatpush3.bf16.msra.mxu0 %v6006_v28 }
 0xf0c   : > { %5699 = vmatprep.subr.bf16.mxu0 %v6416_v3 }
 0xf0f   : > { %5700 = vmatpush3.bf16.msra.mxu0 %v6007_v61  ;;  %v6029_v61 = vld [vmem:[#allocation10 + $0x184] ss:$16 sps:$4 sm:$0xff]  }
 0xf10   : > { %5701 = vmatprep.subr.bf16.mxu0 %v6416_v3 }
 0xf13   : > { %5702 = vmatpush3.bf16.msra.mxu0 %v6008_v17  ;;  %v6042_v17 = vld [vmem:[#allocation10 + $0x148] ss:$16 sps:$4 sm:$0xff]  }
 0xf93   : > { %v3716_v29 = vpop.f32.mrf.mxu0  ;;  %v3762_v30 = vpop.f32.mrf.mxu1 }
 0xf95   : > { %v5667_v32 = vpop.f32.mrf.mxu0  ;;  %v5673_v33 = vpop.f32.mrf.mxu1 }
 0xf97   : > { %v3719_v34 = vpop.f32.mrf.mxu0  ;;  %v3765_v35 = vpop.f32.mrf.mxu1 }
 0xf98   : > { %v5271_v35 = vld [vmem:[%s7232_s5 + $0x1] ss:$0 sm:$0xff] }
 0xf99   : > { %v5668_v42 = vpop.f32.mrf.mxu0  ;;  %v5674_v36 = vpop.f32.mrf.mxu1 }
 0xfb6   : > { %v3808_v38 = vpop.f32.mrf.mxu0 }
 0xfb7   : > { %v3860_v41 = vcombine.low %v3716_v29, %v3808_v38  ;;  %v3861_v43 = vcombine.high %v3716_v29, %v3808_v38 }
 0xfb8   : > { %v5679_v49 = vpop.f32.mrf.mxu0 }
 0xfb9   : > { %v3868_v50 = vrot.slane %v3860_v41, %v6740_v59  ;;  %v3875_v51 = vrot.slane %v3861_v43, %v6740_v59  ;;  %v6009_v41 = vld [vmem:[#allocation10 + $0x1e0] ss:$16 sps:$4 sm:$0xff]   ;;  %v6011_v43 = vld [vmem:[#allocation10 + $0x1e4] ss:$16 sps:$4 sm:$0xff]  }
 0xfba   : > { %v3811_v39 = vpop.f32.mrf.mxu0  ;;  %4372 = vmatprep.subr.bf16.mxu1 %v6011_v43  ;;  %v6069_v43 = vld [vmem:[#allocation11 + $0x160] sm:$0xff]  }
 0xfbb   : > { %4373 = vmatpush1.bf16.msra.mxu1 %v6009_v41  ;;  %v6068_v41 = vld [vmem:[#allocation11 + $0x1a8] sm:$0xff]  }
 0xfbc   : > { %v5680_v40 = vpop.f32.mrf.mxu0 }
 0xfbe   : > { %v3854_v44 = vpop.f32.mrf.mxu1 }
 0xfbf   : > { %v3876_v45 = vcombine.low %v3762_v30, %v3854_v44  ;;  %v3877_v47 = vcombine.high %v3762_v30, %v3854_v44  ;;  %v6012_v44 = vld [vmem:[#allocation10 + $0x1e8] ss:$16 sps:$4 sm:$0xff]  }
 0xfc0   : > { %v5685_v48 = vpop.f32.mrf.mxu1 }
 0xfc1   : > { %v3884_v52 = vrot.slane %v3876_v45, %v6740_v59  ;;  %v3891_v53 = vrot.slane %v3877_v47, %v6740_v59  ;;  %v6014_v45 = vld [vmem:[#allocation10 + $0x1ec] ss:$16 sps:$4 sm:$0xff]   ;;  %v6017_v47 = vld [vmem:[#allocation10 + $0x1c4] ss:$16 sps:$4 sm:$0xff]   ;;  %v6015_v48 = vld [vmem:[#allocation10 + $0x1c0] ss:$16 sps:$4 sm:$0xff]  }
 0xfc2   : > { %v3857_v37 = vpop.f32.mrf.mxu1  ;;  %4413 = vmatprep.subr.bf16.mxu0 %v6014_v45  ;;  %4374 = vmatprep.subr.bf16.mxu1 %v6017_v47  ;;  %v6071_v45 = vld [vmem:[#allocation11 + $0x120] sm:$0xff]  }
 0xfc3   : > { %v3892_v55 = vcombine.low %v3868_v50, %v3884_v52  ;;  %v3893_v56 = vcombine.high %v3868_v50, %v3884_v52  ;;  %v3908_v31 = vcombine.low %v3875_v51, %v3891_v53  ;;  %v3909_v60 = vcombine.high %v3875_v51, %v3891_v53  ;;  %v6018_v50 = vld [vmem:[#allocation10 + $0x1c8] ss:$16 sps:$4 sm:$0xff]   ;;  %4375 = vmatpush1.bf16.msra.mxu1 %v6015_v48  ;;  %v6023_v37 = vld [vmem:[#allocation10 + $0x1a4] ss:$16 sps:$4 sm:$0xff]  }
 0xfc4   : > { %v5686_v62 = vpop.f32.mrf.mxu1  ;;  %4376 = vmatprep.subr.bf16.mxu1 %v6023_v37  ;;  %v6072_v47 = vld [vmem:[#allocation11 + $0x1a0] sm:$0xff]   ;;  %v6074_v48 = vld [vmem:[#allocation11 + $0x1d8] sm:$0xff]   ;;  %v6080_v37 = vld [vmem:[#allocation11 + $0x190] sm:$0xff]  }
 0xfc5   : > { %v3900_v63 = vrot.slane %v3892_v55, %v6743_v1  ;;  %v3907_v6 = vrot.slane %v3893_v56, %v6743_v1  ;;  %v3916_v9 = vrot.slane %v3908_v31, %v6743_v1  ;;  %v3923_v10 = vrot.slane %v3909_v60, %v6743_v1  ;;  %v6026_v55 = vld [vmem:[#allocation10 + $0x1ac] ss:$16 sps:$4 sm:$0xff]   ;;  %v6021_v56 = vld [vmem:[#allocation10 + $0x1a0] ss:$16 sps:$4 sm:$0xff]   ;;  %v6024_v31 = vld [vmem:[#allocation10 + $0x1a8] ss:$16 sps:$4 sm:$0xff]  }
 0xfc6   : > { %v6027_v60 = vld [vmem:[#allocation10 + $0x180] ss:$16 sps:$4 sm:$0xff]   ;;  %v6030_v62 = vld [vmem:[#allocation10 + $0x188] ss:$16 sps:$4 sm:$0xff]  }
 0xfc7   : > { %v3928_v12 = vcombine.low %v3900_v63, %v3907_v6  ;;  %v5268_v2 = vcombine.high %v3900_v63, %v3907_v6  ;;  %v3944_v4 = vcombine.low %v3916_v9, %v3923_v10  ;;  %v5269_v16 = vcombine.high %v3916_v9, %v3923_v10  ;;  %4377 = vmatpush1.bf16.msra.mxu1 %v6021_v56  ;;  %v6032_v63 = vld [vmem:[#allocation10 + $0x18c] ss:$16 sps:$4 sm:$0xff]   ;;  %v6035_v6 = vld [vmem:[#allocation10 + $0x164] ss:$16 sps:$4 sm:$0xff]   ;;  %v6033_v10 = vld [vmem:[#allocation10 + $0x160] ss:$16 sps:$4 sm:$0xff]  }
 0xfc8   : > { %4378 = vmatprep.subr.bf16.mxu1 %v6029_v61  ;;  %v6038_v9 = vld [vmem:[#allocation10 + $0x16c] ss:$16 sps:$4 sm:$0xff]   ;;  %v6085_v61 = vld [vmem:[#allocation11 + $0x140] sm:$0xff]  }
 0xfc9   : > { %v3935_v57 = vrot.slane %v3928_v12, %v6740_v59  ;;  %v3943_v58 = vrot.slane %v5268_v2, %v6740_v59  ;;  %v3951_v18 = vrot.slane %v3944_v4, %v6740_v59  ;;  %v3959_v19 = vrot.slane %v5269_v16, %v6740_v59  ;;  %v6036_v12 = vld [vmem:[#allocation10 + $0x168] ss:$16 sps:$4 sm:$0xff]   ;;  %v6041_v2 = vld [vmem:[#allocation10 + $0x144] ss:$16 sps:$4 sm:$0xff]   ;;  %v6044_v4 = vld [vmem:[#allocation10 + $0x14c] ss:$16 sps:$4 sm:$0xff]  }
 0xfca   : > { %v6039_v16 = vld [vmem:[#allocation10 + $0x140] ss:$16 sps:$4 sm:$0xff]   ;;  %v6082_v56 = vld [vmem:[#allocation11 + $0x1c8] sm:$0xff]  }
 0xfcb   : > { %v3961_v20 = vcombine.high %v3935_v57, %v3943_v58  ;;  %v3977_v21 = vcombine.high %v3951_v18, %v3959_v19  ;;  %v3960_v23 = vcombine.low %v3935_v57, %v3943_v58  ;;  %v3976_v24 = vcombine.low %v3951_v18, %v3959_v19  ;;  %4379 = vmatpush1.bf16.msra.mxu1 %v6027_v60  ;;  %v6047_v57 = vld [vmem:[#allocation10 + $0x124] ss:$16 sps:$4 sm:$0xff]   ;;  %v6050_v58 = vld [vmem:[#allocation10 + $0x12c] ss:$16 sps:$4 sm:$0xff]   ;;  %v6045_v18 = vld [vmem:[#allocation10 + $0x120] ss:$16 sps:$4 sm:$0xff]  }
 0xfcc   : > { %4380 = vmatprep.subr.bf16.mxu1 %v6035_v6  ;;  %v6048_v19 = vld [vmem:[#allocation10 + $0x128] ss:$16 sps:$4 sm:$0xff]   ;;  %v6088_v6 = vld [vmem:[#allocation11 + $0x180] sm:$0xff]  }
 0xfcd   : > { %v3975_v25 = vrot.slane %v3961_v20, %v6743_v1  ;;  %v3991_v26 = vrot.slane %v3977_v21, %v6743_v1  ;;  %v3968_v13 = vrot.slane %v3960_v23, %v6743_v1  ;;  %v3984_v14 = vrot.slane %v3976_v24, %v6743_v1  ;;  %v6053_v20 = vld [vmem:[#allocation10 + $0x104] ss:$16 sps:$4 sm:$0xff]   ;;  %v6056_v21 = vld [vmem:[#allocation10 + $0x10c] ss:$16 sps:$4 sm:$0xff]   ;;  %v6051_v23 = vld [vmem:[#allocation10 + $0x100] ss:$16 sps:$4 sm:$0xff]  }
 0xfce   : > { %v6054_v24 = vld [vmem:[#allocation10 + $0x108] ss:$16 sps:$4 sm:$0xff]  }
 0xfcf   : > { %v3994_v11 = vcombine.low %v3975_v25, %v3991_v26  ;;  %v3993_v27 = vcombine.high %v3968_v13, %v3984_v14  ;;  %v3992_v15 = vcombine.low %v3968_v13, %v3984_v14  ;;  %v3995_v59 = vcombine.high %v3975_v25, %v3991_v26  ;;  %4381 = vmatpush1.bf16.msra.mxu1 %v6033_v10  ;;  %v6057_v25 = vld [vmem:[#allocation11 + $0x178] sm:$0xff]   ;;  %v6084_v60 = vld [vmem:[#allocation11 + $0x188] sm:$0xff]  }
 0xfd0   : > { %4382 = vmatprep.subr.bf16.mxu1 %v6041_v2  ;;  %v6058_v26 = vld [vmem:[#allocation11 + $0x1f8] sm:$0xff]  }
 0xfd1   : > { %4001 = vrot.lane.b32.xlu1 %v3994_v11, %s6421_s26  ;;  %3997 = vrot.lane.b32.xlu0 %v3993_v27, %s6419_s28 }
 0xfd3   : > { %4383 = vmatpush1.bf16.msra.mxu1 %v6039_v16 }
 0xfd4   : > { %4384 = vmatprep.subr.bf16.mxu1 %v6047_v57 }
 0xfd5   : > { %4005 = vrot.lane.b32.xlu0 %v3995_v59, %s6420_s25  ;;  %s7294_s25 = sld [smem:[#allocation30_spill]] }
 0xfd7   : > { %4385 = vmatpush1.bf16.msra.mxu1 %v6045_v18 }
 0xfd8   : > { %4386 = vmatprep.subr.bf16.mxu1 %v6053_v20 }
 0xfdb   : > { %4387 = vmatpush1.bf16.msra.mxu1 %v6051_v23 }
 0xfdc   : > { %5478 = vmatprep.subr.bf16.mxu1 %v6057_v25 }
0x1043   : > { %v3998_v28 = vpop.permute.xlu0 %3997  ;;  %v4002_v29 = vpop.permute.xlu1 %4001 }
0x1044   : > { %v4008_v30 = vsel %vm1351_vm1, %v3992_v15, %v3998_v28  ;;  %v5282_v15 = vld [vmem:[%s7233_s6 + $0x1] ss:$0 sm:$0xff] }
0x1045   : > { %v4009_v33 = vsel %vm1925_vm5, %v4008_v30, %v4002_v29  ;;  %v5283_v28 = vld [vmem:[%s7234_s7 + $0x1] ss:$0 sm:$0xff] }
0x1047   : > { %v4006_v32 = vpop.permute.xlu0 %4005 }
0x1048   : > { %v4010_v34 = vsel %vm1927_vm6, %v4009_v33, %v4006_v32  ;;  %v6059_v32 = vld [vmem:[#allocation11 + $0x138] sm:$0xff]  }
0x1049   : > { %v4011_v1 = vpack.c.bf16 %v4010_v34, %v4010_v34  ;;  %v6060_v33 = vld [vmem:[#allocation11 + $0x1b8] sm:$0xff]  }
0x104b   : > { %5704 = vmatmul.mubr.bf16.vlgmr.msra.gmra.mxu0 %v4011_v1  ;;  %v6061_v1 = vld [vmem:[#allocation11 + $0x170] sm:$0xff]  }
0x104c   : > { %4445 = vmatprep.mubr.bf16.mxu0 %v6417_v22  ;;  %v6020_v22 = vld [vmem:[#allocation10 + $0x1cc] ss:$16 sps:$4 sm:$0xff]   ;;  %4414 = vmatpush1.bf16.msra.mxu0 %v6012_v44  ;;  %v6070_v44 = vld [vmem:[#allocation11 + $0x1e0] sm:$0xff]  }
0x104d   : > { %4415 = vmatprep.subr.bf16.mxu0 %v6020_v22  ;;  %v6073_v22 = vld [vmem:[#allocation11 + $0x158] sm:$0xff]  }
0x1050   : > { %4416 = vmatpush1.bf16.msra.mxu0 %v6018_v50  ;;  %v6075_v50 = vld [vmem:[#allocation11 + $0x118] sm:$0xff]  }
0x1051   : > { %4417 = vmatprep.subr.bf16.mxu0 %v6026_v55  ;;  %v6081_v55 = vld [vmem:[#allocation11 + $0x148] sm:$0xff]  }
0x1054   : > { %4418 = vmatpush1.bf16.msra.mxu0 %v6024_v31  ;;  %v6083_v31 = vld [vmem:[#allocation11 + $0x108] sm:$0xff]  }
0x1055   : > { %4419 = vmatprep.subr.bf16.mxu0 %v6032_v63  ;;  %v6087_v63 = vld [vmem:[#allocation11 + $0x100] sm:$0xff]  }
0x1058   : > { %4420 = vmatpush1.bf16.msra.mxu0 %v6030_v62  ;;  %v6086_v62 = vld [vmem:[#allocation11 + $0x1c0] sm:$0xff]  }
0x1059   : > { %4421 = vmatprep.subr.bf16.mxu0 %v6038_v9  ;;  %v5284_v9 = vld [vmem:[%s7236_s9 + $0x4] sm:$0xf] }
0x105a   : > { %v4195_v10 = vrot.slane %v5284_v9, %v2106_v0  ;;  %v4199_v2 = vrot.slane %v5284_v9, %v2110_v7 }
0x105c   : > { %4422 = vmatpush1.bf16.msra.mxu0 %v6036_v12  ;;  %v4203_v12 = vrot.slane %v5284_v9, %v2114_v5 }
0x105d   : > { %4423 = vmatprep.subr.bf16.mxu0 %v6044_v4  ;;  %v4207_v4 = vrot.slane %v5284_v9, %v2118_v8 }
0x1060   : > { %4424 = vmatpush1.bf16.msra.mxu0 %v6042_v17 }
0x1061   : > { %4425 = vmatprep.subr.bf16.mxu0 %v6050_v58 }
0x1064   : > { %4426 = vmatpush1.bf16.msra.mxu0 %v6048_v19 }
0x1065   : > { %4427 = vmatprep.subr.bf16.mxu0 %v6056_v21 }
0x1068   : > { %4428 = vmatpush1.bf16.msra.mxu0 %v6054_v24 }
0x1069   : > { %5500 = vmatprep.subr.bf16.mxu0 %v6058_v26 }
0x110b   : > { %v4119_v42 = vpop.f32.mrf.mxu0 }
0x110c   : > { %v4120_v36 = vadd.f32 %v5271_v35, %v4119_v42  ;;  %v6062_v35 = vld [vmem:[#allocation11 + $0x1f0] sm:$0xff]  }
0x110d   : > { %v5705_v38 = vpop.f32.mrf.mxu0  ;;  %v6063_v42 = vld [vmem:[#allocation11 + $0x130] sm:$0xff]  }
0x110e   : > { %v7134_v49 = vadd.f32 %v4120_v36, %v6946_v46  ;;  %v6064_v36 = vld [vmem:[#allocation11 + $0x1b0] sm:$0xff]   ;;  %v6065_v38 = vld [vmem:[#allocation11 + $0x168] sm:$0xff]  }
0x110f   : > { %v4122_v39 = vpop.f32.mrf.mxu0 }
0x1110   : > { %4130 = vadd.xlane.f32.xlu1 %v7134_v49  ;;  %v6066_v39 = vld [vmem:[#allocation11 + $0x1e8] sm:$0xff]  }
0x1111   : > { %v5706_v40 = vpop.f32.mrf.mxu0 }
0x1112   : > { %v6067_v40 = vld [vmem:[#allocation11 + $0x128] sm:$0xff]  }
0x1199   : > { %v4131_v46 = vpop.xlane.xlu1 %4130 }
0x119a   : > { %v4132_v51 = vmul.f32 0.0078125, %v4131_v46  ;;  %v6076_v46 = vld [vmem:[#allocation11 + $0x198] sm:$0xff]  }
0x119c   : > { %v4133_v52 = vsub.f32 %v7134_v49, %v4132_v51  ;;  %v6077_v51 = vld [vmem:[#allocation11 + $0x150] sm:$0xff]  }
0x119e   : > { %v4134_v53 = vmul.f32 %v4133_v52, %v4133_v52 }
0x11a0   : > { %4135 = vadd.xlane.f32.xlu0 %v4134_v53  ;;  %v6079_v53 = vld [vmem:[#allocation11 + $0x110] sm:$0xff]  }
0x1229   : > { %v4136_v13 = vpop.xlane.xlu0 %4135 }
0x122a   : > { %v4137_v14 = vmul.f32 0.0078125, %v4136_v13 }
0x122c   : > { %v4138_v11 = vadd.f32 1e-05, %v4137_v14 }
0x122e   : > { %6135 = vrsqrt.f32 %v4138_v11 }
0x123b   : > { %v6136_v27 = vpop.eup %6135 }
0x123c   : > { %v4140_v59 = vmul.f32 %v6136_v27, %v4133_v52  ;;  %v6078_v52 = vld [vmem:[#allocation11 + $0x1d0] sm:$0xff]  }
0x123e   : > { %v4147_v29 = vmul.f32 %v5282_v15, %v4140_v59  ;;  %v5318_v59 = vld [vmem:[%s7238_s11 + $0x1] ss:$0 sm:$0xff] }
0x1240   : > { %v4154_v30 = vadd.f32 %v5283_v28, %v4147_v29 }
0x1242   : > { %v4155_v34 = vpack.c.bf16 %v4154_v30, %v4154_v30 }
0x1244   : > { %4405 = vmatmul.mubr.bf16.vlgmr.msra.gmra.mxu1 %v4155_v34  ;;  %4446 = vmatmul.mubr.bf16.vlgmr.msra.gmra.mxu0 %v4155_v34 }
0x1245   : > { %5479 = vmatpush3.bf16.msra.mxu1 %v6059_v32  ;;  %5501 = vmatpush3.bf16.msra.mxu0 %v6060_v33 }
0x1246   : > { %5480 = vmatprep.subr.bf16.mxu1 %v6061_v1  ;;  %5502 = vmatprep.subr.bf16.mxu0 %v6062_v35 }
0x1249   : > { %5481 = vmatpush3.bf16.msra.mxu1 %v6063_v42  ;;  %5503 = vmatpush3.bf16.msra.mxu0 %v6064_v36 }
0x124a   : > { %5482 = vmatprep.subr.bf16.mxu1 %v6065_v38  ;;  %5504 = vmatprep.subr.bf16.mxu0 %v6066_v39  ;;  %v6089_v39 = vld [vmem:[#allocation13 + $0x38] sm:$0xff]  }
0x124d   : > { %5483 = vmatpush3.bf16.msra.mxu1 %v6067_v40  ;;  %5505 = vmatpush3.bf16.msra.mxu0 %v6068_v41  ;;  %v6090_v40 = vld [vmem:[#allocation13 + $0x30] sm:$0xff]  }
0x124e   : > { %5484 = vmatprep.subr.bf16.mxu1 %v6069_v43  ;;  %5506 = vmatprep.subr.bf16.mxu0 %v6070_v44 }
0x1251   : > { %5485 = vmatpush3.bf16.msra.mxu1 %v6071_v45  ;;  %5507 = vmatpush3.bf16.msra.mxu0 %v6072_v47  ;;  %v6091_v47 = vld [vmem:[#allocation13 + $0x28] sm:$0xff]  }
0x1252   : > { %5486 = vmatprep.subr.bf16.mxu1 %v6073_v22  ;;  %5508 = vmatprep.subr.bf16.mxu0 %v6074_v48  ;;  %v6092_v22 = vld [vmem:[#allocation13 + $0x20] sm:$0xff]   ;;  %v6094_v48 = vld [vmem:[#allocation13 + $0x10] sm:$0xff]  }
0x1255   : > { %5487 = vmatpush3.bf16.msra.mxu1 %v6075_v50  ;;  %5509 = vmatpush3.bf16.msra.mxu0 %v6076_v46  ;;  %v6095_v50 = vld [vmem:[#allocation13 + $0x8] sm:$0xff]   ;;  %v6096_v46 = vld [vmem:[#allocation13] sm:$0xff]  }
0x1256   : > { %5488 = vmatprep.subr.bf16.mxu1 %v6077_v51  ;;  %5510 = vmatprep.subr.bf16.mxu0 %v6078_v52 }
0x1259   : > { %5489 = vmatpush3.bf16.msra.mxu1 %v6079_v53  ;;  %5511 = vmatpush3.bf16.msra.mxu0 %v6080_v37 }
0x125a   : > { %5490 = vmatprep.subr.bf16.mxu1 %v6081_v55  ;;  %5512 = vmatprep.subr.bf16.mxu0 %v6082_v56  ;;  %v5351_v55 = vld [vmem:[%s7239_s12] ss:$0 sm:$0xff] }
0x125d   : > { %5491 = vmatpush3.bf16.msra.mxu1 %v6083_v31  ;;  %5513 = vmatpush3.bf16.msra.mxu0 %v6084_v60  ;;  %v5352_v31 = vld [vmem:[%s7293_s29] ss:$0 sm:$0xff] }
0x125e   : > { %5492 = vmatprep.subr.bf16.mxu1 %v6085_v61  ;;  %5514 = vmatprep.subr.bf16.mxu0 %v6086_v62  ;;  %v5353_v62 = vld [vmem:[%s7294_s25] ss:$0 sm:$0xff] }
0x1261   : > { %5493 = vmatpush3.bf16.msra.mxu1 %v6087_v63  ;;  %5515 = vmatpush3.bf16.msra.mxu0 %v6088_v6 }
0x1262   : > { %5707 = vmatprep.subr.bf16.mxu1 %v6416_v3 }
0x1304   : > { %v4406_v16 = vpop.f32.mrf.mxu1  ;;  %v4447_v17 = vpop.f32.mrf.mxu0 }
0x1305   : > { %v4407_v57 = vadd.f32 %v4406_v16, %v4195_v10  ;;  %v4448_v58 = vadd.f32 %v4447_v17, %v4203_v12 }
0x1306   : > { %v4408_v18 = vpop.f32.mrf.mxu1  ;;  %v4449_v19 = vpop.f32.mrf.mxu0 }
0x1307   : > { %v4409_v20 = vadd.f32 %v4408_v18, %v4199_v2  ;;  %v4450_v21 = vadd.f32 %v4449_v19, %v4207_v4  ;;  %v4454_v23 = vmax.f32 %v4407_v57, 0.0  ;;  %v4456_v24 = vmax.f32 %v4448_v58, 0.0 }
0x1308   : > { %v4410_v0 = vpop.f32.mrf.mxu1  ;;  %v4451_v25 = vpop.f32.mrf.mxu0 }
0x1309   : > { %v4455_v26 = vmax.f32 %v4409_v20, 0.0  ;;  %v4457_v5 = vmax.f32 %v4450_v21, 0.0  ;;  %v4458_v54 = vpack.c.bf16 %v4454_v23, %v4454_v23  ;;  %v4460_v8 = vpack.c.bf16 %v4456_v24, %v4456_v24 }
0x130a   : > { %v4411_v13 = vpop.f32.mrf.mxu1  ;;  %v4452_v14 = vpop.f32.mrf.mxu0 }
0x130b   : > { %v4459_v7 = vpack.c.bf16 %v4455_v26, %v4455_v26  ;;  %v4461_v11 = vpack.c.bf16 %v4457_v5, %v4457_v5 }
0x130d   : > { %4759 = vmatprep.mubr.bf16.mxu1 %v4459_v7  ;;  %4799 = vmatprep.mubr.bf16.mxu0 %v4461_v11 }
0x130e   : > { %4760 = vmatmul.mubr.bf16.vlgmr.msra.gmra.mxu1 %v4458_v54  ;;  %4800 = vmatmul.mubr.bf16.vlgmr.msra.gmra.mxu0 %v4460_v8 }
0x130f   : > { %5723 = vmatprep.mubr.msk.bf16.mxu1 %vm6418_vm0, %v6416_v3  ;;  %5708 = vmatpush3.bf16.msra.mxu1 %v6089_v39 }
0x1310   : > { %5709 = vmatprep.subr.bf16.mxu1 %v6416_v3 }
0x1313   : > { %5710 = vmatpush3.bf16.msra.mxu1 %v6090_v40 }
0x1314   : > { %5711 = vmatprep.subr.bf16.mxu1 %v6416_v3 }
0x1317   : > { %5712 = vmatpush3.bf16.msra.mxu1 %v6091_v47 }
0x1318   : > { %5713 = vmatprep.subr.bf16.mxu1 %v6416_v3 }
0x131b   : > { %5714 = vmatpush3.bf16.msra.mxu1 %v6092_v22 }
0x131c   : > { %5715 = vmatprep.subr.bf16.mxu1 %v6416_v3 }
0x13ce   : > { %v5494_v27 = vpop.f32.mrf.mxu1  ;;  %v5516_v15 = vpop.f32.mrf.mxu0 }
0x13d0   : > { %v5495_v28 = vpop.f32.mrf.mxu1  ;;  %v5517_v29 = vpop.f32.mrf.mxu0 }
0x13d1   : > { %v5496_v30 = vadd.f32 %v5495_v28, %v5494_v27  ;;  %v5518_v1 = vadd.f32 %v5517_v29, %v5516_v15 }
0x13d2   : > { %v5497_v32 = vpop.f32.mrf.mxu1  ;;  %v5519_v33 = vpop.f32.mrf.mxu0 }
0x13d3   : > { %v4762_v34 = vadd.f32 %v5496_v30, %v5318_v59 }
0x13d4   : > { %v5498_v35 = vpop.f32.mrf.mxu1  ;;  %v5520_v42 = vpop.f32.mrf.mxu0 }
0x13d5   : > { %v4802_v36 = vadd.f32 %v5518_v1, %v4762_v34 }
0x13d7   : > { %v4807_v38 = vadd.f32 %v4802_v36, %v7134_v49  ;;  %v6093_v49 = vld [vmem:[#allocation13 + $0x18] sm:$0xff]  }
0x13d8   : > { %5716 = vmatpush3.bf16.msra.mxu1 %v6093_v49 }
0x13d9   : > { %4810 = vadd.xlane.f32.xlu0 %v4807_v38  ;;  %5717 = vmatprep.subr.bf16.mxu1 %v6416_v3 }
0x13dc   : > { %5718 = vmatpush3.bf16.msra.mxu1 %v6094_v48 }
0x13dd   : > { %5719 = vmatprep.subr.bf16.mxu1 %v6416_v3 }
0x13e0   : > { %5720 = vmatpush3.bf16.msra.mxu1 %v6095_v50 }
0x13e1   : > { %5721 = vmatprep.subr.bf16.mxu1 %v6416_v3 }
0x13e4   : > { %5722 = vmatpush3.bf16.msra.mxu1 %v6096_v46 }
0x1462   : > { %v4811_v41 = vpop.xlane.xlu0 %4810 }
0x1463   : > { %v4812_v43 = vmul.f32 0.0078125, %v4811_v41 }
0x1465   : > { %v4813_v44 = vsub.f32 %v4807_v38, %v4812_v43 }
0x1467   : > { %v4814_v45 = vmul.f32 %v4813_v44, %v4813_v44 }
0x1469   : > { %4815 = vadd.xlane.f32.xlu1 %v4814_v45 }
0x14f2   : > { %v4816_v51 = vpop.xlane.xlu1 %4815 }
0x14f3   : > { %v4817_v52 = vmul.f32 0.0078125, %v4816_v51 }
0x14f5   : > { %v4818_v53 = vadd.f32 1e-05, %v4817_v52 }
0x14f7   : > { %6137 = vrsqrt.f32 %v4818_v53 }
0x1504   : > { %v6138_v37 = vpop.eup %6137 }
0x1505   : > { %v4820_v56 = vmul.f32 %v6138_v37, %v4813_v44 }
0x1507   : > { %v4827_v60 = vmul.f32 %v5351_v55, %v4820_v56 }
0x1509   : > { %v4834_v61 = vadd.f32 %v5352_v31, %v4827_v60 }
0x150b   : > { %v4835_v3 = vpack.c.bf16 %v4834_v61, %v4834_v61 }
0x150d   : > { %5724 = vmatmul.mubr.bf16.vlgmr.msra.gmra.mxu1 %v4835_v3 }
0x15cd   : > { %v4941_v63 = vpop.f32.mrf.mxu1 }
0x15ce   : > { %v4942_v6 = vadd.f32 %v5353_v62, %v4941_v63 }
0x15cf   : > { %v5725_v9 = vpop.f32.mrf.mxu1 }
0x15d0   : > { %4947 = vst [vmem:[%s623_s17] sm:$0xff] %v4942_v6 }
0x15d1   : > { %v4944_v10 = vpop.f32.mrf.mxu1 }
0x15d2   : > { %6337 = shalt.err (!%p6334_p1)
}
0x15d3   : > { %s6338_s29 = scalar_lea.hbm %s7184_s23, 128  ;;  %s6342_s28 = scalar_lea.hbm %s7295_s15, 256 }
0x15d4   : > { %p6339_p3 = scmp.ne.s32.totalorder %s7184_s23, %s6338_s29  ;;  %p6343_p12 = scmp.lt.s32.totalorder %s7184_s23, %s7295_s15 }
0x15d5   : > { %p6344_p11 = scmp.lt.s32.totalorder %s6342_s28, %s6338_s29 }
0x15d6   : > { %p6340_p8 = pnand %p6339_p3, %p7296_p5 }
0x15d7   : > { %p6345_p7 = por %p6344_p11, %p6343_p12 }
0x15d8   : > { %p6341_p6 = pneg %p6340_p8 }
0x15da   : > { %p6346_p2 = pnand %p6345_p7, %p6341_p6 }
0x15dc   : > { %6349 = shalt.err (!%p6346_p2)
}
0x15dd   : > { %5753 = dma.vmem_to_hbm [thread:$0]  (%p7296_p5), %s7186_s1, 128, %s7184_s23, %s4949_s4   ;;  %v5726_v12 = vpop.f32.mrf.mxu1 }
0x15de PF: > { %s4974_s17 = sand.u32 1, %s6388_s21   ;;  %p7297_p9 = scmp.ne.s32.totalorder %s7280_s20, 0 }
0x15df   : > { %p7298_p10 = scmp.ge.s32.totalorder %s6400_s24, 2  ;;  %s4975_s3 = scalar_lea.sflag [#allocation4], %s4974_s17 }
0x15e1   : > { %p5779_p4 = pnand %p7298_p10, %p7297_p9 }
0x15e3   : > { %p5780_p13 = pneg %p5779_p4 }
0x15e5   : > { %6383 = dma.done.wait (%p5780_p13), %s4975_s3, 128  }
0x15e6   : > { %6385 = vsyncadd (%p5780_p13), %s4975_s3, 4294967168  ;;  %s7299_s16 = sld [smem:[#allocation20_spill]]  ;;  %p32_p0 = scmp.ge.s32.totalorder %s6621_s19, 4  }
0x15e7   : > { %s7300_s23 = sld [smem:[#allocation21_spill]]  ;;  %s7301_s21 = smov %s6392_s22 }
0x15e8   : > { %s7303_s24 = smov %s6621_s19  ;;  %34 = sbr.rel (!%p32_p0) target bundleno = 19 (0x13), region = 164 }
0x15ec   : > { %s7302_s22 = smov %s7299_s16 }
0x15ed   :  { %4980 = vsyncpa [#allocation3], 1 }
0x15ee   :  { %4982 = vsyncpa [#allocation3 + $0x1], 1 }
0x15ef   :  { %4983 = vsyncpa [#allocation6], 1 }
0x15f0   :  { %4984 = vsyncpa [#allocation9], 1 }
0x15f1   :  { %4985 = vsyncpa [#allocation12], 1 }
0x15f2   :  { %4986 = vsyncpa [#allocation4], 1 }
0x15f3   :  { %4988 = vsyncpa [#allocation4 + $0x1], 1 }

</bundles_post_ra>
